<compile_context>
chip_gen: v6e
topology: v6e:2x2x1
jax: 0.10.0
libtpu: 0.0.40
codegen_flags: <defaults>
</compile_context>

<pallas_src>
import functools

import jax
import jax.numpy as jnp
import numpy as np
from jax.experimental import pallas as pl
from jax.experimental.pallas import tpu as pltpu


_VMEM_LIMIT = 48 * 1024 * 1024   # explicit scoped-VMEM budget (fits all gens)


# --------------------------------------------------------------------------
# helpers
# --------------------------------------------------------------------------
def _const_spec(block_shape, index_map):
    """BlockSpec for a grid-invariant operand: fetched once, single buffer."""
    if hasattr(pl, "Buffered"):
        try:
            return pl.BlockSpec(block_shape, index_map,
                                pipeline_mode=pl.Buffered(1))
        except TypeError:        # older jax without pipeline_mode kwarg
            pass
    return pl.BlockSpec(block_shape, index_map)


def _choose_bm(M, target=1024, min_steps=4):
    """Row tile for the 1x1 kernels: no padding, no output slicing.

    - M <= target: single block (full leading dim is always a legal block).
    - else: largest multiple-of-8 divisor of M, capped so the grid keeps
      >= min_steps steps (pipelining / megacore health).
    - worst case (no such divisor): cdiv grid; Pallas drops out-of-bounds
      writes of the ragged final block.
    """
    if M <= target:
        return M
    cap = min(target, max(8, ((M // min_steps) // 8) * 8))
    for bm in range(cap, 7, -8):
        if M % bm == 0:
            return bm
    return cap


def _choose_th(H, cap=16):
    """Largest divisor of H that is <= cap (halo overhead (th+2)/th)."""
    for th in range(min(cap, H), 0, -1):
        if H % th == 0:
            return th
    return H


# --------------------------------------------------------------------------
# Kernel 1 (non-fuse path): 1x1 conv (no bias) + folded BN
#   out = (x @ w) * scale + shift
# --------------------------------------------------------------------------
def conv1x1_bn_kernel(x_ref, w_ref, scale_ref, shift_ref, o_ref):
    acc = jnp.dot(x_ref[...], w_ref[...], preferred_element_type=jnp.float32)
    o_ref[...] = (acc * scale_ref[...] + shift_ref[...]).astype(o_ref.dtype)


def conv1x1_bn(x_flat, w, scale, shift, bm_target=1024):
    M, cin = x_flat.shape
    cout = w.shape[1]
    bm = _choose_bm(M, bm_target)
    return pl.pallas_call(
        conv1x1_bn_kernel,
        out_shape=jax.ShapeDtypeStruct((M, cout), x_flat.dtype),
        grid_spec=pltpu.PrefetchScalarGridSpec(
            num_scalar_prefetch=0,
            grid=(pl.cdiv(M, bm),),
            in_specs=[
                pl.BlockSpec((bm, cin), lambda i: (i, 0)),
                _const_spec((cin, cout), lambda i: (0, 0)),
                _const_spec((1, cout), lambda i: (0, 0)),
                _const_spec((1, cout), lambda i: (0, 0)),
            ],
            out_specs=pl.BlockSpec((bm, cout), lambda i: (i, 0)),
        ),
        compiler_params=pltpu.CompilerParams(
            dimension_semantics=("parallel",),
            vmem_limit_bytes=_VMEM_LIMIT),
    )(x_flat, w, scale, shift)


# --------------------------------------------------------------------------
# Kernel 2 (fuse path, FUSED): 1x1 conv + BN + attention fuse in one pass.
#   xm  = (x @ w1) * scale + shift
#   s_k = sum_c xm_c * waxT[k,c] + sum_c y_c * wayT[k,c] + ba_k   (k = 0,1)
#   out = xm * sigmoid(s0) + y * sigmoid(s1)
# The 2-channel logits are VPU mul + cross-lane reduce; ba lives in SMEM.
# --------------------------------------------------------------------------
def conv1x1_bn_att_kernel(x_ref, y_ref, w1_ref, scale_ref, shift_ref,
                          waxT_ref, wayT_ref, ba_ref, o_ref):
    xm = jnp.dot(x_ref[...], w1_ref[...], preferred_element_type=jnp.float32)
    xm = xm * scale_ref[...] + shift_ref[...]                  # (bm, Cmid) f32
    y = y_ref[...]

    s0 = jnp.sum(xm * waxT_ref[0:1, :] + y * wayT_ref[0:1, :],
                 axis=-1, keepdims=True) + ba_ref[0]
    s1 = jnp.sum(xm * waxT_ref[1:2, :] + y * wayT_ref[1:2, :],
                 axis=-1, keepdims=True) + ba_ref[1]
    o_ref[...] = (xm * jax.nn.sigmoid(s0)
                  + y * jax.nn.sigmoid(s1)).astype(o_ref.dtype)


def conv1x1_bn_att(x_flat, y_flat, w1, scale, shift, waxT, wayT, ba,
                   bm_target=1024):
    M, cin = x_flat.shape
    cmid = w1.shape[1]
    bm = _choose_bm(M, bm_target)
    return pl.pallas_call(
        conv1x1_bn_att_kernel,
        out_shape=jax.ShapeDtypeStruct((M, cmid), x_flat.dtype),
        grid_spec=pltpu.PrefetchScalarGridSpec(
            num_scalar_prefetch=0,
            grid=(pl.cdiv(M, bm),),
            in_specs=[
                pl.BlockSpec((bm, cin), lambda i: (i, 0)),
                pl.BlockSpec((bm, cmid), lambda i: (i, 0)),
                _const_spec((cin, cmid), lambda i: (0, 0)),
                _const_spec((1, cmid), lambda i: (0, 0)),
                _const_spec((1, cmid), lambda i: (0, 0)),
                _const_spec((2, cmid), lambda i: (0, 0)),
                _const_spec((2, cmid), lambda i: (0, 0)),
                pl.BlockSpec(memory_space=pltpu.MemorySpace.SMEM),
            ],
            out_specs=pl.BlockSpec((bm, cmid), lambda i: (i, 0)),
        ),
        compiler_params=pltpu.CompilerParams(
            dimension_semantics=("parallel",),
            vmem_limit_bytes=_VMEM_LIMIT),
    )(x_flat, y_flat, w1, scale, shift, waxT, wayT, ba)


# --------------------------------------------------------------------------
# Kernel 3: 3x3 conv (stride 1, pad 1, no bias) + folded BN.
# The padded NHWC input stays in HBM (memory_space=pl.ANY); the kernel DMAs
# overlapping (th+2, W+2, C) row windows into a VMEM double buffer, with a
# cross-step prefetch along the row-tile axis.  The 3x3 im2col happens in
# VMEM and feeds a single (th*W, 9C) @ (9C, Cout) matmul.
# --------------------------------------------------------------------------
def conv3x3_bn_kernel(xp_hbm, w_ref, scale_ref, shift_ref, o_ref, xbuf, sem):
    _, th2, wp2, cin = xbuf.shape            # (2, th+2, W+2, C)
    th, W = th2 - 2, wp2 - 2
    cout = o_ref.shape[-1]

    n = pl.program_id(0)
    t = pl.program_id(1)
    num_t = pl.num_programs(1)
    slot = t % 2

    def start_fetch(tile, slot_):
        pltpu.make_async_copy(
            xp_hbm.at[n, pl.ds(tile * th, th2)],   # overlapping row window
            xbuf.at[slot_],
            sem.at[slot_]).start()

    # Cold fetch at the start of every image (keeps the chain valid even when
    # the N axis is sharded across TensorCores).
    @pl.when(t == 0)
    def _():
        start_fetch(t, slot)

    # Prefetch the next row tile of this image into the other slot.
    @pl.when(t + 1 < num_t)
    def _():
        start_fetch(t + 1, 1 - slot)

    pltpu.make_async_copy(
        xp_hbm.at[n, pl.ds(0, th2)], xbuf.at[slot], sem.at[slot]).wait()

    cur = xbuf.at[slot]                      # ref view: (th+2, W+2, C)
    patches = jnp.concatenate(
        [cur[dh:dh + th, dw:dw + W, :] for dh in range(3) for dw in range(3)],
        axis=-1).reshape(th * W, 9 * cin)    # in-VMEM im2col
    acc = jnp.dot(patches, w_ref[...], preferred_element_type=jnp.float32)
    out = acc * scale_ref[...] + shift_ref[...]
    o_ref[0] = out.reshape(th, W, cout).astype(o_ref.dtype)


def conv3x3_bn(x_nhwc, w, scale, shift):
    N, H, W, C = x_nhwc.shape
    Cout = w.shape[-1]
    th = _choose_th(H)
    num_t = H // th

    # Single 1-px halo pad in HBM; everything else stays in-kernel.
    xp = jnp.pad(x_nhwc, ((0, 0), (1, 1), (1, 1), (0, 0)))   # (N, H+2, W+2, C)
    w_flat = w.reshape(9 * C, Cout)                          # (kh,kw,Cin)->9C

    return pl.pallas_call(
        conv3x3_bn_kernel,
        out_shape=jax.ShapeDtypeStruct((N, H, W, Cout), x_nhwc.dtype),
        grid_spec=pltpu.PrefetchScalarGridSpec(
            num_scalar_prefetch=0,
            grid=(N, num_t),
            in_specs=[
                pl.BlockSpec(memory_space=pl.ANY),           # raw HBM ref
                _const_spec((9 * C, Cout), lambda n, t: (0, 0)),
                _const_spec((1, Cout), lambda n, t: (0, 0)),
                _const_spec((1, Cout), lambda n, t: (0, 0)),
            ],
            out_specs=pl.BlockSpec((1, th, W, Cout),
                                   lambda n, t: (n, t, 0, 0)),
            scratch_shapes=[
                pltpu.VMEM((2, th + 2, W + 2, C), x_nhwc.dtype),
                pltpu.SemaphoreType.DMA((2,)),
            ],
        ),
        compiler_params=pltpu.CompilerParams(
            dimension_semantics=("parallel", "arbitrary"),
            vmem_limit_bytes=_VMEM_LIMIT),
    )(xp, w_flat, scale, shift)


# --------------------------------------------------------------------------
# Parameter init (deterministic, mirrors the PyTorch __init__ shapes/bounds)
# --------------------------------------------------------------------------
def fold_bn(gamma, beta, mean, var, eps=1e-5):
    scale = gamma * jax.lax.rsqrt(var + eps)
    shift = beta - mean * scale
    return scale.reshape(1, -1), shift.reshape(1, -1)


def init_abf_params(key, in_channel, mid_channel, out_channel, fuse):
    ks = jax.random.split(key, 12)
    # conv1: kaiming_uniform(a=1) -> bound = sqrt(3 / fan_in)
    b1 = float(np.sqrt(3.0 / in_channel))
    w1 = jax.random.uniform(ks[0], (in_channel, mid_channel), jnp.float32, -b1, b1)
    # conv2: fan_in = mid_channel * 9 ; stored as (kh, kw, Cin, Cout)
    b2 = float(np.sqrt(3.0 / (mid_channel * 9)))
    w2 = jax.random.uniform(ks[1], (3, 3, mid_channel, out_channel), jnp.float32, -b2, b2)
    # BatchNorm (inference) params
    g1 = jax.random.uniform(ks[2], (mid_channel,), jnp.float32, 0.5, 1.5)
    be1 = jax.random.uniform(ks[3], (mid_channel,), jnp.float32, -0.2, 0.2)
    m1 = jax.random.uniform(ks[4], (mid_channel,), jnp.float32, -0.2, 0.2)
    v1 = jax.random.uniform(ks[5], (mid_channel,), jnp.float32, 0.5, 1.5)
    g2 = jax.random.uniform(ks[6], (out_channel,), jnp.float32, 0.5, 1.5)
    be2 = jax.random.uniform(ks[7], (out_channel,), jnp.float32, -0.2, 0.2)
    m2 = jax.random.uniform(ks[8], (out_channel,), jnp.float32, -0.2, 0.2)
    v2 = jax.random.uniform(ks[9], (out_channel,), jnp.float32, 0.5, 1.5)
    scale1, shift1 = fold_bn(g1, be1, m1, v1)
    scale2, shift2 = fold_bn(g2, be2, m2, v2)
    params = dict(w1=w1, scale1=scale1, shift1=shift1,
                  w2=w2, scale2=scale2, shift2=shift2, fuse=fuse)
    if fuse:
        fan_in = 2 * mid_channel                 # att_conv: default Conv2d init
        ba_b = float(1.0 / np.sqrt(fan_in))
        wa = jax.random.uniform(ks[10], (2 * mid_channel, 2), jnp.float32, -ba_b, ba_b)
        ba = jax.random.uniform(ks[11], (2,), jnp.float32, -ba_b, ba_b)
        params.update(wa_xT=wa[:mid_channel].T,       # (2, mid)
                      wa_yT=wa[mid_channel:].T,       # (2, mid)
                      ba=ba)                          # (2,)  -> SMEM
    return params


# --------------------------------------------------------------------------
# Forward (mirrors ABF.forward). Returns (y, x) in NCHW like PyTorch.
# --------------------------------------------------------------------------
def nearest_resize_nhwc(x, oh, ow):
    # PyTorch F.interpolate(mode='nearest'): src = floor(dst * in / out)
    h, w = x.shape[1], x.shape[2]
    ridx = (jnp.arange(oh) * h) // oh
    cidx = (jnp.arange(ow) * w) // ow
    return x[:, ridx][:, :, cidx]


def abf_forward(params, x_nchw, y_nchw=None, shape=None, out_shape=None):
    n, cin, h, w = x_nchw.shape
    mid = params["w1"].shape[1]
    x = jnp.transpose(x_nchw, (0, 2, 3, 1))                      # NHWC
    x_flat = x.reshape(n * h * w, cin)

    if params["fuse"]:
        assert shape == h and shape == w, "fuse path requires shape == h == w"
        yn = jnp.transpose(y_nchw, (0, 2, 3, 1))                 # NHWC
        yr = nearest_resize_nhwc(yn, shape, shape)               # (n, shape, shape, mid)
        y_flat = yr.reshape(n * shape * shape, mid)
        x_mid_flat = conv1x1_bn_att(x_flat, y_flat, params["w1"],
                                    params["scale1"], params["shift1"],
                                    params["wa_xT"], params["wa_yT"],
                                    params["ba"])
    else:
        x_mid_flat = conv1x1_bn(x_flat, params["w1"], params["scale1"],
                                params["shift1"])

    x_mid = x_mid_flat.reshape(n, h, w, mid)
    if x_mid.shape[2] != out_shape:
        x_mid = nearest_resize_nhwc(x_mid, out_shape, out_shape)

    y_out = conv3x3_bn(x_mid, params["w2"], params["scale2"], params["shift2"])
    return (jnp.transpose(y_out, (0, 3, 1, 2)),
            jnp.transpose(x_mid, (0, 3, 1, 2)))


# --------------------------------------------------------------------------
# Pure-JAX reference (for correctness check)
# --------------------------------------------------------------------------
def abf_reference(params, x_nchw, y_nchw, shape, out_shape):
    x = jnp.einsum("nchw,cm->nmhw", x_nchw, params["w1"])
    x = x * params["scale1"].reshape(1, -1, 1, 1) + params["shift1"].reshape(1, -1, 1, 1)
    if params["fuse"]:
        hy, wy = y_nchw.shape[2], y_nchw.shape[3]
        ridx = (jnp.arange(shape) * hy) // shape
        cidx = (jnp.arange(shape) * wy) // shape
        yr = y_nchw[:, :, ridx][:, :, :, cidx]
        wa = jnp.concatenate([params["wa_xT"].T, params["wa_yT"].T], axis=0)
        z_in = jnp.concatenate([x, yr], axis=1)
        s = jnp.einsum("nchw,co->nohw", z_in, wa) + params["ba"].reshape(1, 2, 1, 1)
        z = jax.nn.sigmoid(s)
        x = x * z[:, 0:1] + yr * z[:, 1:2]
    if x.shape[-1] != out_shape:
        h, w = x.shape[2], x.shape[3]
        ridx = (jnp.arange(out_shape) * h) // out_shape
        cidx = (jnp.arange(out_shape) * w) // out_shape
        x = x[:, :, ridx][:, :, :, cidx]
    w_oihw = jnp.transpose(params["w2"], (3, 2, 0, 1))
    y = jax.lax.conv_general_dilated(x, w_oihw, (1, 1), "SAME",
                                     dimension_numbers=("NCHW", "OIHW", "NCHW"))
    y = y * params["scale2"].reshape(1, -1, 1, 1) + params["shift2"].reshape(1, -1, 1, 1)
    return y, x


if __name__ == "__main__":
    key = jax.random.PRNGKey(0)
    k_p, k_p2, k_x, k_y = jax.random.split(key, 4)

    n, in_channel, mid_channel, out_channel = 2, 8, 8, 8
    h = w = 16
    shape = 16          # y is nearest-upsampled to (shape, shape)
    out_shape = 16      # x already at out_shape -> no final interpolation

    x = jax.random.normal(k_x, (n, in_channel, h, w), jnp.float32)
    y = jax.random.normal(k_y, (n, mid_channel, 8, 8), jnp.float32)

    # --- fuse=True path (fused conv1x1+BN+attention kernel + conv3x3) ---
    params = init_abf_params(k_p, in_channel, mid_channel, out_channel, fuse=True)
    y_out, x_mid = abf_forward(params, x, y, shape=shape, out_shape=out_shape)
    jax.block_until_ready((y_out, x_mid))
    y_ref, x_ref = abf_reference(params, x, y, shape, out_shape)
    np.testing.assert_allclose(np.asarray(x_mid), np.asarray(x_ref), atol=1e-4, rtol=1e-4)
    np.testing.assert_allclose(np.asarray(y_out), np.asarray(y_ref), atol=1e-4, rtol=1e-4)

    # --- fuse=False path (plain conv1x1+BN kernel, with final resize) ---
    params_nf = init_abf_params(k_p2, in_channel, mid_channel, out_channel, fuse=False)
    y2, x2 = abf_forward(params_nf, x, None, shape=None, out_shape=8)
    jax.block_until_ready((y2, x2))
    y2_ref, x2_ref = abf_reference(params_nf, x, None, None, 8)
    np.testing.assert_allclose(np.asarray(x2), np.asarray(x2_ref), atol=1e-4, rtol=1e-4)
    np.testing.assert_allclose(np.asarray(y2), np.asarray(y2_ref), atol=1e-4, rtol=1e-4)

    print("KERNEL_OK")
</pallas_src>

<mosaic_0001>
module attributes {stable_mosaic.version = 11 : i64} {
  func.func @conv1x1_bn_att_kernel(%arg0: i32, %arg1: memref<512x8xf32, #tpu.memory_space<vmem>>, %arg2: memref<512x8xf32, #tpu.memory_space<vmem>>, %arg3: memref<8x8xf32, #tpu.memory_space<vmem>>, %arg4: memref<1x8xf32, #tpu.memory_space<vmem>>, %arg5: memref<1x8xf32, #tpu.memory_space<vmem>>, %arg6: memref<2x8xf32, #tpu.memory_space<vmem>>, %arg7: memref<2x8xf32, #tpu.memory_space<vmem>>, %arg8: memref<2xf32, #tpu.memory_space<smem>>, %arg9: memref<512x8xf32, #tpu.memory_space<vmem>>) attributes {dimension_semantics = [#tpu.dimension_semantics<parallel>], iteration_bounds = array<i64: 1>, scalar_prefetch = 0 : i64, scratch_operands = 0 : i64, tpu.core_type = #tpu.core_type<tc>, window_params = [{transform_indices = @transform_0, window_bounds = array<i64: 512, 8>}, {transform_indices = @transform_1, window_bounds = array<i64: 512, 8>}, {pipeline_mode = #tpu.pipeline_mode<synchronous>, transform_indices = @transform_2, window_bounds = array<i64: 8, 8>}, {pipeline_mode = #tpu.pipeline_mode<synchronous>, transform_indices = @transform_3, window_bounds = array<i64: 1, 8>}, {pipeline_mode = #tpu.pipeline_mode<synchronous>, transform_indices = @transform_4, window_bounds = array<i64: 1, 8>}, {pipeline_mode = #tpu.pipeline_mode<synchronous>, transform_indices = @transform_5, window_bounds = array<i64: 2, 8>}, {pipeline_mode = #tpu.pipeline_mode<synchronous>, transform_indices = @transform_6, window_bounds = array<i64: 2, 8>}, {transform_indices = @transform_7, window_bounds = array<i64: 2>}, {transform_indices = @transform_8, window_bounds = array<i64: 512, 8>}]} {
    %c0 = arith.constant 0 : index
    %c0_0 = arith.constant 0 : index
    %0 = vector.load %arg1[%c0, %c0_0] : memref<512x8xf32, #tpu.memory_space<vmem>>, vector<512x8xf32>
    %c0_1 = arith.constant 0 : index
    %c0_2 = arith.constant 0 : index
    %1 = vector.load %arg3[%c0_1, %c0_2] : memref<8x8xf32, #tpu.memory_space<vmem>>, vector<8x8xf32>
    %cst = arith.constant dense<0.000000e+00> : vector<512x8xf32>
    %2 = tpu.matmul %0, %1, %cst {dimension_numbers = #tpu.dot_dimension_numbers<[1], [0], [0], [1], [0, 0, 1, 1], [], []>} : vector<512x8xf32>, vector<8x8xf32>, vector<512x8xf32> -> vector<512x8xf32>
    %c0_3 = arith.constant 0 : index
    %c0_4 = arith.constant 0 : index
    %3 = vector.load %arg4[%c0_3, %c0_4] : memref<1x8xf32, #tpu.memory_space<vmem>>, vector<1x8xf32>
    %4 = vector.broadcast %3 : vector<1x8xf32> to vector<512x8xf32>
    %5 = arith.mulf %2, %4 : vector<512x8xf32>
    %c0_5 = arith.constant 0 : index
    %c0_6 = arith.constant 0 : index
    %6 = vector.load %arg5[%c0_5, %c0_6] : memref<1x8xf32, #tpu.memory_space<vmem>>, vector<1x8xf32>
    %7 = vector.broadcast %6 : vector<1x8xf32> to vector<512x8xf32>
    %8 = arith.addf %5, %7 : vector<512x8xf32>
    %c0_7 = arith.constant 0 : index
    %c0_8 = arith.constant 0 : index
    %9 = vector.load %arg2[%c0_7, %c0_8] : memref<512x8xf32, #tpu.memory_space<vmem>>, vector<512x8xf32>
    %c0_9 = arith.constant 0 : index
    %c0_10 = arith.constant 0 : index
    %10 = vector.load %arg6[%c0_9, %c0_10] : memref<2x8xf32, #tpu.memory_space<vmem>>, vector<1x8xf32>
    %11 = vector.broadcast %10 : vector<1x8xf32> to vector<512x8xf32>
    %12 = arith.mulf %8, %11 : vector<512x8xf32>
    %c0_11 = arith.constant 0 : index
    %c0_12 = arith.constant 0 : index
    %13 = vector.load %arg7[%c0_11, %c0_12] : memref<2x8xf32, #tpu.memory_space<vmem>>, vector<1x8xf32>
    %14 = vector.broadcast %13 : vector<1x8xf32> to vector<512x8xf32>
    %15 = arith.mulf %9, %14 : vector<512x8xf32>
    %16 = arith.addf %12, %15 : vector<512x8xf32>
    %cst_13 = arith.constant dense<0.000000e+00> : vector<512xf32>
    %17 = vector.multi_reduction <add>, %16, %cst_13 [1] : vector<512x8xf32> to vector<512xf32>
    %18 = vector.shape_cast %17 : vector<512xf32> to vector<512x1xf32>
    %c0_14 = arith.constant 0 : index
    %19 = memref.load %arg8[%c0_14] : memref<2xf32, #tpu.memory_space<smem>>
    %20 = vector.broadcast %19 : f32 to vector<512x1xf32>
    %21 = arith.addf %18, %20 : vector<512x1xf32>
    %c1 = arith.constant 1 : index
    %c0_15 = arith.constant 0 : index
    %22 = vector.load %arg6[%c1, %c0_15] : memref<2x8xf32, #tpu.memory_space<vmem>>, vector<1x8xf32>
    %23 = vector.broadcast %22 : vector<1x8xf32> to vector<512x8xf32>
    %24 = arith.mulf %8, %23 : vector<512x8xf32>
    %c1_16 = arith.constant 1 : index
    %c0_17 = arith.constant 0 : index
    %25 = vector.load %arg7[%c1_16, %c0_17] : memref<2x8xf32, #tpu.memory_space<vmem>>, vector<1x8xf32>
    %26 = vector.broadcast %25 : vector<1x8xf32> to vector<512x8xf32>
    %27 = arith.mulf %9, %26 : vector<512x8xf32>
    %28 = arith.addf %24, %27 : vector<512x8xf32>
    %cst_18 = arith.constant dense<0.000000e+00> : vector<512xf32>
    %29 = vector.multi_reduction <add>, %28, %cst_18 [1] : vector<512x8xf32> to vector<512xf32>
    %30 = vector.shape_cast %29 : vector<512xf32> to vector<512x1xf32>
    %c1_19 = arith.constant 1 : index
    %31 = memref.load %arg8[%c1_19] : memref<2xf32, #tpu.memory_space<smem>>
    %32 = vector.broadcast %31 : f32 to vector<512x1xf32>
    %33 = arith.addf %30, %32 : vector<512x1xf32>
    %34 = arith.negf %21 : vector<512x1xf32>
    %35 = math.exp %34 : vector<512x1xf32>
    %cst_20 = arith.constant 1.000000e+00 : f32
    %36 = vector.broadcast %cst_20 : f32 to vector<512x1xf32>
    %37 = arith.addf %36, %35 : vector<512x1xf32>
    %38 = arith.divf %36, %37 : vector<512x1xf32>
    %39 = vector.broadcast %38 : vector<512x1xf32> to vector<512x8xf32>
    %40 = arith.mulf %8, %39 : vector<512x8xf32>
    %41 = arith.negf %33 : vector<512x1xf32>
    %42 = math.exp %41 : vector<512x1xf32>
    %cst_21 = arith.constant 1.000000e+00 : f32
    %43 = vector.broadcast %cst_21 : f32 to vector<512x1xf32>
    %44 = arith.addf %43, %42 : vector<512x1xf32>
    %45 = arith.divf %43, %44 : vector<512x1xf32>
    %46 = vector.broadcast %45 : vector<512x1xf32> to vector<512x8xf32>
    %47 = arith.mulf %9, %46 : vector<512x8xf32>
    %48 = arith.addf %40, %47 : vector<512x8xf32>
    %c0_22 = arith.constant 0 : index
    %c0_23 = arith.constant 0 : index
    %49 = vector.load %arg9[%c0_22, %c0_23] : memref<512x8xf32, #tpu.memory_space<vmem>>, vector<512x8xf32>
    tpu.vector_store %arg9[%c0_22, %c0_23], %48 {strides = array<i32>} : memref<512x8xf32, #tpu.memory_space<vmem>>, vector<512x8xf32>,
    return
  }
  func.func @transform_0(%arg0: i32) -> (i32, i32) {
    %c0_i32 = arith.constant 0 : i32
    %c0_i32_0 = arith.constant 0 : i32
    return %arg0, %c0_i32 : i32, i32
  }
  func.func @transform_1(%arg0: i32) -> (i32, i32) {
    %c0_i32 = arith.constant 0 : i32
    %c0_i32_0 = arith.constant 0 : i32
    return %arg0, %c0_i32 : i32, i32
  }
  func.func @transform_2(%arg0: i32) -> (i32, i32) {
    %c0_i32 = arith.constant 0 : i32
    %c0_i32_0 = arith.constant 0 : i32
    %c0_i32_1 = arith.constant 0 : i32
    return %c0_i32, %c0_i32_0 : i32, i32
  }
  func.func @transform_3(%arg0: i32) -> (i32, i32) {
    %c0_i32 = arith.constant 0 : i32
    %c0_i32_0 = arith.constant 0 : i32
    %c0_i32_1 = arith.constant 0 : i32
    return %c0_i32, %c0_i32_0 : i32, i32
  }
  func.func @transform_4(%arg0: i32) -> (i32, i32) {
    %c0_i32 = arith.constant 0 : i32
    %c0_i32_0 = arith.constant 0 : i32
    %c0_i32_1 = arith.constant 0 : i32
    return %c0_i32, %c0_i32_0 : i32, i32
  }
  func.func @transform_5(%arg0: i32) -> (i32, i32) {
    %c0_i32 = arith.constant 0 : i32
    %c0_i32_0 = arith.constant 0 : i32
    %c0_i32_1 = arith.constant 0 : i32
    return %c0_i32, %c0_i32_0 : i32, i32
  }
  func.func @transform_6(%arg0: i32) -> (i32, i32) {
    %c0_i32 = arith.constant 0 : i32
    %c0_i32_0 = arith.constant 0 : i32
    %c0_i32_1 = arith.constant 0 : i32
    return %c0_i32, %c0_i32_0 : i32, i32
  }
  func.func @transform_7(%arg0: i32) -> i32 {
    %c0_i32 = arith.constant 0 : i32
    %c0_i32_0 = arith.constant 0 : i32
    return %c0_i32 : i32
  }
  func.func @transform_8(%arg0: i32) -> (i32, i32) {
    %c0_i32 = arith.constant 0 : i32
    %c0_i32_0 = arith.constant 0 : i32
    return %arg0, %c0_i32 : i32, i32
  }
}

</mosaic_0001>

<bundles_post_ra>
// kernel: tpu_custom_call.1
= control target key start
LH: loop header
LB: loop body
LE: loop exit
PB: predicated region body
PF: predicated region fallthrough
CT: control target
= control target key end

     0   :  { %13 = vsyncpa [#allocation3], 0  ;;  %s6235_s0 = inlined_call_operand.vmem [shape: f32[512,8], index: 0, kind: input, shape index: {}]   ;;  %s6236_s1 = inlined_call_operand.vmem [shape: f32[512,8], index: 1, kind: input, shape index: {}]   ;;  %s6237_s2 = inlined_call_operand.vmem [shape: f32[8,8], index: 2, kind: input, shape index: {}]   ;;  %s6238_s3 = inlined_call_operand.vmem [shape: f32[1,8], index: 3, kind: input, shape index: {}]   ;;  %s6239_s4 = inlined_call_operand.vmem [shape: f32[1,8], index: 4, kind: input, shape index: {}]   ;;  %s6240_s5 = inlined_call_operand.vmem [shape: f32[2,8], index: 5, kind: input, shape index: {}]   ;;  %s6241_s6 = inlined_call_operand.vmem [shape: f32[2,8], index: 6, kind: input, shape index: {}]   ;;  %s6242_s7 = inlined_call_operand.vmem [shape: f32[2], index: 7, kind: input, shape index: {}]   ;;  %s6243_s8 = inlined_call_operand.vmem [shape: f32[512,8], index: 8, kind: output, shape index: {}]  }
   0x1   :  { %s34_s29 = sshll.u32 %s6242_s7, 4  ;;  %s35_s29 = int_to_ptr.vmem [resolvable:$true] %s34_s29 }
   0x2   :  { %s3791_s30 = scalar_lea.vmem %s35_s29, 16  ;;  %p3796_p1 = scmp.lt.s32.totalorder %s35_s29, %s35_s29 }
   0x3   :  { %p3792_p0 = scmp.ne.s32.totalorder %s35_s29, %s3791_s30  ;;  %p3797_p2 = scmp.lt.s32.totalorder %s3791_s30, %s3791_s30 }
   0x5   :  { %p3798_p3 = por %p3797_p2, %p3796_p1 }
   0x7   :  { %p3799_p4 = pnand %p3798_p3, %p3792_p0 }
   0x9   :  { %3802 = shalt.err (!%p3799_p4)
}
   0xa   :  { %s3805_s9 = smov [#allocation2]  }
   0xb   :  { %37 = dma.vmem_to_smem %s35_s29, 16, %s3805_s9, [#allocation3]  }
   0xc   :  { %3803 = dma.done.wait [#allocation3], 16  }
   0xd   :  { %3804 = vsyncadd [#allocation3], 4294967280 }
   0xe   :  { %41 = sfence }
   0xf   :  { %v106_v0 = vld [vmem:[%s6237_s2] sm:$0xff]  ;;  %vm107_vm0 = vcmask 64512   ;;  %v43_v3 = vld [vmem:[%s6235_s0 + $0x8] sm:$0xff]  ;;  %v44_v5 = vld [vmem:[%s6235_s0 + $0x10] sm:$0xff]  ;;  %s4530_s16 = sld [smem:[#allocation2]] }
  0x10   :  { %v42_v1 = vld [vmem:[%s6235_s0] sm:$0xff]  ;;  %3104 = vmatprep.subr.mxu0 %v106_v0  ;;  %3202 = vmatprep.subr.mxu1 %v106_v0  ;;  %v75_v4 = vld [vmem:[%s6235_s0 + $0x108] sm:$0xff]  ;;  %v76_v6 = vld [vmem:[%s6235_s0 + $0x110] sm:$0xff]  ;;  %s4545_s2 = sld [smem:[#allocation2 + $0x1]] }
  0x11   :  { %v74_v2 = vld [vmem:[%s6235_s0 + $0x100] sm:$0xff]  ;;  %3105 = vmatpush3.msra.mxu0 %v106_v0  ;;  %3203 = vmatpush3.msra.mxu1 %v106_v0  ;;  %v45_v7 = vld [vmem:[%s6235_s0 + $0x18] sm:$0xff]  ;;  %v47_v11 = vld [vmem:[%s6235_s0 + $0x28] sm:$0xff] }
  0x12   :  { %3106 = vmatprep.mubr.msk.f32.mxu0 %vm107_vm0, %v42_v1  ;;  %3154 = vmatprep.mubr.msk.f32.mxu1 %vm107_vm0, %v74_v2  ;;  %v77_v8 = vld [vmem:[%s6235_s0 + $0x118] sm:$0xff]  ;;  %v46_v9 = vld [vmem:[%s6235_s0 + $0x20] sm:$0xff]  ;;  %v79_v12 = vld [vmem:[%s6235_s0 + $0x128] sm:$0xff] }
  0x13   :  { %3107 = vmatmul.mubr.msk.f32.vlgmr.msra.gmra.mxu0 %vm107_vm0, %v43_v3  ;;  %3155 = vmatmul.mubr.msk.f32.vlgmr.msra.gmra.mxu1 %vm107_vm0, %v75_v4  ;;  %v78_v10 = vld [vmem:[%s6235_s0 + $0x120] sm:$0xff]  ;;  %v48_v13 = vld [vmem:[%s6235_s0 + $0x30] sm:$0xff]  ;;  %v49_v15 = vld [vmem:[%s6235_s0 + $0x38] sm:$0xff] }
  0x14   :  { %3109 = vmatprep.mubr.msk.f32.mxu0 %vm107_vm0, %v44_v5  ;;  %3157 = vmatprep.mubr.msk.f32.mxu1 %vm107_vm0, %v76_v6  ;;  %v80_v14 = vld [vmem:[%s6235_s0 + $0x130] sm:$0xff]  ;;  %v81_v16 = vld [vmem:[%s6235_s0 + $0x138] sm:$0xff]  ;;  %v50_v17 = vld [vmem:[%s6235_s0 + $0x40] sm:$0xff] }
  0x15   :  { %v82_v18 = vld [vmem:[%s6235_s0 + $0x140] sm:$0xff]  ;;  %v51_v19 = vld [vmem:[%s6235_s0 + $0x48] sm:$0xff]  ;;  %v52_v21 = vld [vmem:[%s6235_s0 + $0x50] sm:$0xff] }
  0x16   :  { %v83_v20 = vld [vmem:[%s6235_s0 + $0x148] sm:$0xff]  ;;  %v84_v22 = vld [vmem:[%s6235_s0 + $0x150] sm:$0xff]  ;;  %v53_v23 = vld [vmem:[%s6235_s0 + $0x58] sm:$0xff] }
  0x17   :  { %3110 = vmatmul.mubr.msk.f32.gmra.mxu0 %vm107_vm0, %v45_v7  ;;  %3158 = vmatmul.mubr.msk.f32.gmra.mxu1 %vm107_vm0, %v77_v8  ;;  %v85_v24 = vld [vmem:[%s6235_s0 + $0x158] sm:$0xff]  ;;  %v54_v25 = vld [vmem:[%s6235_s0 + $0x60] sm:$0xff]  ;;  %v55_v27 = vld [vmem:[%s6235_s0 + $0x68] sm:$0xff] }
  0x18   :  { %3112 = vmatprep.mubr.msk.f32.mxu0 %vm107_vm0, %v46_v9  ;;  %3160 = vmatprep.mubr.msk.f32.mxu1 %vm107_vm0, %v78_v10  ;;  %v86_v26 = vld [vmem:[%s6235_s0 + $0x160] sm:$0xff]  ;;  %v87_v28 = vld [vmem:[%s6235_s0 + $0x168] sm:$0xff]  ;;  %v56_v29 = vld [vmem:[%s6235_s0 + $0x70] sm:$0xff] }
  0x19   :  { %v88_v30 = vld [vmem:[%s6235_s0 + $0x170] sm:$0xff]  ;;  %v57_v31 = vld [vmem:[%s6235_s0 + $0x78] sm:$0xff]  ;;  %v58_v33 = vld [vmem:[%s6235_s0 + $0x80] sm:$0xff] }
  0x1a   :  { %v89_v32 = vld [vmem:[%s6235_s0 + $0x178] sm:$0xff]  ;;  %v90_v34 = vld [vmem:[%s6235_s0 + $0x180] sm:$0xff]  ;;  %v59_v35 = vld [vmem:[%s6235_s0 + $0x88] sm:$0xff] }
  0x1b   :  { %3113 = vmatmul.mubr.msk.f32.gmra.mxu0 %vm107_vm0, %v47_v11  ;;  %3161 = vmatmul.mubr.msk.f32.gmra.mxu1 %vm107_vm0, %v79_v12  ;;  %v91_v36 = vld [vmem:[%s6235_s0 + $0x188] sm:$0xff]  ;;  %v60_v37 = vld [vmem:[%s6235_s0 + $0x90] sm:$0xff]  ;;  %v61_v39 = vld [vmem:[%s6235_s0 + $0x98] sm:$0xff] }
  0x1c   :  { %3115 = vmatprep.mubr.msk.f32.mxu0 %vm107_vm0, %v48_v13  ;;  %3163 = vmatprep.mubr.msk.f32.mxu1 %vm107_vm0, %v80_v14  ;;  %v92_v38 = vld [vmem:[%s6235_s0 + $0x190] sm:$0xff]  ;;  %v93_v40 = vld [vmem:[%s6235_s0 + $0x198] sm:$0xff]  ;;  %v62_v41 = vld [vmem:[%s6235_s0 + $0xa0] sm:$0xff] }
  0x1d   :  { %v94_v42 = vld [vmem:[%s6235_s0 + $0x1a0] sm:$0xff]  ;;  %v63_v43 = vld [vmem:[%s6235_s0 + $0xa8] sm:$0xff]  ;;  %v64_v45 = vld [vmem:[%s6235_s0 + $0xb0] sm:$0xff] }
  0x1e   :  { %v95_v44 = vld [vmem:[%s6235_s0 + $0x1a8] sm:$0xff]  ;;  %v96_v46 = vld [vmem:[%s6235_s0 + $0x1b0] sm:$0xff]  ;;  %v65_v47 = vld [vmem:[%s6235_s0 + $0xb8] sm:$0xff] }
  0x1f   :  { %3116 = vmatmul.mubr.msk.f32.gmra.mxu0 %vm107_vm0, %v49_v15  ;;  %3164 = vmatmul.mubr.msk.f32.gmra.mxu1 %vm107_vm0, %v81_v16  ;;  %v97_v48 = vld [vmem:[%s6235_s0 + $0x1b8] sm:$0xff]  ;;  %v66_v49 = vld [vmem:[%s6235_s0 + $0xc0] sm:$0xff]  ;;  %v67_v51 = vld [vmem:[%s6235_s0 + $0xc8] sm:$0xff] }
  0x20   :  { %3118 = vmatprep.mubr.msk.f32.mxu0 %vm107_vm0, %v50_v17  ;;  %3166 = vmatprep.mubr.msk.f32.mxu1 %vm107_vm0, %v82_v18  ;;  %v98_v50 = vld [vmem:[%s6235_s0 + $0x1c0] sm:$0xff]  ;;  %v99_v52 = vld [vmem:[%s6235_s0 + $0x1c8] sm:$0xff]  ;;  %v68_v53 = vld [vmem:[%s6235_s0 + $0xd0] sm:$0xff] }
  0x21   :  { %v69_v54 = vld [vmem:[%s6235_s0 + $0xd8] sm:$0xff]  ;;  %v100_v55 = vld [vmem:[%s6235_s0 + $0x1d0] sm:$0xff]  ;;  %v70_v57 = vld [vmem:[%s6235_s0 + $0xe0] sm:$0xff] }
  0x22   :  { %v101_v56 = vld [vmem:[%s6235_s0 + $0x1d8] sm:$0xff]  ;;  %v71_v58 = vld [vmem:[%s6235_s0 + $0xe8] sm:$0xff]  ;;  %v102_v59 = vld [vmem:[%s6235_s0 + $0x1e0] sm:$0xff] }
  0x23   :  { %3119 = vmatmul.mubr.msk.f32.gmra.mxu0 %vm107_vm0, %v51_v19  ;;  %3167 = vmatmul.mubr.msk.f32.gmra.mxu1 %vm107_vm0, %v83_v20  ;;  %v103_v60 = vld [vmem:[%s6235_s0 + $0x1e8] sm:$0xff]  ;;  %v72_v61 = vld [vmem:[%s6235_s0 + $0xf0] sm:$0xff]  ;;  %v73_v62 = vld [vmem:[%s6235_s0 + $0xf8] sm:$0xff] }
  0x24   :  { %3121 = vmatprep.mubr.msk.f32.mxu0 %vm107_vm0, %v52_v21  ;;  %3169 = vmatprep.mubr.msk.f32.mxu1 %vm107_vm0, %v84_v22  ;;  %v104_v63 = vld [vmem:[%s6235_s0 + $0x1f0] sm:$0xff]  ;;  %v105_v0 = vld [vmem:[%s6235_s0 + $0x1f8] sm:$0xff]  ;;  %v4116_v1 = vld [vmem:[%s6238_s3] ss:$0 sm:$0xff] }
  0x25   :  { %v860_v2 = vld [vmem:[%s6236_s1 + $0x108] sm:$0xff]  ;;  %v4124_v3 = vld [vmem:[%s6241_s6] ss:$0 sm:$0xff]  ;;  %v4139_v10 = vld [vmem:[%s6241_s6 + $0x1] ss:$0 sm:$0xff] }
  0x26   :  { %v828_v4 = vld [vmem:[%s6236_s1 + $0x8] sm:$0xff]  ;;  %v4132_v6 = vld [vmem:[%s6239_s4] ss:$0 sm:$0xff]  ;;  %v998_v14 = vmul.f32 %v4124_v3, %v860_v2  ;;  %v4162_v21 = vld [vmem:[%s6240_s5 + $0x1] ss:$0 sm:$0xff] }
  0x27   :  { %3122 = vmatmul.mubr.msk.f32.gmra.mxu0 %vm107_vm0, %v53_v23  ;;  %3170 = vmatmul.mubr.msk.f32.gmra.mxu1 %vm107_vm0, %v85_v24  ;;  %v4144_v13 = vld [vmem:[%s6240_s5] ss:$0 sm:$0xff]  ;;  %v966_v15 = vmul.f32 %v4124_v3, %v828_v4  ;;  %v1426_v22 = vmul.f32 %v4139_v10, %v828_v4 }
  0x28   :  { %3124 = vmatprep.mubr.msk.f32.mxu0 %vm107_vm0, %v54_v25  ;;  %3172 = vmatprep.mubr.msk.f32.mxu1 %vm107_vm0, %v86_v26  ;;  %v827_v16 = vld [vmem:[%s6236_s1] sm:$0xff] }
  0x2b   :  { %3125 = vmatmul.mubr.msk.f32.gmra.mxu0 %vm107_vm0, %v55_v27  ;;  %3173 = vmatmul.mubr.msk.f32.gmra.mxu1 %vm107_vm0, %v87_v28  ;;  %v965_v28 = vmul.f32 %v4124_v3, %v827_v16 }
  0x2c   :  { %3127 = vmatprep.mubr.msk.f32.mxu0 %vm107_vm0, %v56_v29  ;;  %3175 = vmatprep.mubr.msk.f32.mxu1 %vm107_vm0, %v88_v30  ;;  %v859_v29 = vld [vmem:[%s6236_s1 + $0x100] sm:$0xff] }
  0x2f   :  { %3128 = vmatmul.mubr.msk.f32.gmra.mxu0 %vm107_vm0, %v57_v31  ;;  %3176 = vmatmul.mubr.msk.f32.gmra.mxu1 %vm107_vm0, %v89_v32 }
  0x30   :  { %3130 = vmatprep.mubr.msk.f32.mxu0 %vm107_vm0, %v58_v33  ;;  %3178 = vmatprep.mubr.msk.f32.mxu1 %vm107_vm0, %v90_v34 }
  0x33   :  { %3131 = vmatmul.mubr.msk.f32.gmra.mxu0 %vm107_vm0, %v59_v35  ;;  %3179 = vmatmul.mubr.msk.f32.gmra.mxu1 %vm107_vm0, %v91_v36 }
  0x34   :  { %3133 = vmatprep.mubr.msk.f32.mxu0 %vm107_vm0, %v60_v37  ;;  %3181 = vmatprep.mubr.msk.f32.mxu1 %vm107_vm0, %v92_v38 }
  0x37   :  { %3134 = vmatmul.mubr.msk.f32.gmra.mxu0 %vm107_vm0, %v61_v39  ;;  %3182 = vmatmul.mubr.msk.f32.gmra.mxu1 %vm107_vm0, %v93_v40  ;;  %v1458_v39 = vmul.f32 %v4139_v10, %v860_v2  ;;  %v997_v40 = vmul.f32 %v4124_v3, %v859_v29  ;;  %v1457_v2 = vmul.f32 %v4139_v10, %v859_v29 }
  0x38   :  { %3136 = vmatprep.mubr.msk.f32.mxu0 %vm107_vm0, %v62_v41  ;;  %3184 = vmatprep.mubr.msk.f32.mxu1 %vm107_vm0, %v94_v42  ;;  %v830_v41 = vld [vmem:[%s6236_s1 + $0x18] sm:$0xff] }
  0x3b   :  { %3137 = vmatmul.mubr.msk.f32.gmra.mxu0 %vm107_vm0, %v63_v43  ;;  %3185 = vmatmul.mubr.msk.f32.gmra.mxu1 %vm107_vm0, %v95_v44 }
  0x3c   :  { %3139 = vmatprep.mubr.msk.f32.mxu0 %vm107_vm0, %v64_v45  ;;  %3187 = vmatprep.mubr.msk.f32.mxu1 %vm107_vm0, %v96_v46 }
  0x3f   :  { %3140 = vmatmul.mubr.msk.f32.gmra.mxu0 %vm107_vm0, %v65_v47  ;;  %3188 = vmatmul.mubr.msk.f32.gmra.mxu1 %vm107_vm0, %v97_v48 }
  0x40   :  { %3142 = vmatprep.mubr.msk.f32.mxu0 %vm107_vm0, %v66_v49  ;;  %3190 = vmatprep.mubr.msk.f32.mxu1 %vm107_vm0, %v98_v50  ;;  %v968_v50 = vmul.f32 %v4124_v3, %v830_v41 }
  0x43   :  { %3143 = vmatmul.mubr.msk.f32.gmra.mxu0 %vm107_vm0, %v67_v51  ;;  %3191 = vmatmul.mubr.msk.f32.gmra.mxu1 %vm107_vm0, %v99_v52 }
  0x44   :  { %3145 = vmatprep.mubr.msk.f32.mxu0 %vm107_vm0, %v68_v53  ;;  %3193 = vmatprep.mubr.msk.f32.mxu1 %vm107_vm0, %v100_v55  ;;  %v1425_v53 = vmul.f32 %v4139_v10, %v827_v16 }
  0x47   :  { %3146 = vmatmul.mubr.msk.f32.gmra.mxu0 %vm107_vm0, %v69_v54  ;;  %3194 = vmatmul.mubr.msk.f32.gmra.mxu1 %vm107_vm0, %v101_v56  ;;  %v862_v54 = vld [vmem:[%s6236_s1 + $0x118] sm:$0xff] }
  0x48   :  { %3148 = vmatprep.mubr.msk.f32.mxu0 %vm107_vm0, %v70_v57  ;;  %3196 = vmatprep.mubr.msk.f32.mxu1 %vm107_vm0, %v102_v59 }
  0x4b   :  { %3149 = vmatmul.mubr.msk.f32.gmra.mxu0 %vm107_vm0, %v71_v58  ;;  %3197 = vmatmul.mubr.msk.f32.gmra.mxu1 %vm107_vm0, %v103_v60 }
  0x4c   :  { %3151 = vmatprep.mubr.msk.f32.mxu0 %vm107_vm0, %v72_v61  ;;  %3199 = vmatprep.mubr.msk.f32.mxu1 %vm107_vm0, %v104_v63 }
  0x4f   :  { %3152 = vmatmul.mubr.msk.f32.gmra.mxu0 %vm107_vm0, %v73_v62  ;;  %3200 = vmatmul.mubr.msk.f32.gmra.mxu1 %vm107_vm0, %v105_v0  ;;  %v1000_v62 = vmul.f32 %v4124_v3, %v862_v54 }
  0xd3   :  { %v3108_v5 = vpop.f32.mrf.mxu0  ;;  %v3156_v7 = vpop.f32.mrf.mxu1 }
  0xd4   :  { %v693_v8 = vmul.f32 %v3108_v5, %v4116_v1  ;;  %v725_v9 = vmul.f32 %v3156_v7, %v4116_v1 }
  0xd5   :  { %v366_v11 = vpop.f32.mrf.mxu0  ;;  %v526_v12 = vpop.f32.mrf.mxu1 }
  0xd6   :  { %v4152_v17 = vadd.f32 %v4132_v6, %v693_v8  ;;  %v4155_v18 = vadd.f32 %v4132_v6, %v725_v9  ;;  %v692_v19 = vmul.f32 %v4116_v1, %v366_v11  ;;  %v724_v20 = vmul.f32 %v4116_v1, %v526_v12  ;;  %v861_v9 = vld [vmem:[%s6236_s1 + $0x110] sm:$0xff] }
  0xd7   :  { %v3111_v26 = vpop.f32.mrf.mxu0  ;;  %v3159_v27 = vpop.f32.mrf.mxu1  ;;  %v999_v16 = vmul.f32 %v4124_v3, %v861_v9 }
  0xd8   :  { %6300 = vst [vmem:[#allocation5_spill] sm:$0xff] %v4152_v17  ;;  %6301 = vst [vmem:[#allocation6_spill] sm:$0xff] %v4155_v18  ;;  %v4166_v23 = vadd.f32 %v4132_v6, %v692_v19  ;;  %v929_v24 = vmul.f32 %v4144_v13, %v4155_v18  ;;  %v897_v25 = vmul.f32 %v4144_v13, %v4152_v17 }
  0xd9   :  { %v4177_v30 = vadd.f32 %v4132_v6, %v724_v20  ;;  %v695_v31 = vmul.f32 %v3111_v26, %v4116_v1  ;;  %v1357_v32 = vmul.f32 %v4162_v21, %v4152_v17  ;;  %v727_v35 = vmul.f32 %v3159_v27, %v4116_v1  ;;  %v536_v45 = vpop.f32.mrf.mxu1  ;;  %v376_v55 = vpop.f32.mrf.mxu0  ;;  %v829_v27 = vld [vmem:[%s6236_s1 + $0x10] sm:$0xff] }
  0xda   :  { %6302 = vst [vmem:[#allocation7_spill] sm:$0xff] %v4166_v23  ;;  %v1062_v33 = vadd.f32 %v998_v14, %v929_v24  ;;  %v1030_v34 = vadd.f32 %v966_v15, %v897_v25  ;;  %v896_v36 = vmul.f32 %v4144_v13, %v4166_v23  ;;  %v1389_v46 = vmul.f32 %v4162_v21, %v4155_v18 }
  0xdb   :  { %6303 = vst [vmem:[#allocation8_spill] sm:$0xff] %v4177_v30  ;;  %v4186_v37 = vadd.f32 %v4132_v6, %v695_v31  ;;  %v1490_v38 = vadd.f32 %v1426_v22, %v1357_v32  ;;  %v928_v47 = vmul.f32 %v4144_v13, %v4177_v30  ;;  %v4200_v48 = vadd.f32 %v4132_v6, %v727_v35  ;;  %v3114_v11 = vpop.f32.mrf.mxu0  ;;  %v3162_v26 = vpop.f32.mrf.mxu1 }
  0xdc   :  { %v1192_v42 = vsel %vm107_vm0, %v1062_v33, 0.0  ;;  %v1096_v43 = vsel %vm107_vm0, %v1030_v34, 0.0  ;;  %v1029_v44 = vadd.f32 %v965_v28, %v896_v36  ;;  %v726_v52 = vmul.f32 %v4116_v1, %v536_v45 }
  0xdd   :  { %6304 = vst [vmem:[#allocation9_spill] sm:$0xff] %v4186_v37  ;;  %1193 = vadd.xlane.f32.xlu1 %v1192_v42  ;;  %1097 = vadd.xlane.f32.xlu0 %v1096_v43  ;;  %6305 = vst [vmem:[#allocation10_spill] sm:$0xff] %v4200_v48  ;;  %v899_v49 = vmul.f32 %v4144_v13, %v4186_v37  ;;  %v1556_v51 = vsel %vm107_vm0, %v1490_v38, 0.0  ;;  %v1522_v57 = vadd.f32 %v1458_v39, %v1389_v46  ;;  %v386_v28 = vpop.f32.mrf.mxu0  ;;  %v546_v39 = vpop.f32.mrf.mxu1 }
  0xde   :  { %v1093_v56 = vsel %vm107_vm0, %v1029_v44, 0.0  ;;  %v1061_v58 = vadd.f32 %v997_v40, %v928_v47  ;;  %v1356_v59 = vmul.f32 %v4162_v21, %v4166_v23  ;;  %v931_v61 = vmul.f32 %v4144_v13, %v4200_v48 }
  0xdf   :  { %v1032_v60 = vadd.f32 %v968_v50, %v899_v49  ;;  %v694_v63 = vmul.f32 %v4116_v1, %v376_v55  ;;  %v4219_v0 = vadd.f32 %v4132_v6, %v726_v52  ;;  %v1652_v4 = vsel %vm107_vm0, %v1522_v57, 0.0  ;;  %v831_v52 = vld [vmem:[%s6236_s1 + $0x20] sm:$0xff] }
  0xe0   :  { %v1189_v5 = vsel %vm107_vm0, %v1061_v58, 0.0  ;;  %v1489_v7 = vadd.f32 %v1425_v53, %v1356_v59  ;;  %v1388_v8 = vmul.f32 %v4162_v21, %v4177_v30  ;;  %v1064_v14 = vadd.f32 %v1000_v62, %v931_v61 }
  0xe1   :  { %1557 = vadd.xlane.f32.xlu1 %v1556_v51  ;;  %1094 = vadd.xlane.f32.xlu0 %v1093_v56  ;;  %6306 = vst [vmem:[#allocation11_spill] sm:$0xff] %v4219_v0  ;;  %v1102_v12 = vsel %vm107_vm0, %v1032_v60, 0.0  ;;  %v930_v15 = vmul.f32 %v4144_v13, %v4219_v0  ;;  %v1359_v19 = vmul.f32 %v4162_v21, %v4186_v37  ;;  %v832_v51 = vld [vmem:[%s6236_s1 + $0x28] sm:$0xff] }
  0xe2   :  { %v1428_v20 = vmul.f32 %v4139_v10, %v830_v41  ;;  %v4237_v22 = vadd.f32 %v4132_v6, %v694_v63  ;;  %v1553_v24 = vsel %vm107_vm0, %v1489_v7, 0.0  ;;  %v1521_v25 = vadd.f32 %v1457_v2, %v1388_v8  ;;  %v3117_v7 = vpop.f32.mrf.mxu0  ;;  %v864_v8 = vld [vmem:[%s6236_s1 + $0x128] sm:$0xff] }
  0xe3   :  { %v1198_v29 = vsel %vm107_vm0, %v1064_v14, 0.0  ;;  %v697_v31 = vmul.f32 %v3114_v11, %v4116_v1  ;;  %v1063_v32 = vadd.f32 %v999_v16, %v930_v15  ;;  %v1460_v34 = vmul.f32 %v4139_v10, %v862_v54 }
  0xe4   :  { %6307 = vst [vmem:[#allocation12_spill] sm:$0xff] %v4237_v22  ;;  %v1492_v33 = vadd.f32 %v1428_v20, %v1359_v19  ;;  %v1427_v35 = vmul.f32 %v4139_v10, %v829_v27  ;;  %v1649_v36 = vsel %vm107_vm0, %v1521_v25, 0.0  ;;  %v696_v38 = vmul.f32 %v4116_v1, %v386_v28  ;;  %v396_v25 = vpop.f32.mrf.mxu0 }
  0xe5   :  { %1653 = vadd.xlane.f32.xlu1 %v1652_v4  ;;  %1190 = vadd.xlane.f32.xlu0 %v1189_v5  ;;  %v1391_v40 = vmul.f32 %v4162_v21, %v4200_v48  ;;  %v1358_v41 = vmul.f32 %v4162_v21, %v4237_v22  ;;  %v4254_v42 = vadd.f32 %v4132_v6, %v697_v31  ;;  %v1195_v46 = vsel %vm107_vm0, %v1063_v32, 0.0 }
  0xe6   :  { %v729_v43 = vmul.f32 %v3162_v26, %v4116_v1  ;;  %v1459_v44 = vmul.f32 %v4139_v10, %v861_v9  ;;  %v967_v45 = vmul.f32 %v4124_v3, %v829_v27  ;;  %v1562_v47 = vsel %vm107_vm0, %v1492_v33, 0.0  ;;  %v863_v9 = vld [vmem:[%s6236_s1 + $0x120] sm:$0xff]  ;;  %v3165_v26 = vpop.f32.mrf.mxu1 }
  0xe7   :  { %6308 = vst [vmem:[#allocation13_spill] sm:$0xff] %v4254_v42  ;;  %v728_v49 = vmul.f32 %v4116_v1, %v546_v39  ;;  %v1390_v50 = vmul.f32 %v4162_v21, %v4219_v0  ;;  %v4271_v53 = vadd.f32 %v4132_v6, %v696_v38  ;;  %v1524_v54 = vadd.f32 %v1460_v34, %v1391_v40 }
  0xe8   :  { %v1491_v55 = vadd.f32 %v1427_v35, %v1358_v41  ;;  %v898_v56 = vmul.f32 %v4144_v13, %v4237_v22  ;;  %v970_v57 = vmul.f32 %v4124_v3, %v832_v51  ;;  %v969_v58 = vmul.f32 %v4124_v3, %v831_v52 }
  0xe9   :  { %1554 = vadd.xlane.f32.xlu0 %v1553_v24  ;;  %1103 = vadd.xlane.f32.xlu1 %v1102_v12  ;;  %6309 = vst [vmem:[#allocation14_spill] sm:$0xff] %v4271_v53  ;;  %v4278_v59 = vadd.f32 %v4132_v6, %v729_v43  ;;  %v4281_v60 = vadd.f32 %v4132_v6, %v728_v49  ;;  %v1658_v63 = vsel %vm107_vm0, %v1524_v54, 0.0  ;;  %v4607_v0 = vstv %s4545_s2 }
  0xea   :  { %v1523_v61 = vadd.f32 %v1459_v44, %v1390_v50  ;;  %v901_v62 = vmul.f32 %v4144_v13, %v4254_v42  ;;  %v1559_v2 = vsel %vm107_vm0, %v1491_v55, 0.0  ;;  %v1031_v4 = vadd.f32 %v967_v45, %v898_v56  ;;  %v834_v50 = vld [vmem:[%s6236_s1 + $0x38] sm:$0xff] }
  0xeb   :  { %6310 = vst [vmem:[#allocation15_spill] sm:$0xff] %v4278_v59  ;;  %6311 = vst [vmem:[#allocation16_spill] sm:$0xff] %v4281_v60  ;;  %v900_v5 = vmul.f32 %v4144_v13, %v4271_v53  ;;  %v933_v11 = vmul.f32 %v4144_v13, %v4278_v59  ;;  %v1002_v12 = vmul.f32 %v4124_v3, %v864_v8 }
  0xec   :  { %v932_v14 = vmul.f32 %v4144_v13, %v4281_v60  ;;  %v1001_v15 = vmul.f32 %v4124_v3, %v863_v9  ;;  %v1655_v16 = vsel %vm107_vm0, %v1523_v61, 0.0  ;;  %v1099_v19 = vsel %vm107_vm0, %v1031_v4, 0.0 }
  0xed   :  { %1650 = vadd.xlane.f32.xlu0 %v1649_v36  ;;  %1199 = vadd.xlane.f32.xlu1 %v1198_v29  ;;  %v1034_v20 = vadd.f32 %v970_v57, %v901_v62  ;;  %v1033_v24 = vadd.f32 %v969_v58, %v900_v5  ;;  %v699_v27 = vmul.f32 %v3117_v7, %v4116_v1  ;;  %v556_v36 = vpop.f32.mrf.mxu1 }
  0xee   :  { %v1430_v28 = vmul.f32 %v4139_v10, %v832_v51  ;;  %v1066_v29 = vadd.f32 %v1002_v12, %v933_v11  ;;  %v1065_v31 = vadd.f32 %v1001_v15, %v932_v14  ;;  %v698_v32 = vmul.f32 %v4116_v1, %v396_v25  ;;  %v833_v51 = vld [vmem:[%s6236_s1 + $0x30] sm:$0xff]  ;;  %v866_v11 = vld [vmem:[%s6236_s1 + $0x138] sm:$0xff] }
  0xef   :  { %v1429_v33 = vmul.f32 %v4139_v10, %v831_v52  ;;  %v1108_v34 = vsel %vm107_vm0, %v1034_v20, 0.0  ;;  %v1105_v35 = vsel %vm107_vm0, %v1033_v24, 0.0  ;;  %v1361_v38 = vmul.f32 %v4162_v21, %v4254_v42  ;;  %v865_v12 = vld [vmem:[%s6236_s1 + $0x130] sm:$0xff] }
  0xf0   :  { %v1360_v39 = vmul.f32 %v4162_v21, %v4271_v53  ;;  %v4314_v40 = vadd.f32 %v4132_v6, %v699_v27  ;;  %v731_v41 = vmul.f32 %v3165_v26, %v4116_v1  ;;  %v1462_v43 = vmul.f32 %v4139_v10, %v864_v8  ;;  %v835_v26 = vld [vmem:[%s6236_s1 + $0x40] sm:$0xff] }
  0xf1   :  { %1196 = vadd.xlane.f32.xlu0 %v1195_v46  ;;  %1563 = vadd.xlane.f32.xlu1 %v1562_v47  ;;  %v1461_v44 = vmul.f32 %v4139_v10, %v863_v9  ;;  %v1204_v45 = vsel %vm107_vm0, %v1066_v29, 0.0  ;;  %v1201_v46 = vsel %vm107_vm0, %v1065_v31, 0.0  ;;  %v4322_v47 = vadd.f32 %v4132_v6, %v698_v32  ;;  %v3120_v9 = vpop.f32.mrf.mxu0 }
  0xf2   :  { %6312 = vst [vmem:[#allocation17_spill] sm:$0xff] %v4314_v40  ;;  %v730_v49 = vmul.f32 %v4116_v1, %v556_v36  ;;  %v1494_v52 = vadd.f32 %v1430_v28, %v1361_v38  ;;  %v1493_v54 = vadd.f32 %v1429_v33, %v1360_v39  ;;  %v1393_v55 = vmul.f32 %v4162_v21, %v4278_v59  ;;  %v3168_v33 = vpop.f32.mrf.mxu1 }
  0xf3   :  { %6313 = vst [vmem:[#allocation18_spill] sm:$0xff] %v4322_v47  ;;  %v1392_v56 = vmul.f32 %v4162_v21, %v4281_v60  ;;  %v972_v57 = vmul.f32 %v4124_v3, %v834_v50  ;;  %v971_v58 = vmul.f32 %v4124_v3, %v833_v51  ;;  %v4338_v61 = vadd.f32 %v4132_v6, %v731_v41  ;;  %v406_v32 = vpop.f32.mrf.mxu0 }
  0xf4   :  { %v4341_v62 = vadd.f32 %v4132_v6, %v730_v49  ;;  %v1568_v4 = vsel %vm107_vm0, %v1494_v52, 0.0  ;;  %v1565_v5 = vsel %vm107_vm0, %v1493_v54, 0.0  ;;  %v1526_v7 = vadd.f32 %v1462_v43, %v1393_v55  ;;  %v867_v43 = vld [vmem:[%s6236_s1 + $0x140] sm:$0xff]  ;;  %v838_v52 = vld [vmem:[%s6236_s1 + $0x58] sm:$0xff]  ;;  %v837_v54 = vld [vmem:[%s6236_s1 + $0x50] sm:$0xff] }
  0xf5   :  { %1659 = vadd.xlane.f32.xlu1 %v1658_v63  ;;  %1560 = vadd.xlane.f32.xlu0 %v1559_v2  ;;  %6314 = vst [vmem:[#allocation19_spill] sm:$0xff] %v4338_v61  ;;  %v903_v63 = vmul.f32 %v4144_v13, %v4314_v40  ;;  %v902_v2 = vmul.f32 %v4144_v13, %v4322_v47 }
  0xf6   :  { %6315 = vst [vmem:[#allocation20_spill] sm:$0xff] %v4341_v62  ;;  %v1525_v8 = vadd.f32 %v1461_v44, %v1392_v56  ;;  %v1432_v14 = vmul.f32 %v4139_v10, %v834_v50  ;;  %v1431_v15 = vmul.f32 %v4139_v10, %v833_v51  ;;  %v935_v20 = vmul.f32 %v4144_v13, %v4338_v61 }
  0xf7   :  { %v1004_v24 = vmul.f32 %v4124_v3, %v866_v11  ;;  %v1003_v25 = vmul.f32 %v4124_v3, %v865_v12  ;;  %v1664_v27 = vsel %vm107_vm0, %v1526_v7, 0.0  ;;  %v1035_v29 = vadd.f32 %v971_v58, %v902_v2 }
  0xf8   :  { %v1661_v28 = vsel %vm107_vm0, %v1525_v8, 0.0  ;;  %v934_v31 = vmul.f32 %v4144_v13, %v4341_v62  ;;  %v1463_v36 = vmul.f32 %v4139_v10, %v865_v12  ;;  %v701_v39 = vmul.f32 %v3120_v9, %v4116_v1  ;;  %v870_v12 = vld [vmem:[%s6236_s1 + $0x158] sm:$0xff] }
  0xf9   :  { %1656 = vadd.xlane.f32.xlu0 %v1655_v16  ;;  %1100 = vadd.xlane.f32.xlu1 %v1099_v19  ;;  %v836_v16 = vld [vmem:[%s6236_s1 + $0x48] sm:$0xff]  ;;  %v1036_v19 = vadd.f32 %v972_v57, %v903_v63  ;;  %v4381_v41 = vmul.f32 %v4124_v3, %v835_v26  ;;  %v1068_v49 = vadd.f32 %v1004_v24, %v935_v20  ;;  %v1111_v55 = vsel %vm107_vm0, %v1035_v29, 0.0  ;;  %v566_v57 = vpop.f32.mrf.mxu1 }
  0xfa   :  { %v4377_v38 = vmul.f32 %v4124_v3, %v836_v16  ;;  %v4387_v44 = vmul.f32 %v4139_v10, %v836_v16  ;;  %v700_v50 = vmul.f32 %v4116_v1, %v406_v32  ;;  %v1067_v56 = vadd.f32 %v1003_v25, %v934_v31  ;;  %v869_v25 = vld [vmem:[%s6236_s1 + $0x150] sm:$0xff]  ;;  %v3123_v32 = vpop.f32.mrf.mxu0 }
  0xfb   :  { %v1363_v58 = vmul.f32 %v4162_v21, %v4314_v40  ;;  %v1362_v63 = vmul.f32 %v4162_v21, %v4322_v47  ;;  %v4409_v2 = vmul.f32 %v4124_v3, %v867_v43  ;;  %v4418_v7 = vadd.f32 %v4132_v6, %v701_v39 }
  0xfc   :  { %v733_v8 = vmul.f32 %v3168_v33, %v4116_v1  ;;  %v4422_v9 = vmul.f32 %v4124_v3, %v838_v52  ;;  %v1210_v16 = vsel %vm107_vm0, %v1068_v49, 0.0  ;;  %v732_v20 = vmul.f32 %v4116_v1, %v566_v57  ;;  %v872_v57 = vld [vmem:[%s6236_s1 + $0x168] sm:$0xff] }
  0xfd   :  { %1109 = vadd.xlane.f32.xlu1 %v1108_v34  ;;  %1106 = vadd.xlane.f32.xlu0 %v1105_v35  ;;  %v868_v34 = vld [vmem:[%s6236_s1 + $0x148] sm:$0xff]  ;;  %v1464_v35 = vmul.f32 %v4139_v10, %v866_v11  ;;  %6316 = vst [vmem:[#allocation21_spill] sm:$0xff] %v4418_v7  ;;  %v4425_v11 = vmul.f32 %v4124_v3, %v837_v54 }
  0xfe   :  { %v4395_v51 = vmul.f32 %v4124_v3, %v868_v34  ;;  %v1395_v24 = vmul.f32 %v4162_v21, %v4338_v61  ;;  %v1495_v29 = vadd.f32 %v1431_v15, %v1362_v63  ;;  %v1394_v31 = vmul.f32 %v4162_v21, %v4341_v62 }
  0xff   :  { %v4447_v33 = vmul.f32 %v4124_v3, %v870_v12  ;;  %v4453_v39 = vmul.f32 %v4139_v10, %v837_v54  ;;  %v4462_v15 = vmul.f32 %v4139_v10, %v869_v25  ;;  %v4484_v63 = vadd.f32 %v4132_v6, %v732_v20 }
 0x100   :  { %v1528_v54 = vadd.f32 %v1464_v35, %v1395_v24  ;;  %v1571_v35 = vsel %vm107_vm0, %v1495_v29, 0.0  ;;  %v703_v20 = vmul.f32 %v3123_v32, %v4116_v1  ;;  %v4505_v29 = vmul.f32 %v4139_v10, %v872_v57 }
 0x101   :  { %1205 = vadd.xlane.f32.xlu1 %v1204_v45  ;;  %1202 = vadd.xlane.f32.xlu0 %v1201_v46  ;;  %v4390_v45 = vmul.f32 %v4139_v10, %v835_v26  ;;  %v1114_v46 = vsel %vm107_vm0, %v1036_v19, 0.0  ;;  %v4432_v19 = vadd.f32 %v4132_v6, %v700_v50  ;;  %v840_v26 = vld [vmem:[%s6236_s1 + $0x68] sm:$0xff]  ;;  %v839_v50 = vld [vmem:[%s6236_s1 + $0x60] sm:$0xff]  ;;  %6319 = vst [vmem:[#allocation24_spill] sm:$0xff] %v4484_v63 }
 0x102   :  { %v4465_v49 = vmul.f32 %v4124_v3, %v840_v26  ;;  %v4489_v24 = vmul.f32 %v4124_v3, %v839_v50  ;;  %v936_v61 = vmul.f32 %v4144_v13, %v4484_v63 }
 0x103   :  { %6317 = vst [vmem:[#allocation22_spill] sm:$0xff] %v4432_v19 }
 0x105   :  { %1569 = vadd.xlane.f32.xlu1 %v1568_v4  ;;  %1566 = vadd.xlane.f32.xlu0 %v1565_v5  ;;  %v4412_v4 = vmul.f32 %v4139_v10, %v868_v34  ;;  %v4415_v5 = vmul.f32 %v4139_v10, %v867_v43  ;;  %v4450_v34 = vmul.f32 %v4139_v10, %v838_v52  ;;  %v3171_v43 = vpop.f32.mrf.mxu1 }
 0x106   :  { %v4471_v52 = vadd.f32 %v4132_v6, %v733_v8 }
 0x107   :  { %v576_v62 = vpop.f32.mrf.mxu1 }
 0x108   :  { %6318 = vst [vmem:[#allocation23_spill] sm:$0xff] %v4471_v52 }
 0x109   :  { %1665 = vadd.xlane.f32.xlu1 %v1664_v27  ;;  %1662 = vadd.xlane.f32.xlu0 %v1661_v28  ;;  %v1207_v27 = vsel %vm107_vm0, %v1067_v56, 0.0  ;;  %v1496_v28 = vadd.f32 %v1432_v14, %v1363_v58  ;;  %v4459_v14 = vmul.f32 %v4139_v10, %v870_v12  ;;  %v904_v56 = vmul.f32 %v4144_v13, %v4432_v19  ;;  %v871_v58 = vld [vmem:[%s6236_s1 + $0x160] sm:$0xff] }
 0x10a   :  { %v1527_v12 = vadd.f32 %v1463_v36, %v1394_v31  ;;  %v4502_v36 = vmul.f32 %v4124_v3, %v871_v58  ;;  %v1670_v31 = vsel %vm107_vm0, %v1528_v54, 0.0  ;;  %v735_v54 = vmul.f32 %v3171_v43, %v4116_v1 }
 0x10b   :  { %v1574_v8 = vsel %vm107_vm0, %v1496_v28, 0.0  ;;  %v4499_v28 = vmul.f32 %v4124_v3, %v872_v57  ;;  %v1037_v32 = vadd.f32 %v4381_v41, %v904_v56 }
 0x10c   :  { %v1667_v57 = vsel %vm107_vm0, %v1527_v12, 0.0  ;;  %v1365_v12 = vmul.f32 %v4162_v21, %v4418_v7 }
 0x10d   :  { %1115 = vadd.xlane.f32.xlu1 %v1114_v46  ;;  %1112 = vadd.xlane.f32.xlu0 %v1111_v55  ;;  %v4456_v46 = vmul.f32 %v4124_v3, %v869_v25  ;;  %v905_v55 = vmul.f32 %v4144_v13, %v4418_v7  ;;  %v4492_v25 = vmul.f32 %v4139_v10, %v840_v26  ;;  %v842_v26 = vld [vmem:[%s6236_s1 + $0x78] sm:$0xff]  ;;  %v1117_v60 = vsel %vm107_vm0, %v1037_v32, 0.0 }
 0x10e   :  { %v4528_v56 = vmul.f32 %v4124_v3, %v842_v26 }
 0x111   :  { %1211 = vadd.xlane.f32.xlu1 %v1210_v16  ;;  %1208 = vadd.xlane.f32.xlu0 %v1207_v27  ;;  %v416_v16 = vpop.f32.mrf.mxu0  ;;  %v4495_v27 = vmul.f32 %v4139_v10, %v839_v50  ;;  %v1038_v50 = vadd.f32 %v4377_v38, %v905_v55  ;;  %v734_v38 = vmul.f32 %v4116_v1, %v576_v62  ;;  %v874_v62 = vld [vmem:[%s6236_s1 + $0x178] sm:$0xff] }
 0x112   :  { %v702_v47 = vmul.f32 %v4116_v1, %v416_v16  ;;  %v4525_v55 = vmul.f32 %v4139_v10, %v871_v58  ;;  %v1364_v16 = vmul.f32 %v4162_v21, %v4432_v19  ;;  %v4543_v58 = vmul.f32 %v4139_v10, %v842_v26  ;;  %v873_v19 = vld [vmem:[%s6236_s1 + $0x170] sm:$0xff] }
 0x113   :  { %v3126_v41 = vpop.f32.mrf.mxu0  ;;  %v1069_v26 = vadd.f32 %v4409_v2, %v936_v61  ;;  %v4572_v32 = vmul.f32 %v4124_v3, %v874_v62  ;;  %v1498_v61 = vadd.f32 %v4387_v44, %v1365_v12  ;;  %v1396_v2 = vmul.f32 %v4162_v21, %v4484_v63 }
 0x114   :  { %v4561_v59 = vadd.f32 %v4132_v6, %v702_v47  ;;  %v1497_v47 = vadd.f32 %v4390_v45, %v1364_v16  ;;  %v4587_v44 = vmul.f32 %v4139_v10, %v873_v19 }
 0x115   :  { %1575 = vadd.xlane.f32.xlu1 %v1574_v8  ;;  %1572 = vadd.xlane.f32.xlu0 %v1571_v35  ;;  %v937_v8 = vmul.f32 %v4144_v13, %v4471_v52  ;;  %v841_v35 = vld [vmem:[%s6236_s1 + $0x70] sm:$0xff]  ;;  %v1213_v45 = vsel %vm107_vm0, %v1069_v26, 0.0  ;;  %v4601_v26 = vstv %s4530_s16  ;;  %v1580_v53 = vsel %vm107_vm0, %v1498_v61, 0.0 }
 0x116   :  { %v4537_v43 = vmul.f32 %v4124_v3, %v841_v35  ;;  %v4556_v40 = vmul.f32 %v4139_v10, %v841_v35  ;;  %6321 = vst [vmem:[#allocation26_spill] sm:$0xff] %v4561_v59  ;;  %v426_v35 = vpop.f32.mrf.mxu0  ;;  %v906_v16 = vmul.f32 %v4144_v13, %v4561_v59  ;;  %v1577_v42 = vsel %vm107_vm0, %v1497_v47, 0.0 }
 0x117   :  { %v1070_v7 = vadd.f32 %v4395_v51, %v937_v8  ;;  %v4567_v51 = vadd.f32 %v4132_v6, %v734_v38  ;;  %v1397_v8 = vmul.f32 %v4162_v21, %v4471_v52  ;;  %v705_v38 = vmul.f32 %v3126_v41, %v4116_v1 }
 0x118   :  { %v4584_v52 = vmul.f32 %v4139_v10, %v874_v62  ;;  %v704_v63 = vmul.f32 %v4116_v1, %v426_v35  ;;  %v1529_v22 = vadd.f32 %v4415_v5, %v1396_v2  ;;  %v1039_v47 = vadd.f32 %v4425_v11, %v906_v16 }
 0x119   :  { %1671 = vadd.xlane.f32.xlu1 %v1670_v31  ;;  %1668 = vadd.xlane.f32.xlu0 %v1667_v57  ;;  %v1120_v31 = vsel %vm107_vm0, %v1038_v50, 0.0  ;;  %v4549_v57 = vadd.f32 %v4132_v6, %v703_v20  ;;  %v4564_v50 = vadd.f32 %v4132_v6, %v735_v54  ;;  %v3174_v20 = vpop.f32.mrf.mxu1  ;;  %6323 = vst [vmem:[#allocation28_spill] sm:$0xff] %v4567_v51 }
 0x11a   :  { %v4579_v54 = vmul.f32 %v4124_v3, %v873_v19  ;;  %v1530_v62 = vadd.f32 %v4412_v4, %v1397_v8  ;;  %v938_v19 = vmul.f32 %v4144_v13, %v4567_v51  ;;  %v737_v4 = vmul.f32 %v3174_v20, %v4116_v1 }
 0x11b   :  { %6320 = vst [vmem:[#allocation25_spill] sm:$0xff] %v4549_v57  ;;  %6322 = vst [vmem:[#allocation27_spill] sm:$0xff] %v4564_v50  ;;  %v907_v12 = vmul.f32 %v4144_v13, %v4549_v57  ;;  %v586_v41 = vpop.f32.mrf.mxu1  ;;  %v1367_v35 = vmul.f32 %v4162_v21, %v4549_v57  ;;  %v1366_v2 = vmul.f32 %v4162_v21, %v4561_v59 }
 0x11c   :  { %v736_v8 = vmul.f32 %v4116_v1, %v586_v41  ;;  %v1676_v20 = vsel %vm107_vm0, %v1530_v62, 0.0  ;;  %v4624_v41 = vadd.f32 %v4132_v6, %v704_v63  ;;  %v1399_v57 = vmul.f32 %v4162_v21, %v4564_v50 }
 0x11d   :  { %1121 = vadd.xlane.f32.xlu1 %v1120_v31  ;;  %1118 = vadd.xlane.f32.xlu0 %v1117_v60  ;;  %v1216_v60 = vsel %vm107_vm0, %v1070_v7, 0.0  ;;  %v3129_v31 = vpop.f32.mrf.mxu0  ;;  %v939_v7 = vmul.f32 %v4144_v13, %v4564_v50  ;;  %v3177_v48 = vpop.f32.mrf.mxu1  ;;  %v1040_v61 = vadd.f32 %v4422_v9, %v907_v12  ;;  %v1673_v9 = vsel %vm107_vm0, %v1529_v22, 0.0 }
 0x11e   :  { %6325 = vst [vmem:[#allocation30_spill] sm:$0xff] %v4624_v41  ;;  %v1398_v11 = vmul.f32 %v4162_v21, %v4567_v51  ;;  %v1500_v63 = vadd.f32 %v4450_v34, %v1367_v35  ;;  %v1499_v62 = vadd.f32 %v4453_v39, %v1366_v2  ;;  %v908_v34 = vmul.f32 %v4144_v13, %v4624_v41 }
 0x11f   :  { %v1072_v5 = vadd.f32 %v4447_v33, %v939_v7  ;;  %v707_v33 = vmul.f32 %v3129_v31, %v4116_v1  ;;  %v596_v16 = vpop.f32.mrf.mxu1  ;;  %v1126_v22 = vsel %vm107_vm0, %v1040_v61, 0.0  ;;  %v1123_v7 = vsel %vm107_vm0, %v1039_v47, 0.0 }
 0x120   :  { %v738_v39 = vmul.f32 %v4116_v1, %v596_v16 }
 0x121   :  { %1217 = vadd.xlane.f32.xlu1 %v1216_v60  ;;  %1214 = vadd.xlane.f32.xlu0 %v1213_v45  ;;  %v4610_v60 = vadd.f32 %v4132_v6, %v705_v38  ;;  %v436_v45 = vpop.f32.mrf.mxu0  ;;  %v1071_v38 = vadd.f32 %v4456_v46, %v938_v19  ;;  %v4637_v46 = vadd.f32 %v4132_v6, %v736_v8  ;;  %v1222_v31 = vsel %vm107_vm0, %v1072_v5, 0.0  ;;  %v3180_v2 = vpop.f32.mrf.mxu1 }
 0x122   :  { %v739_v8 = vmul.f32 %v3177_v48, %v4116_v1  ;;  %v4653_v61 = vadd.f32 %v4132_v6, %v707_v33  ;;  %v1586_v5 = vsel %vm107_vm0, %v1500_v63, 0.0  ;;  %v4681_v16 = vadd.f32 %v4132_v6, %v738_v39 }
 0x123   :  { %6324 = vst [vmem:[#allocation29_spill] sm:$0xff] %v4610_v60  ;;  %6327 = vst [vmem:[#allocation32_spill] sm:$0xff] %v4637_v46  ;;  %v909_v12 = vmul.f32 %v4144_v13, %v4610_v60  ;;  %v1219_v19 = vsel %vm107_vm0, %v1071_v38, 0.0  ;;  %v3132_v35 = vpop.f32.mrf.mxu0  ;;  %v940_v48 = vmul.f32 %v4144_v13, %v4637_v46  ;;  %v1368_v38 = vmul.f32 %v4162_v21, %v4624_v41 }
 0x124   :  { %6328 = vst [vmem:[#allocation33_spill] sm:$0xff] %v4653_v61  ;;  %v4675_v33 = vadd.f32 %v4132_v6, %v739_v8  ;;  %6331 = vst [vmem:[#allocation36_spill] sm:$0xff] %v4681_v16  ;;  %v606_v8 = vpop.f32.mrf.mxu1 }
 0x125   :  { %1581 = vadd.xlane.f32.xlu1 %v1580_v53  ;;  %1578 = vadd.xlane.f32.xlu0 %v1577_v42  ;;  %v706_v53 = vmul.f32 %v4116_v1, %v436_v45  ;;  %v4634_v42 = vadd.f32 %v4132_v6, %v737_v4  ;;  %v1532_v4 = vadd.f32 %v4459_v14, %v1399_v57  ;;  %v446_v63 = vpop.f32.mrf.mxu0 }
 0x126   :  { %v1531_v45 = vadd.f32 %v4462_v15, %v1398_v11  ;;  %v1042_v14 = vadd.f32 %v4465_v49, %v909_v12  ;;  %v1583_v15 = vsel %vm107_vm0, %v1499_v62, 0.0  ;;  %v1041_v11 = vadd.f32 %v4489_v24, %v908_v34  ;;  %6330 = vst [vmem:[#allocation35_spill] sm:$0xff] %v4675_v33 }
 0x127   :  { %6326 = vst [vmem:[#allocation31_spill] sm:$0xff] %v4634_v42  ;;  %v4656_v47 = vadd.f32 %v4132_v6, %v706_v53  ;;  %v941_v57 = vmul.f32 %v4144_v13, %v4634_v42  ;;  %v1682_v49 = vsel %vm107_vm0, %v1532_v4, 0.0  ;;  %v1400_v53 = vmul.f32 %v4162_v21, %v4637_v46 }
 0x128   :  { %v1679_v12 = vsel %vm107_vm0, %v1531_v45, 0.0  ;;  %v4688_v24 = vsel %vm107_vm0, %v1042_v14, 0.0  ;;  %v1073_v4 = vadd.f32 %v4502_v36, %v940_v48  ;;  %v709_v34 = vmul.f32 %v3132_v35, %v4116_v1 }
 0x129   :  { %1677 = vadd.xlane.f32.xlu1 %v1676_v20  ;;  %1674 = vadd.xlane.f32.xlu0 %v1673_v9  ;;  %6329 = vst [vmem:[#allocation34_spill] sm:$0xff] %v4656_v47  ;;  %v1369_v20 = vmul.f32 %v4162_v21, %v4610_v60  ;;  %v1401_v9 = vmul.f32 %v4162_v21, %v4634_v42  ;;  %v1129_v14 = vsel %vm107_vm0, %v1041_v11, 0.0 }
 0x12a   :  { %v1074_v62 = vadd.f32 %v4499_v28, %v941_v57  ;;  %v1501_v39 = vadd.f32 %v4495_v27, %v1368_v38  ;;  %v708_v42 = vmul.f32 %v4116_v1, %v446_v63  ;;  %v1533_v41 = vadd.f32 %v4525_v55, %v1400_v53  ;;  %v876_v63 = vld [vmem:[%s6236_s1 + $0x188] sm:$0xff] }
 0x12b   :  { %v1502_v45 = vadd.f32 %v4492_v25, %v1369_v20  ;;  %v1534_v46 = vadd.f32 %v4505_v29, %v1401_v9  ;;  %v943_v28 = vmul.f32 %v4144_v13, %v4675_v33  ;;  %v741_v36 = vmul.f32 %v3180_v2, %v4116_v1 }
 0x12c   :  { %v942_v27 = vmul.f32 %v4144_v13, %v4681_v16  ;;  %v740_v29 = vmul.f32 %v4116_v1, %v606_v8  ;;  %v4714_v55 = vadd.f32 %v4132_v6, %v709_v34  ;;  %v1371_v57 = vmul.f32 %v4162_v21, %v4653_v61  ;;  %v3183_v34 = vpop.f32.mrf.mxu1 }
 0x12d   :  { %1127 = vadd.xlane.f32.xlu1 %v1126_v22  ;;  %1124 = vadd.xlane.f32.xlu0 %v1123_v7  ;;  %v911_v22 = vmul.f32 %v4144_v13, %v4653_v61  ;;  %v910_v7 = vmul.f32 %v4144_v13, %v4656_v47  ;;  %v4725_v48 = vsel %vm107_vm0, %v1534_v46, 0.0  ;;  %v4728_v2 = vadd.f32 %v4132_v6, %v708_v42  ;;  %v844_v46 = vld [vmem:[%s6236_s1 + $0x88] sm:$0xff]  ;;  %v843_v42 = vld [vmem:[%s6236_s1 + $0x80] sm:$0xff] }
 0x12e   :  { %6332 = vst [vmem:[#allocation37_spill] sm:$0xff] %v4714_v55  ;;  %v4731_v20 = vsel %vm107_vm0, %v1533_v41, 0.0  ;;  %v1076_v38 = vadd.f32 %v4572_v32, %v943_v28  ;;  %v4735_v9 = vadd.f32 %v4132_v6, %v741_v36  ;;  %v1370_v11 = vmul.f32 %v4162_v21, %v4656_v47 }
 0x12f   :  { %v1044_v35 = vadd.f32 %v4528_v56, %v911_v22  ;;  %v1043_v25 = vadd.f32 %v4537_v43, %v910_v7  ;;  %v4719_v56 = vsel %vm107_vm0, %v1502_v45, 0.0  ;;  %v4722_v43 = vsel %vm107_vm0, %v1501_v39, 0.0  ;;  %6333 = vst [vmem:[#allocation38_spill] sm:$0xff] %v4728_v2 }
 0x130   :  { %6334 = vst [vmem:[#allocation39_spill] sm:$0xff] %v4735_v9  ;;  %v4753_v53 = vadd.f32 %v4132_v6, %v740_v29  ;;  %v1504_v22 = vadd.f32 %v4543_v58, %v1371_v57  ;;  %v1403_v7 = vmul.f32 %v4162_v21, %v4675_v33  ;;  %v982_v8 = vmul.f32 %v4124_v3, %v844_v46 }
 0x131   :  { %1223 = vadd.xlane.f32.xlu1 %v1222_v31  ;;  %1220 = vadd.xlane.f32.xlu0 %v1219_v19  ;;  %v4708_v31 = vsel %vm107_vm0, %v1074_v62, 0.0  ;;  %v4711_v19 = vsel %vm107_vm0, %v1073_v4, 0.0  ;;  %v4746_v41 = vsel %vm107_vm0, %v1044_v35, 0.0  ;;  %v4749_v32 = vsel %vm107_vm0, %v1043_v25, 0.0 }
 0x132   :  { %6335 = vst [vmem:[#allocation40_spill] sm:$0xff] %v4753_v53  ;;  %v1402_v62 = vmul.f32 %v4162_v21, %v4681_v16  ;;  %v913_v4 = vmul.f32 %v4144_v13, %v4714_v55  ;;  %v912_v45 = vmul.f32 %v4144_v13, %v4728_v2  ;;  %v981_v58 = vmul.f32 %v4124_v3, %v843_v42  ;;  %v616_v16 = vpop.f32.mrf.mxu1 }
 0x133   :  { %v4774_v28 = vsel %vm107_vm0, %v1076_v38, 0.0  ;;  %v1503_v36 = vadd.f32 %v4556_v40, %v1370_v11  ;;  %v945_v35 = vmul.f32 %v4144_v13, %v4735_v9  ;;  %v1014_v25 = vmul.f32 %v4124_v3, %v876_v63 }
 0x134   :  { %v944_v29 = vmul.f32 %v4144_v13, %v4753_v53  ;;  %v4790_v40 = vsel %vm107_vm0, %v1504_v22, 0.0  ;;  %v1536_v11 = vadd.f32 %v4584_v52, %v1403_v7  ;;  %v1046_v33 = vadd.f32 %v982_v8, %v913_v4  ;;  %v846_v22 = vld [vmem:[%s6236_s1 + $0x98] sm:$0xff] }
 0x135   :  { %1587 = vadd.xlane.f32.xlu1 %v1586_v5  ;;  %1584 = vadd.xlane.f32.xlu0 %v1583_v15  ;;  %v3135_v5 = vpop.f32.mrf.mxu0  ;;  %v1075_v15 = vadd.f32 %v4579_v54, %v942_v27  ;;  %v875_v54 = vld [vmem:[%s6236_s1 + $0x180] sm:$0xff]  ;;  %v1045_v47 = vadd.f32 %v981_v58, %v912_v45  ;;  %v1372_v52 = vmul.f32 %v4162_v21, %v4728_v2  ;;  %v3186_v58 = vpop.f32.mrf.mxu1 }
 0x136   :  { %v711_v39 = vmul.f32 %v3135_v5, %v4116_v1  ;;  %v1013_v57 = vmul.f32 %v4124_v3, %v875_v54  ;;  %v1535_v5 = vadd.f32 %v4587_v44, %v1402_v62  ;;  %v1441_v44 = vmul.f32 %v4139_v10, %v843_v42 }
 0x137   :  { %v456_v27 = vpop.f32.mrf.mxu0  ;;  %v4787_v38 = vsel %vm107_vm0, %v1075_v15, 0.0  ;;  %v743_v15 = vmul.f32 %v3183_v34, %v4116_v1  ;;  %v1078_v62 = vadd.f32 %v1014_v25, %v945_v35  ;;  %v1405_v8 = vmul.f32 %v4162_v21, %v4735_v9  ;;  %v845_v25 = vld [vmem:[%s6236_s1 + $0x90] sm:$0xff] }
 0x138   :  { %v4795_v61 = vadd.f32 %v4132_v6, %v711_v39  ;;  %v1077_v4 = vadd.f32 %v1013_v57, %v944_v29  ;;  %v1474_v34 = vmul.f32 %v4139_v10, %v876_v63  ;;  %v1404_v45 = vmul.f32 %v4162_v21, %v4753_v53  ;;  %v878_v29 = vld [vmem:[%s6236_s1 + $0x198] sm:$0xff] }
 0x139   :  { %1683 = vadd.xlane.f32.xlu1 %v1682_v49  ;;  %1680 = vadd.xlane.f32.xlu0 %v1679_v12  ;;  %v1373_v49 = vmul.f32 %v4162_v21, %v4714_v55  ;;  %v1442_v12 = vmul.f32 %v4139_v10, %v844_v46  ;;  %v710_v55 = vmul.f32 %v4116_v1, %v456_v27  ;;  %v4800_v46 = vsel %vm107_vm0, %v1503_v36, 0.0  ;;  %v3138_v7 = vpop.f32.mrf.mxu0 }
 0x13a   :  { %6336 = vst [vmem:[#allocation41_spill] sm:$0xff] %v4795_v61  ;;  %v1473_v42 = vmul.f32 %v4139_v10, %v875_v54  ;;  %v4817_v39 = vsel %vm107_vm0, %v1536_v11, 0.0  ;;  %v984_v35 = vmul.f32 %v4124_v3, %v846_v22  ;;  %v4828_v63 = vsel %vm107_vm0, %v1535_v5, 0.0  ;;  %v877_v11 = vld [vmem:[%s6236_s1 + $0x190] sm:$0xff] }
 0x13b   :  { %v4820_v36 = vadd.f32 %v4132_v6, %v710_v55  ;;  %v4831_v10 = vsel %vm107_vm0, %v1046_v33, 0.0  ;;  %v4834_v54 = vadd.f32 %v4132_v6, %v743_v15  ;;  %v1505_v55 = vadd.f32 %v1441_v44, %v1372_v52  ;;  %v466_v27 = vpop.f32.mrf.mxu0  ;;  %v4866_v15 = vld [vmem:[%s6241_s6] ss:$0 sm:$0xff] }
 0x13c   :  { %v4840_v3 = vsel %vm107_vm0, %v1045_v47, 0.0  ;;  %v713_v33 = vmul.f32 %v3138_v7, %v4116_v1  ;;  %v4853_v57 = vsel %vm107_vm0, %v1077_v4, 0.0  ;;  %v1538_v47 = vadd.f32 %v1474_v34, %v1405_v8  ;;  %v4872_v44 = vld [vmem:[%s6238_s3] ss:$0 sm:$0xff] }
 0x13d   :  { %1133 = vadd.xlane.f32.xlu1 %v4688_v24  ;;  %1130 = vadd.xlane.f32.xlu0 %v1129_v14  ;;  %v742_v24 = vmul.f32 %v4116_v1, %v616_v16  ;;  %v1506_v14 = vadd.f32 %v1442_v12, %v1373_v49  ;;  %6337 = vst [vmem:[#allocation42_spill] sm:$0xff] %v4820_v36  ;;  %6338 = vst [vmem:[#allocation43_spill] sm:$0xff] %v4834_v54  ;;  %v4887_v8 = vld [vmem:[%s6239_s4] ss:$0 sm:$0xff] }
 0x13e   :  { %v915_v16 = vmul.f32 %v4144_v13, %v4795_v61  ;;  %v1537_v12 = vadd.f32 %v1473_v42, %v1404_v45  ;;  %v914_v1 = vmul.f32 %v4144_v13, %v4820_v36  ;;  %v983_v52 = vmul.f32 %v4866_v15, %v845_v25 }
 0x13f   :  { %v4856_v49 = vsel %vm107_vm0, %v1506_v14, 0.0  ;;  %v712_v7 = vmul.f32 %v4872_v44, %v466_v27  ;;  %v947_v4 = vmul.f32 %v4144_v13, %v4834_v54  ;;  %v745_v14 = vmul.f32 %v4872_v44, %v3186_v58  ;;  %v4906_v58 = vld [vmem:[%s6241_s6 + $0x1] ss:$0 sm:$0xff]  ;;  %v3141_v27 = vpop.f32.mrf.mxu0 }
 0x140   :  { %v1048_v5 = vadd.f32 %v984_v35, %v915_v16  ;;  %v4890_v34 = vadd.f32 %v4887_v8, %v713_v33  ;;  %v1375_v42 = vmul.f32 %v4162_v21, %v4795_v61  ;;  %v1444_v16 = vmul.f32 %v4906_v58, %v846_v22 }
 0x141   :  { %1229 = vadd.xlane.f32.xlu1 %v4708_v31  ;;  %1226 = vadd.xlane.f32.xlu0 %v4711_v19  ;;  %v4843_v31 = vsel %vm107_vm0, %v1078_v62, 0.0  ;;  %v4846_v19 = vadd.f32 %v4132_v6, %v742_v24  ;;  %v626_v6 = vpop.f32.mrf.mxu1  ;;  %v4878_v62 = vsel %vm107_vm0, %v1505_v55, 0.0  ;;  %v1016_v24 = vmul.f32 %v4866_v15, %v878_v29 }
 0x142   :  { %6340 = vst [vmem:[#allocation45_spill] sm:$0xff] %v4890_v34  ;;  %v744_v45 = vmul.f32 %v4872_v44, %v626_v6  ;;  %v1374_v35 = vmul.f32 %v4162_v21, %v4820_v36  ;;  %v1443_v55 = vmul.f32 %v4906_v58, %v845_v25  ;;  %v1047_v33 = vadd.f32 %v983_v52, %v914_v1  ;;  %v4918_v6 = vld [vmem:[%s6240_s5 + $0x1] ss:$0 sm:$0xff]  ;;  %v848_v21 = vld [vmem:[%s6236_s1 + $0xa8] sm:$0xff] }
 0x143   :  { %6339 = vst [vmem:[#allocation44_spill] sm:$0xff] %v4846_v19  ;;  %v4913_v53 = vadd.f32 %v4887_v8, %v712_v7  ;;  %v1407_v61 = vmul.f32 %v4918_v6, %v4834_v54  ;;  %v1476_v22 = vmul.f32 %v4906_v58, %v878_v29  ;;  %v4929_v25 = vsel %vm107_vm0, %v1538_v47, 0.0  ;;  %v847_v29 = vld [vmem:[%s6236_s1 + $0xa0] sm:$0xff] }
 0x144   :  { %v4932_v1 = vadd.f32 %v4887_v8, %v745_v14  ;;  %v1406_v52 = vmul.f32 %v4918_v6, %v4846_v19  ;;  %v1475_v7 = vmul.f32 %v4906_v58, %v877_v11  ;;  %v4941_v54 = vsel %vm107_vm0, %v1537_v12, 0.0  ;;  %v879_v12 = vld [vmem:[%s6236_s1 + $0x1a0] sm:$0xff] }
 0x145   :  { %1593 = vadd.xlane.f32.xlu1 %v4719_v56  ;;  %1590 = vadd.xlane.f32.xlu0 %v4722_v43  ;;  %v4895_v56 = vld [vmem:[%s6240_s5] ss:$0 sm:$0xff]  ;;  %v1015_v43 = vmul.f32 %v4866_v15, %v877_v11  ;;  %6341 = vst [vmem:[#allocation46_spill] sm:$0xff] %v4913_v53  ;;  %v4944_v47 = vadd.f32 %v4887_v8, %v744_v45  ;;  %v880_v11 = vld [vmem:[%s6236_s1 + $0x1a8] sm:$0xff] }
 0x146   :  { %v946_v13 = vmul.f32 %v4895_v56, %v4846_v19  ;;  %6342 = vst [vmem:[#allocation47_spill] sm:$0xff] %v4932_v1  ;;  %v1508_v36 = vadd.f32 %v1444_v16, %v1375_v42  ;;  %v1507_v14 = vadd.f32 %v1443_v55, %v1374_v35  ;;  %v917_v9 = vmul.f32 %v4895_v56, %v4890_v34 }
 0x147   :  { %6343 = vst [vmem:[#allocation48_spill] sm:$0xff] %v4944_v47  ;;  %v986_v19 = vmul.f32 %v4866_v15, %v848_v21  ;;  %v985_v45 = vmul.f32 %v4866_v15, %v847_v29  ;;  %v715_v42 = vmul.f32 %v4872_v44, %v3141_v27  ;;  %v4962_v16 = vsel %vm107_vm0, %v1048_v5, 0.0 }
 0x148   :  { %v4965_v35 = vsel %vm107_vm0, %v1047_v33, 0.0  ;;  %v1539_v55 = vadd.f32 %v1475_v7, %v1406_v52  ;;  %v948_v2 = vmul.f32 %v4895_v56, %v4944_v47  ;;  %v1017_v27 = vmul.f32 %v4866_v15, %v879_v12 }
 0x149   :  { %1689 = vadd.xlane.f32.xlu1 %v4725_v48  ;;  %1686 = vadd.xlane.f32.xlu0 %v4731_v20  ;;  %v1080_v48 = vadd.f32 %v1016_v24, %v947_v4  ;;  %v1079_v20 = vadd.f32 %v1015_v43, %v946_v13  ;;  %v476_v4 = vpop.f32.mrf.mxu0  ;;  %v3189_v24 = vpop.f32.mrf.mxu1  ;;  %v1540_v13 = vadd.f32 %v1476_v22, %v1407_v61  ;;  %v4981_v33 = vsel %vm107_vm0, %v1508_v36, 0.0 }
 0x14a   :  { %v916_v43 = vmul.f32 %v4895_v56, %v4913_v53  ;;  %v949_v61 = vmul.f32 %v4895_v56, %v4932_v1  ;;  %v1018_v22 = vmul.f32 %v4866_v15, %v880_v11  ;;  %v4984_v52 = vsel %vm107_vm0, %v1507_v14, 0.0 }
 0x14b   :  { %v4978_v5 = vsel %vm107_vm0, %v1079_v20, 0.0  ;;  %v636_v7 = vpop.f32.mrf.mxu1  ;;  %v3144_v60 = vpop.f32.mrf.mxu0  ;;  %v4987_v51 = vsel %vm107_vm0, %v1540_v13, 0.0  ;;  %v1050_v50 = vadd.f32 %v986_v19, %v917_v9  ;;  %v4995_v36 = vsel %vm107_vm0, %v1539_v55, 0.0  ;;  %v850_v9 = vld [vmem:[%s6236_s1 + $0xb8] sm:$0xff] }
 0x14c   :  { %v1049_v59 = vadd.f32 %v985_v45, %v916_v43  ;;  %v1377_v20 = vmul.f32 %v4918_v6, %v4890_v34  ;;  %v1446_v14 = vmul.f32 %v4906_v58, %v848_v21  ;;  %v1082_v19 = vadd.f32 %v1018_v22, %v949_v61 }
 0x14d   :  { %1139 = vadd.xlane.f32.xlu1 %v4746_v41  ;;  %1136 = vadd.xlane.f32.xlu0 %v4749_v32  ;;  %v714_v41 = vmul.f32 %v4872_v44, %v476_v4  ;;  %v4975_v32 = vsel %vm107_vm0, %v1080_v48, 0.0  ;;  %v4990_v4 = vadd.f32 %v4887_v8, %v715_v42  ;;  %v747_v48 = vmul.f32 %v4872_v44, %v3189_v24  ;;  %v486_v42 = vpop.f32.mrf.mxu0  ;;  %v3192_v55 = vpop.f32.mrf.mxu1 }
 0x14e   :  { %v1081_v13 = vadd.f32 %v1017_v27, %v948_v2  ;;  %v1376_v43 = vmul.f32 %v4918_v6, %v4913_v53  ;;  %v1445_v24 = vmul.f32 %v4906_v58, %v847_v29  ;;  %v1409_v45 = vmul.f32 %v4918_v6, %v4932_v1 }
 0x14f   :  { %6344 = vst [vmem:[#allocation49_spill] sm:$0xff] %v4990_v4  ;;  %v1478_v21 = vmul.f32 %v4906_v58, %v880_v11  ;;  %v1408_v2 = vmul.f32 %v4918_v6, %v4944_v47  ;;  %v1477_v61 = vmul.f32 %v4906_v58, %v879_v12  ;;  %v919_v22 = vmul.f32 %v4895_v56, %v4990_v4  ;;  %v849_v12 = vld [vmem:[%s6236_s1 + $0xb0] sm:$0xff]  ;;  %v646_v1 = vpop.f32.mrf.mxu1 }
 0x150   :  { %v988_v27 = vmul.f32 %v4866_v15, %v850_v9  ;;  %v5023_v29 = vsel %vm107_vm0, %v1050_v50, 0.0  ;;  %v5026_v11 = vadd.f32 %v4887_v8, %v747_v48  ;;  %v5033_v47 = vsel %vm107_vm0, %v1049_v59, 0.0  ;;  %v882_v50 = vld [vmem:[%s6236_s1 + $0x1b8] sm:$0xff]  ;;  %v881_v59 = vld [vmem:[%s6236_s1 + $0x1b0] sm:$0xff] }
 0x151   :  { %1235 = vadd.xlane.f32.xlu1 %v4774_v28  ;;  %1232 = vadd.xlane.f32.xlu0 %v4787_v38  ;;  %v5005_v28 = vadd.f32 %v4887_v8, %v714_v41  ;;  %v746_v38 = vmul.f32 %v4872_v44, %v636_v7  ;;  %v1510_v41 = vadd.f32 %v1446_v14, %v1377_v20  ;;  %v5046_v20 = vsel %vm107_vm0, %v1081_v13, 0.0 }
 0x152   :  { %6346 = vst [vmem:[#allocation51_spill] sm:$0xff] %v5026_v11  ;;  %v717_v7 = vmul.f32 %v4872_v44, %v3144_v60  ;;  %v716_v48 = vmul.f32 %v4872_v44, %v486_v42  ;;  %6349 = vst [vmem:[#allocation54_spill] sm:$0xff] %v5046_v20  ;;  %v1509_v14 = vadd.f32 %v1445_v24, %v1376_v43 }
 0x153   :  { %6345 = vst [vmem:[#allocation50_spill] sm:$0xff] %v5005_v28  ;;  %v1542_v60 = vadd.f32 %v1478_v21, %v1409_v45  ;;  %v1052_v53 = vadd.f32 %v988_v27, %v919_v22  ;;  %v918_v34 = vmul.f32 %v4895_v56, %v5005_v28  ;;  %v987_v37 = vmul.f32 %v4866_v15, %v849_v12 }
 0x154   :  { %v5058_v13 = vsel %vm107_vm0, %v1510_v41, 0.0  ;;  %v5061_v43 = vadd.f32 %v4887_v8, %v717_v7  ;;  %v951_v24 = vmul.f32 %v4895_v56, %v5026_v11  ;;  %v1020_v45 = vmul.f32 %v4866_v15, %v882_v50 }
 0x155   :  { %1599 = vadd.xlane.f32.xlu1 %v4790_v40  ;;  %1596 = vadd.xlane.f32.xlu0 %v4800_v46  ;;  %v5036_v40 = vsel %vm107_vm0, %v1082_v19, 0.0  ;;  %v5039_v46 = vadd.f32 %v4887_v8, %v746_v38  ;;  %v749_v19 = vmul.f32 %v4872_v44, %v3192_v55  ;;  %v1541_v38 = vadd.f32 %v1477_v61, %v1408_v2  ;;  %v5076_v55 = vld [vmem:[%s6236_s1 + $0xc8] sm:$0xff] }
 0x156   :  { %6347 = vst [vmem:[#allocation52_spill] sm:$0xff] %v5036_v40  ;;  %6350 = vst [vmem:[#allocation55_spill] sm:$0xff] %v5058_v13  ;;  %v1019_v42 = vmul.f32 %v4866_v15, %v881_v59  ;;  %v1379_v61 = vmul.f32 %v4918_v6, %v4990_v4  ;;  %v1448_v22 = vmul.f32 %v4906_v58, %v850_v9  ;;  %v5100_v9 = vld [vmem:[%s6236_s1 + $0x1c8] sm:$0xff]  ;;  %v5136_v40 = vsel %vm107_vm0, %v1052_v53, 0.0 }
 0x157   :  { %6348 = vst [vmem:[#allocation53_spill] sm:$0xff] %v5039_v46  ;;  %6351 = vst [vmem:[#allocation56_spill] sm:$0xff] %v5061_v43  ;;  %v950_v21 = vmul.f32 %v4895_v56, %v5039_v46  ;;  %v5079_v2 = vadd.f32 %v4887_v8, %v749_v19  ;;  %v1378_v27 = vmul.f32 %v4918_v6, %v5005_v28  ;;  %v5105_v28 = vsel %vm107_vm0, %v1509_v14, 0.0 }
 0x158   :  { %v1447_v41 = vmul.f32 %v4906_v58, %v849_v12  ;;  %v1411_v7 = vmul.f32 %v4918_v6, %v5026_v11  ;;  %v1410_v19 = vmul.f32 %v4918_v6, %v5039_v46  ;;  %6354 = vst [vmem:[#allocation59_spill] sm:$0xff] %v5105_v28  ;;  %v1479_v12 = vmul.f32 %v4906_v58, %v881_v59  ;;  %v3147_v11 = vpop.f32.mrf.mxu0 }
 0x159   :  { %1695 = vadd.xlane.f32.xlu1 %v4817_v39  ;;  %1692 = vadd.xlane.f32.xlu0 %v4828_v63  ;;  %v5070_v39 = vadd.f32 %v4887_v8, %v716_v48  ;;  %v748_v63 = vmul.f32 %v4872_v44, %v646_v1  ;;  %6353 = vst [vmem:[#allocation58_spill] sm:$0xff] %v5079_v2  ;;  %v5089_v1 = vld [vmem:[%s6236_s1 + $0xc0] sm:$0xff] }
 0x15a   :  { %v1480_v48 = vmul.f32 %v4906_v58, %v882_v50  ;;  %v921_v50 = vmul.f32 %v4895_v56, %v5061_v43  ;;  %v990_v46 = vmul.f32 %v4866_v15, %v5076_v55  ;;  %v1051_v4 = vadd.f32 %v987_v37, %v918_v34  ;;  %v883_v37 = vld [vmem:[%s6236_s1 + $0x1c0] sm:$0xff]  ;;  %v3195_v34 = vpop.f32.mrf.mxu1  ;;  %v496_v20 = vpop.f32.mrf.mxu0 }
 0x15b   :  { %6352 = vst [vmem:[#allocation57_spill] sm:$0xff] %v5070_v39  ;;  %v5113_v30 = vadd.f32 %v4887_v8, %v748_v63  ;;  %v1084_v14 = vadd.f32 %v1020_v45, %v951_v24  ;;  %v1083_v23 = vadd.f32 %v1019_v42, %v950_v21  ;;  %v953_v59 = vmul.f32 %v4895_v56, %v5079_v2 }
 0x15c   :  { %v1022_v18 = vmul.f32 %v4866_v15, %v5100_v9  ;;  %v5127_v63 = vsel %vm107_vm0, %v1542_v60, 0.0  ;;  %v1512_v17 = vadd.f32 %v1448_v22, %v1379_v61  ;;  %v1511_v28 = vadd.f32 %v1447_v41, %v1378_v27 }
 0x15d   :  { %1145 = vadd.xlane.f32.xlu1 %v4831_v10  ;;  %1142 = vadd.xlane.f32.xlu0 %v4840_v3  ;;  %6355 = vst [vmem:[#allocation60_spill] sm:$0xff] %v5113_v30  ;;  %v920_v10 = vmul.f32 %v4895_v56, %v5070_v39  ;;  %v989_v3 = vmul.f32 %v4866_v15, %v5089_v1  ;;  %v5132_v24 = vsel %vm107_vm0, %v1541_v38, 0.0  ;;  %v656_v38 = vpop.f32.mrf.mxu1 }
 0x15e   :  { %v1544_v13 = vadd.f32 %v1480_v48, %v1411_v7  ;;  %v1543_v45 = vadd.f32 %v1479_v12, %v1410_v19  ;;  %v1054_v21 = vadd.f32 %v990_v46, %v921_v50  ;;  %v719_v42 = vmul.f32 %v4872_v44, %v3147_v11 }
 0x15f   :  { %v1053_v60 = vadd.f32 %v989_v3, %v920_v10  ;;  %v952_v61 = vmul.f32 %v4895_v56, %v5113_v30  ;;  %v1021_v22 = vmul.f32 %v4866_v15, %v883_v37  ;;  %v5148_v46 = vsel %vm107_vm0, %v1083_v23, 0.0 }
 0x160   :  { %v1086_v11 = vadd.f32 %v1022_v18, %v953_v59  ;;  %v5151_v53 = vsel %vm107_vm0, %v1512_v17, 0.0  ;;  %v5154_v27 = vsel %vm107_vm0, %v1511_v28, 0.0  ;;  %v718_v41 = vmul.f32 %v4872_v44, %v496_v20 }
 0x161   :  { %1241 = vadd.xlane.f32.xlu1 %v4843_v31  ;;  %1238 = vadd.xlane.f32.xlu0 %v4853_v57  ;;  %v5142_v31 = vsel %vm107_vm0, %v1051_v4, 0.0  ;;  %v5145_v57 = vsel %vm107_vm0, %v1084_v14, 0.0  ;;  %v751_v7 = vmul.f32 %v4872_v44, %v3195_v34  ;;  %v5161_v4 = vsel %vm107_vm0, %v1544_v13, 0.0 }
 0x162   :  { %v5164_v18 = vsel %vm107_vm0, %v1543_v45, 0.0  ;;  %v5167_v17 = vsel %vm107_vm0, %v1054_v21, 0.0  ;;  %v5170_v23 = vadd.f32 %v4887_v8, %v719_v42  ;;  %v5173_v48 = vsel %vm107_vm0, %v1053_v60, 0.0  ;;  %v5204_v60 = vld [vmem:[%s6236_s1 + $0xd8] sm:$0xff] }
 0x163   :  { %v1381_v13 = vmul.f32 %v4918_v6, %v5061_v43  ;;  %v5181_v50 = vsel %vm107_vm0, %v1086_v11, 0.0  ;;  %v1450_v10 = vmul.f32 %v4906_v58, %v5076_v55  ;;  %v5186_v3 = vadd.f32 %v4887_v8, %v718_v41 }
 0x164   :  { %6356 = vst [vmem:[#allocation61_spill] sm:$0xff] %v5170_v23  ;;  %v5189_v14 = vadd.f32 %v4887_v8, %v751_v7  ;;  %v1380_v59 = vmul.f32 %v4918_v6, %v5070_v39  ;;  %v1449_v34 = vmul.f32 %v4906_v58, %v5089_v1  ;;  %v1413_v55 = vmul.f32 %v4918_v6, %v5079_v2  ;;  %v5220_v7 = vld [vmem:[%s6236_s1 + $0xd0] sm:$0xff] }
 0x165   :  { %1605 = vadd.xlane.f32.xlu1 %v4856_v49  ;;  %1602 = vadd.xlane.f32.xlu0 %v4878_v62  ;;  %v1085_v49 = vadd.f32 %v1021_v22, %v952_v61  ;;  %v750_v62 = vmul.f32 %v4872_v44, %v656_v38  ;;  %6357 = vst [vmem:[#allocation62_spill] sm:$0xff] %v5186_v3 }
 0x166   :  { %v1194_v28 = vpop.xlane.xlu1 %1193  ;;  %v1098_v20 = vpop.xlane.xlu0 %1097  ;;  %6358 = vst [vmem:[#allocation63_spill] sm:$0xff] %v5189_v14  ;;  %v1482_v42 = vmul.f32 %v4906_v58, %v5100_v9  ;;  %v1481_v11 = vmul.f32 %v4906_v58, %v883_v37  ;;  %v1514_v41 = vadd.f32 %v1450_v10, %v1381_v13  ;;  %v923_v37 = vmul.f32 %v4895_v56, %v5170_v23 }
 0x167   :  { %v1320_v19 = vadd.f32 %v4601_v26, %v1194_v28  ;;  %v1288_v12 = vadd.f32 %v4601_v26, %v1098_v20  ;;  %v5207_v1 = vsel %vm107_vm0, %v1085_v49, 0.0  ;;  %v5225_v28 = vld [vmem:[%s6236_s1 + $0x1d8] sm:$0xff]  ;;  %v1513_v20 = vadd.f32 %v1449_v34, %v1380_v59 }
 0x168   :  { %v992_v49 = vmul.f32 %v4866_v15, %v5204_v60  ;;  %v922_v10 = vmul.f32 %v4895_v56, %v5186_v3 }
 0x169   :  { %v2944_v45 = vmul.f32 -1.442695, %v1320_v19  ;;  %v2912_v21 = vmul.f32 -1.442695, %v1288_v12  ;;  %1701 = vadd.xlane.f32.xlu1 %v4929_v25  ;;  %1698 = vadd.xlane.f32.xlu0 %v4941_v54  ;;  %v5210_v25 = vadd.f32 %v4887_v8, %v750_v62  ;;  %v1412_v54 = vmul.f32 %v4918_v6, %v5113_v30  ;;  %v3150_v62 = vpop.f32.mrf.mxu0 }
 0x16a   :  { %v1558_v61 = vpop.xlane.xlu1 %1557  ;;  %v1095_v22 = vpop.xlane.xlu0 %1094  ;;  %v1546_v12 = vadd.f32 %v1482_v42, %v1413_v55  ;;  %v5249_v42 = vsel %vm107_vm0, %v1514_v41, 0.0 }
 0x16b   :  { %6359 = vst [vmem:[#allocation64_spill] sm:$0xff] %v5210_v25  ;;  %3205 = vpow2.f32 %v2944_v45  ;;  %v1748_v9 = vadd.f32 %v4607_v0, %v1558_v61  ;;  %v1287_v38 = vadd.f32 %v4601_v26, %v1095_v22  ;;  %v3198_v45 = vpop.f32.mrf.mxu1  ;;  %v1545_v34 = vadd.f32 %v1481_v11, %v1412_v54  ;;  %v506_v30 = vpop.f32.mrf.mxu0 }
 0x16c   :  { %3207 = vpow2.f32 %v2912_v21  ;;  %v991_v61 = vmul.f32 %v4866_v15, %v5220_v7  ;;  %v955_v22 = vmul.f32 %v4895_v56, %v5189_v14  ;;  %v5252_v54 = vsel %vm107_vm0, %v1513_v20, 0.0 }
 0x16d   :  { %v2976_v13 = vmul.f32 -1.442695, %v1748_v9  ;;  %v2911_v19 = vmul.f32 -1.442695, %v1287_v38  ;;  %1151 = vadd.xlane.f32.xlu1 %v4962_v16  ;;  %1148 = vadd.xlane.f32.xlu0 %v4965_v35  ;;  %v1024_v9 = vmul.f32 %v4866_v15, %v5225_v28  ;;  %v5244_v16 = vld [vmem:[%s6236_s1 + $0x1d0] sm:$0xff]  ;;  %v1056_v11 = vadd.f32 %v992_v49, %v923_v37 }
 0x16e   :  { %v1654_v21 = vpop.xlane.xlu1 %1653  ;;  %v1191_v59 = vpop.xlane.xlu0 %1190  ;;  %v721_v38 = vmul.f32 %v4872_v44, %v3150_v62  ;;  %v1023_v41 = vmul.f32 %v4866_v15, %v5244_v16  ;;  %v5262_v37 = vsel %vm107_vm0, %v1546_v12, 0.0  ;;  %v5265_v49 = vsel %vm107_vm0, %v1545_v34, 0.0 }
 0x16f   :  { %3209 = vpow2.f32 %v2976_v13  ;;  %v1780_v35 = vadd.f32 %v4607_v0, %v1654_v21  ;;  %v1319_v55 = vadd.f32 %v4601_v26, %v1191_v59  ;;  %v954_v13 = vmul.f32 %v4895_v56, %v5210_v25  ;;  %6360 = vst [vmem:[#allocation65_spill] sm:$0xff] %v5265_v49 }
 0x170   :  { %3211 = vpow2.f32 %v2911_v19  ;;  %v666_v19 = vpop.f32.mrf.mxu1  ;;  %v1055_v62 = vadd.f32 %v991_v61, %v922_v10  ;;  %v1088_v59 = vadd.f32 %v1024_v9, %v955_v22  ;;  %v5274_v43 = vadd.f32 %v4887_v8, %v721_v38 }
 0x171   :  { %v3008_v2 = vmul.f32 -1.442695, %v1780_v35  ;;  %v2943_v39 = vmul.f32 -1.442695, %v1319_v55  ;;  %1247 = vadd.xlane.f32.xlu1 %v4975_v32  ;;  %1244 = vadd.xlane.f32.xlu0 %v4978_v5  ;;  %v720_v35 = vmul.f32 %v4872_v44, %v506_v30  ;;  %v5271_v55 = vsel %vm107_vm0, %v1056_v11, 0.0 }
 0x172   :  { %v1555_v21 = vpop.xlane.xlu0 %1554  ;;  %v1104_v20 = vpop.xlane.xlu1 %1103  ;;  %v753_v12 = vmul.f32 %v4872_v44, %v3198_v45  ;;  %v752_v10 = vmul.f32 %v4872_v44, %v666_v19  ;;  %v5284_v22 = vsel %vm107_vm0, %v1088_v59, 0.0  ;;  %v1383_v45 = vmul.f32 %v4918_v6, %v5170_v23 }
 0x173   :  { %3213 = vpow2.f32 %v3008_v2  ;;  %v1747_v32 = vadd.f32 %v4607_v0, %v1555_v21  ;;  %v1290_v5 = vadd.f32 %v4601_v26, %v1104_v20  ;;  %v1087_v2 = vadd.f32 %v1023_v41, %v954_v13 }
 0x174   :  { %3215 = vpow2.f32 %v2943_v39  ;;  %v5281_v39 = vsel %vm107_vm0, %v1055_v62, 0.0  ;;  %v1452_v9 = vmul.f32 %v4906_v58, %v5204_v60  ;;  %v5293_v11 = vadd.f32 %v4887_v8, %v720_v35 }
 0x175   :  { %v2975_v34 = vmul.f32 -1.442695, %v1747_v32  ;;  %v2914_v49 = vmul.f32 -1.442695, %v1290_v5  ;;  %1611 = vadd.xlane.f32.xlu1 %v4981_v33  ;;  %1608 = vadd.xlane.f32.xlu0 %v4984_v52  ;;  %v5296_v13 = vadd.f32 %v4887_v8, %v753_v12  ;;  %v1382_v41 = vmul.f32 %v4918_v6, %v5186_v3 }
 0x176   :  { %v1651_v61 = vpop.xlane.xlu0 %1650  ;;  %v1200_v30 = vpop.xlane.xlu1 %1199  ;;  %v1451_v19 = vmul.f32 %v4906_v58, %v5220_v7  ;;  %v5305_v62 = vsel %vm107_vm0, %v1087_v2, 0.0  ;;  %v1516_v12 = vadd.f32 %v1452_v9, %v1383_v45  ;;  %v1415_v7 = vmul.f32 %v4918_v6, %v5189_v14 }
 0x177   :  { %3217 = vpow2.f32 %v2975_v34  ;;  %v1779_v33 = vadd.f32 %v4607_v0, %v1651_v61  ;;  %v1322_v52 = vadd.f32 %v4601_v26, %v1200_v30  ;;  %v1414_v61 = vmul.f32 %v4918_v6, %v5210_v25 }
 0x178   :  { %v3206_v38 = vpop.eup %3205  ;;  %3219 = vpow2.f32 %v2914_v49  ;;  %v5308_v49 = vadd.f32 %v4887_v8, %v752_v10  ;;  %v1515_v10 = vadd.f32 %v1451_v19, %v1382_v41  ;;  %v1483_v30 = vmul.f32 %v4906_v58, %v5244_v16 }
 0x179   :  { %v3208_v60 = vpop.eup %3207  ;;  %v2036_v21 = vadd.f32 1.0, %v3206_v38  ;;  %v3007_v20 = vmul.f32 -1.442695, %v1779_v33  ;;  %1707 = vadd.xlane.f32.xlu1 %v4987_v51  ;;  %1704 = vadd.xlane.f32.xlu0 %v4995_v36  ;;  %v2946_v32 = vmul.f32 -1.442695, %v1322_v52  ;;  %v1484_v36 = vmul.f32 %v4906_v58, %v5225_v28  ;;  %v5325_v28 = vld [vmem:[%s6236_s1 + $0xe8] sm:$0xff] }
 0x17a   :  { %v2004_v59 = vadd.f32 1.0, %v3208_v60  ;;  %v1197_v5 = vpop.xlane.xlu0 %1196  ;;  %v1564_v35 = vpop.xlane.xlu1 %1563  ;;  %v925_v52 = vmul.f32 %v4895_v56, %v5274_v43  ;;  %v5330_v60 = vsel %vm107_vm0, %v1516_v12, 0.0 }
 0x17b   :  { %3221 = vrcp.f32 %v2036_v21  ;;  %v1321_v34 = vadd.f32 %v4601_v26, %v1197_v5  ;;  %v1750_v51 = vadd.f32 %v4607_v0, %v1564_v35  ;;  %v1548_v21 = vadd.f32 %v1484_v36, %v1415_v7  ;;  %v6362_v36 = vld [vmem:[#allocation54_spill] sm:$0xff] }
 0x17c   :  { %v3210_v2 = vpop.eup %3209  ;;  %3223 = vrcp.f32 %v2004_v59  ;;  %v994_v5 = vmul.f32 %v4866_v15, %v5325_v28  ;;  %v924_v35 = vmul.f32 %v4895_v56, %v5293_v11 }
 0x17d   :  { %v3212_v45 = vpop.eup %3211  ;;  %v2452_v9 = vadd.f32 1.0, %v3210_v2  ;;  %3225 = vpow2.f32 %v3007_v20  ;;  %v2945_v33 = vmul.f32 -1.442695, %v1321_v34  ;;  %1157 = vadd.xlane.f32.xlu1 %v5023_v29  ;;  %1154 = vadd.xlane.f32.xlu0 %v5033_v47  ;;  %v2978_v41 = vmul.f32 -1.442695, %v1750_v51  ;;  %v5337_v20 = vld [vmem:[%s6236_s1 + $0xe0] sm:$0xff] }
 0x17e   :  { %v2003_v38 = vadd.f32 1.0, %v3212_v45  ;;  %3227 = vpow2.f32 %v2946_v32  ;;  %v1660_v16 = vpop.xlane.xlu1 %1659  ;;  %v1561_v19 = vpop.xlane.xlu0 %1560  ;;  %v5340_v32 = vsel %vm107_vm0, %v1515_v10, 0.0  ;;  %v6361_v51 = vld [vmem:[#allocation52_spill] sm:$0xff]  ;;  %v1547_v2 = vadd.f32 %v1483_v30, %v1414_v61 }
 0x17f   :  { %3229 = vrcp.f32 %v2452_v9  ;;  %v1782_v29 = vadd.f32 %v4607_v0, %v1660_v16  ;;  %v1749_v47 = vadd.f32 %v4607_v0, %v1561_v19  ;;  %v3153_v45 = vpop.f32.mrf.mxu0  ;;  %v993_v19 = vmul.f32 %v4866_v15, %v5337_v20 }
 0x180   :  { %v3214_v59 = vpop.eup %3213  ;;  %3231 = vrcp.f32 %v2003_v38  ;;  %v723_v61 = vmul.f32 %v4872_v44, %v3153_v45 }
 0x181   :  { %v3216_v12 = vpop.eup %3215  ;;  %v2484_v34 = vadd.f32 1.0, %v3214_v59  ;;  %3233 = vpow2.f32 %v2945_v33  ;;  %v3010_v7 = vmul.f32 -1.442695, %v1782_v29  ;;  %1253 = vadd.xlane.f32.xlu1 %v6361_v51  ;;  %1250 = vadd.xlane.f32.xlu0 %v6362_v36  ;;  %v2977_v10 = vmul.f32 -1.442695, %v1749_v47  ;;  %v5353_v59 = vld [vmem:[%s6236_s1 + $0x1e8] sm:$0xff] }
 0x182   :  { %v2035_v9 = vadd.f32 1.0, %v3216_v12  ;;  %3235 = vpow2.f32 %v2978_v41  ;;  %v1657_v38 = vpop.xlane.xlu0 %1656  ;;  %v1101_v16 = vpop.xlane.xlu1 %1100  ;;  %v5359_v41 = vsel %vm107_vm0, %v1548_v21, 0.0  ;;  %v1058_v47 = vadd.f32 %v994_v5, %v925_v52 }
 0x183   :  { %3237 = vrcp.f32 %v2484_v34  ;;  %v1781_v33 = vadd.f32 %v4607_v0, %v1657_v38  ;;  %v1289_v29 = vadd.f32 %v4601_v26, %v1101_v16  ;;  %v957_v12 = vmul.f32 %v4895_v56, %v5296_v13  ;;  %v6363_v34 = vld [vmem:[#allocation55_spill] sm:$0xff] }
 0x184   :  { %v3218_v30 = vpop.eup %3217  ;;  %3239 = vrcp.f32 %v2035_v9  ;;  %v6364_v38 = vld [vmem:[#allocation59_spill] sm:$0xff]  ;;  %v1026_v45 = vmul.f32 %v4866_v15, %v5353_v59  ;;  %v1057_v52 = vadd.f32 %v993_v19, %v924_v35  ;;  %v5381_v35 = vadd.f32 %v4887_v8, %v723_v61 }
 0x185   :  { %v3220_v51 = vpop.eup %3219  ;;  %v2451_v36 = vadd.f32 1.0, %v3218_v30  ;;  %3241 = vpow2.f32 %v3010_v7  ;;  %v3009_v25 = vmul.f32 -1.442695, %v1781_v33  ;;  %1617 = vadd.xlane.f32.xlu1 %v6363_v34  ;;  %1614 = vadd.xlane.f32.xlu0 %v6364_v38  ;;  %v2913_v9 = vmul.f32 -1.442695, %v1289_v29  ;;  %v5375_v33 = vld [vmem:[%s6236_s1 + $0x1e0] sm:$0xff]  ;;  %v516_v34 = vpop.f32.mrf.mxu0 }
 0x186   :  { %v2006_v16 = vadd.f32 1.0, %v3220_v51  ;;  %3243 = vpow2.f32 %v2977_v10  ;;  %v1110_v21 = vpop.xlane.xlu1 %1109  ;;  %v1107_v14 = vpop.xlane.xlu0 %1106  ;;  %v5370_v7 = vsel %vm107_vm0, %v1547_v2, 0.0  ;;  %v5378_v29 = vsel %vm107_vm0, %v1058_v47, 0.0 }
 0x187   :  { %3245 = vrcp.f32 %v2451_v36  ;;  %v1292_v5 = vadd.f32 %v4601_v26, %v1110_v21  ;;  %v1291_v30 = vadd.f32 %v4601_v26, %v1107_v14  ;;  %v3201_v51 = vpop.f32.mrf.mxu1  ;;  %v956_v14 = vmul.f32 %v4895_v56, %v5308_v49 }
 0x188   :  { %v3222_v10 = vpop.eup %3221  ;;  %3247 = vrcp.f32 %v2006_v16  ;;  %v1090_v38 = vadd.f32 %v1026_v45, %v957_v12  ;;  %v5388_v3 = vsel %vm107_vm0, %v1057_v52, 0.0  ;;  %v1025_v61 = vmul.f32 %v4866_v15, %v5375_v33  ;;  %v3723_v15 = vld [vmem:[%s6236_s1 + $0x8] sm:$0xff] }
 0x189   :  { %v3224_v2 = vpop.eup %3223  ;;  %3249 = vpow2.f32 %v3009_v25  ;;  %v2916_v19 = vmul.f32 -1.442695, %v1292_v5  ;;  %v2915_v36 = vmul.f32 -1.442695, %v1291_v30  ;;  %1713 = vadd.xlane.f32.xlu1 %v5127_v63  ;;  %1710 = vadd.xlane.f32.xlu0 %v5132_v24  ;;  %6365 = vst [vmem:[#allocation52_spill] sm:$0xff] %v5388_v3  ;;  %v722_v56 = vmul.f32 %v4872_v44, %v516_v34  ;;  %v676_v12 = vpop.f32.mrf.mxu1 }
 0x18a   :  { %v3226_v21 = vpop.eup %3225  ;;  %3251 = vpow2.f32 %v2913_v9  ;;  %v1206_v16 = vpop.xlane.xlu1 %1205  ;;  %v6366_v9 = vld [vmem:[#allocation5_spill] sm:$0xff]  ;;  %v755_v52 = vmul.f32 %v4872_v44, %v3201_v51  ;;  %v754_v51 = vmul.f32 %v4872_v44, %v676_v12  ;;  %v3724_v44 = vld [vmem:[%s6236_s1 + $0x108] sm:$0xff] }
 0x18b   :  { %v1203_v47 = vpop.xlane.xlu0 %1202  ;;  %v3228_v25 = vpop.eup %3227  ;;  %v2483_v5 = vadd.f32 1.0, %v3226_v21  ;;  %3253 = vpow2.f32 %v2916_v19  ;;  %v1324_v63 = vadd.f32 %v4601_v26, %v1206_v16  ;;  %v2196_v30 = vmul.f32 %v3224_v2, %v6366_v9 }
 0x18c   :  { %v1323_v24 = vadd.f32 %v4601_v26, %v1203_v47  ;;  %v3230_v45 = vpop.eup %3229  ;;  %v2038_v23 = vadd.f32 1.0, %v3228_v25  ;;  %3255 = vpow2.f32 %v2915_v36  ;;  %v5403_v36 = vsel %vm107_vm0, %v1090_v38, 0.0 }
 0x18d   :  { %v3232_v3 = vpop.eup %3231  ;;  %v2644_v34 = vmul.f32 %v3723_v15, %v3230_v45  ;;  %3257 = vrcp.f32 %v2483_v5  ;;  %v2948_v19 = vmul.f32 -1.442695, %v1324_v63  ;;  %1163 = vadd.xlane.f32.xlu1 %v5136_v40  ;;  %1160 = vadd.xlane.f32.xlu0 %v5142_v31  ;;  %6367 = vst [vmem:[#allocation54_spill] sm:$0xff] %v5403_v36  ;;  %v5408_v25 = vmul.f32 %v4918_v6, %v5274_v43  ;;  %v6368_v15 = vld [vmem:[#allocation6_spill] sm:$0xff] }
 0x18e   :  { %v2947_v21 = vmul.f32 -1.442695, %v1323_v24  ;;  %v3234_v16 = vpop.eup %3233  ;;  %3259 = vrcp.f32 %v2038_v23  ;;  %v1570_v2 = vpop.xlane.xlu1 %1569  ;;  %v1089_v9 = vadd.f32 %v1025_v61, %v956_v14  ;;  %v2228_v36 = vmul.f32 %v3222_v10, %v6368_v15 }
 0x18f   :  { %v1567_v47 = vpop.xlane.xlu0 %1566  ;;  %v3236_v5 = vpop.eup %3235  ;;  %v2708_v63 = vadd.f32 %v2644_v34, %v2196_v30  ;;  %v2037_v24 = vadd.f32 1.0, %v3234_v16  ;;  %3261 = vpow2.f32 %v2948_v19  ;;  %v1752_v40 = vadd.f32 %v4607_v0, %v1570_v2 }
 0x190   :  { %v3238_v31 = vpop.eup %3237  ;;  %v2454_v45 = vadd.f32 1.0, %v3236_v5  ;;  %3263 = vpow2.f32 %v2947_v21  ;;  %v1751_v23 = vadd.f32 %v4607_v0, %v1567_v47  ;;  %v5423_v19 = vadd.f32 %v4887_v8, %v722_v56  ;;  %v6369_v56 = vld [vmem:[#allocation7_spill] sm:$0xff] }
 0x191   :  { %v3240_v38 = vpop.eup %3239  ;;  %2772 = vst.msk [vmem:[%s6243_s8 + $0x8] sm:$0xff] %vm107_vm0, %v2708_v63  ;;  %v2676_v12 = vmul.f32 %v3724_v44, %v3238_v31  ;;  %3265 = vrcp.f32 %v2037_v24  ;;  %v2980_v30 = vmul.f32 -1.442695, %v1752_v40  ;;  %1259 = vadd.xlane.f32.xlu1 %v5145_v57  ;;  %1256 = vadd.xlane.f32.xlu0 %v5148_v46  ;;  %v1454_v21 = vmul.f32 %v4906_v58, %v5325_v28  ;;  %v3725_v28 = vld [vmem:[%s6236_s1] sm:$0xff] }
 0x192   :  { %v3242_v14 = vpop.eup %3241  ;;  %3267 = vrcp.f32 %v2454_v45  ;;  %v2979_v61 = vmul.f32 -1.442695, %v1751_v23  ;;  %v1666_v10 = vpop.xlane.xlu1 %1665  ;;  %v5430_v24 = vadd.f32 %v4887_v8, %v755_v52  ;;  %v2195_v31 = vmul.f32 %v3232_v3, %v6369_v56 }
 0x193   :  { %v1663_v34 = vpop.xlane.xlu0 %1662  ;;  %v3244_v16 = vpop.eup %3243  ;;  %v2740_v2 = vadd.f32 %v2676_v12, %v2228_v36  ;;  %v2486_v47 = vadd.f32 1.0, %v3242_v14  ;;  %3269 = vpow2.f32 %v2980_v30  ;;  %v1784_v5 = vadd.f32 %v4607_v0, %v1666_v10 }
 0x194   :  { %v3246_v57 = vpop.eup %3245  ;;  %v2453_v63 = vadd.f32 1.0, %v3244_v16  ;;  %3271 = vpow2.f32 %v2979_v61  ;;  %v1783_v46 = vadd.f32 %v4607_v0, %v1663_v34  ;;  %v5445_v44 = vadd.f32 %v4887_v8, %v754_v51 }
 0x195   :  { %v5432_v40 = vpop.eup %3247  ;;  %2804 = vst.msk [vmem:[%s6243_s8 + $0x108] sm:$0xff] %vm107_vm0, %v2740_v2  ;;  %v2643_v36 = vmul.f32 %v3725_v28, %v3246_v57  ;;  %3273 = vrcp.f32 %v2486_v47  ;;  %v3012_v45 = vmul.f32 -1.442695, %v1784_v5  ;;  %1623 = vadd.xlane.f32.xlu1 %v5151_v53  ;;  %1620 = vadd.xlane.f32.xlu0 %v5154_v27  ;;  %v1384_v12 = vmul.f32 %v4918_v6, %v5293_v11  ;;  %v6370_v57 = vld [vmem:[#allocation8_spill] sm:$0xff] }
 0x196   :  { %v3250_v52 = vpop.eup %3249  ;;  %3275 = vrcp.f32 %v2453_v63  ;;  %v3011_v23 = vmul.f32 -1.442695, %v1783_v46  ;;  %v1116_v3 = vpop.xlane.xlu1 %1115  ;;  %v1453_v16 = vmul.f32 %v4906_v58, %v5337_v20  ;;  %v5460_v47 = vsel %vm107_vm0, %v1089_v9, 0.0 }
 0x197   :  { %v1113_v15 = vpop.xlane.xlu0 %1112  ;;  %v3252_v30 = vpop.eup %3251  ;;  %v2707_v14 = vadd.f32 %v2643_v36, %v2195_v31  ;;  %v2485_v61 = vadd.f32 1.0, %v3250_v52  ;;  %3277 = vpow2.f32 %v3012_v45  ;;  %v1294_v10 = vadd.f32 %v4601_v26, %v1116_v3  ;;  %v3726_v36 = vld [vmem:[%s6236_s1 + $0x100] sm:$0xff] }
 0x198   :  { %v3254_v53 = vpop.eup %3253  ;;  %v2005_v34 = vadd.f32 1.0, %v3252_v30  ;;  %3279 = vpow2.f32 %v3011_v23  ;;  %v1293_v27 = vadd.f32 %v4601_v26, %v1113_v15  ;;  %v2227_v63 = vmul.f32 %v3240_v38, %v6370_v57 }
 0x199   :  { %v3256_v2 = vpop.eup %3255  ;;  %2771 = vst.msk [vmem:[%s6243_s8] sm:$0xff] %vm107_vm0, %v2707_v14  ;;  %3281 = vrcp.f32 %v2485_v61  ;;  %v2008_v8 = vadd.f32 1.0, %v3254_v53  ;;  %v2918_v51 = vmul.f32 -1.442695, %v1294_v10  ;;  %1719 = vadd.xlane.f32.xlu1 %v5161_v4  ;;  %1716 = vadd.xlane.f32.xlu0 %v5164_v18  ;;  %v1518_v38 = vadd.f32 %v1454_v21, %v5408_v25 }
 0x19a   :  { %v3258_v5 = vpop.eup %3257  ;;  %3283 = vrcp.f32 %v2005_v34  ;;  %v2007_v20 = vadd.f32 1.0, %v3256_v2  ;;  %v2917_v46 = vmul.f32 -1.442695, %v1293_v27  ;;  %v1212_v56 = vpop.xlane.xlu1 %1211  ;;  %v1417_v52 = vmul.f32 %v4918_v6, %v5296_v13 }
 0x19b   :  { %v1209_v31 = vpop.xlane.xlu0 %1208  ;;  %v3260_v28 = vpop.eup %3259  ;;  %v2675_v45 = vmul.f32 %v3726_v36, %v3258_v5  ;;  %3285 = vrcp.f32 %v2008_v8  ;;  %v1326_v4 = vadd.f32 %v4601_v26, %v1212_v56  ;;  %v1486_v23 = vmul.f32 %v4906_v58, %v5353_v59  ;;  %v6371_v8 = vld [vmem:[#allocation9_spill] sm:$0xff] }
 0x19c   :  { %v1325_v18 = vadd.f32 %v4601_v26, %v1209_v31  ;;  %v3262_v9 = vpop.eup %3261  ;;  %3287 = vrcp.f32 %v2007_v20  ;;  %v5475_v34 = vadd.f32 %v1453_v16, %v1384_v12  ;;  %v2198_v12 = vmul.f32 %v5432_v40, %v6371_v8  ;;  %v3727_v16 = vld [vmem:[%s6236_s1 + $0x18] sm:$0xff] }
 0x19d   :  { %v3264_v3 = vpop.eup %3263  ;;  %v2739_v15 = vadd.f32 %v2675_v45, %v2227_v63  ;;  %v2040_v30 = vadd.f32 1.0, %v3262_v9  ;;  %3289 = vpow2.f32 %v2918_v51  ;;  %v2950_v14 = vmul.f32 -1.442695, %v1326_v4  ;;  %1169 = vadd.xlane.f32.xlu1 %v5167_v17  ;;  %1166 = vadd.xlane.f32.xlu0 %v5173_v48  ;;  %v6372_v63 = vld [vmem:[#allocation10_spill] sm:$0xff] }
 0x19e   :  { %v3266_v61 = vpop.eup %3265  ;;  %v2039_v10 = vadd.f32 1.0, %v3264_v3  ;;  %3291 = vpow2.f32 %v2917_v46  ;;  %v2949_v53 = vmul.f32 -1.442695, %v1325_v18  ;;  %v1576_v25 = vpop.xlane.xlu1 %1575  ;;  %v5485_v48 = vmul.f32 %v4918_v6, %v5308_v49 }
 0x19f   :  { %v1573_v21 = vpop.xlane.xlu0 %1572  ;;  %v3268_v27 = vpop.eup %3267  ;;  %2803 = vst.msk [vmem:[%s6243_s8 + $0x100] sm:$0xff] %vm107_vm0, %v2739_v15  ;;  %3293 = vrcp.f32 %v2040_v30  ;;  %v1754_v59 = vadd.f32 %v4607_v0, %v1576_v25  ;;  %v5494_v5 = vmul.f32 %v4906_v58, %v5375_v33  ;;  %v2230_v20 = vmul.f32 %v3260_v28, %v6372_v63  ;;  %v3728_v58 = vld [vmem:[%s6236_s1 + $0x118] sm:$0xff]  ;;  %v5516_v15 = vld [vmem:[%s6240_s5] ss:$0 sm:$0xff] }
 0x1a0   :  { %v1753_v17 = vadd.f32 %v4607_v0, %v1573_v21  ;;  %v3270_v2 = vpop.eup %3269  ;;  %v2646_v51 = vmul.f32 %v3727_v16, %v3268_v27  ;;  %3295 = vrcp.f32 %v2039_v10  ;;  %v5511_v3 = vadd.f32 %v1486_v23, %v1417_v52  ;;  %v6373_v23 = vld [vmem:[#allocation11_spill] sm:$0xff]  ;;  %v6374_v63 = vld [vmem:[#allocation12_spill] sm:$0xff] }
 0x1a1   :  { %v3272_v57 = vpop.eup %3271  ;;  %v2456_v46 = vadd.f32 1.0, %v3270_v2  ;;  %3297 = vpow2.f32 %v2950_v14  ;;  %v2982_v6 = vmul.f32 -1.442695, %v1754_v59  ;;  %1265 = vadd.xlane.f32.xlu1 %v5181_v50  ;;  %1262 = vadd.xlane.f32.xlu0 %v5207_v1  ;;  %v5509_v1 = vsel %vm107_vm0, %v1518_v38, 0.0  ;;  %v5527_v38 = vld [vmem:[%s6236_s1 + $0xf8] sm:$0xff] }
 0x1a2   :  { %v3274_v40 = vpop.eup %3273  ;;  %v2710_v56 = vadd.f32 %v2646_v51, %v2198_v12  ;;  %v2455_v31 = vadd.f32 1.0, %v3272_v57  ;;  %3299 = vpow2.f32 %v2949_v53  ;;  %v2981_v36 = vmul.f32 -1.442695, %v1753_v17  ;;  %v1672_v45 = vpop.xlane.xlu1 %1671  ;;  %v3731_v51 = vld [vmem:[%s6236_s1 + $0x10] sm:$0xff] }
 0x1a3   :  { %v1669_v4 = vpop.xlane.xlu0 %1668  ;;  %v3276_v18 = vpop.eup %3275  ;;  %v2678_v33 = vmul.f32 %v3728_v58, %v3274_v40  ;;  %3301 = vrcp.f32 %v2456_v46  ;;  %v1786_v28 = vadd.f32 %v4607_v0, %v1672_v45  ;;  %v5520_v30 = vmul.f32 %v5516_v15, %v5381_v35  ;;  %v5546_v46 = vld [vmem:[%s6241_s6] ss:$0 sm:$0xff]  ;;  %v5555_v45 = vld [vmem:[%s6236_s1 + $0xf0] sm:$0xff] }
 0x1a4   :  { %v1785_v50 = vadd.f32 %v4607_v0, %v1669_v4  ;;  %v3278_v9 = vpop.eup %3277  ;;  %2774 = vst.msk [vmem:[%s6243_s8 + $0x18] sm:$0xff] %vm107_vm0, %v2710_v56  ;;  %3303 = vrcp.f32 %v2455_v31  ;;  %v2229_v21 = vmul.f32 %v3266_v61, %v6373_v23  ;;  %v2645_v57 = vmul.f32 %v3731_v51, %v3276_v18 }
 0x1a5   :  { %v3280_v14 = vpop.eup %3279  ;;  %v2742_v10 = vadd.f32 %v2678_v33, %v2230_v20  ;;  %v2488_v53 = vadd.f32 1.0, %v3278_v9  ;;  %3305 = vpow2.f32 %v2982_v6  ;;  %v3014_v25 = vmul.f32 -1.442695, %v1786_v28  ;;  %1629 = vadd.xlane.f32.xlu1 %v5249_v42  ;;  %1626 = vadd.xlane.f32.xlu0 %v5252_v54  ;;  %v3730_v42 = vld [vmem:[%s6236_s1 + $0x110] sm:$0xff] }
 0x1a6   :  { %v3282_v52 = vpop.eup %3281  ;;  %v2487_v27 = vadd.f32 1.0, %v3280_v14  ;;  %3307 = vpow2.f32 %v2981_v36  ;;  %v3013_v59 = vmul.f32 -1.442695, %v1785_v50  ;;  %v1122_v17 = vpop.xlane.xlu1 %1121  ;;  %v996_v6 = vmul.f32 %v5546_v46, %v5527_v38  ;;  %v6375_v36 = vld [vmem:[#allocation65_spill] sm:$0xff] }
 0x1a7   :  { %v1119_v2 = vpop.xlane.xlu0 %1118  ;;  %v3284_v8 = vpop.eup %3283  ;;  %2806 = vst.msk [vmem:[%s6243_s8 + $0x118] sm:$0xff] %vm107_vm0, %v2742_v10  ;;  %v2677_v54 = vmul.f32 %v3730_v42, %v3282_v52  ;;  %3309 = vrcp.f32 %v2488_v53  ;;  %v1296_v12 = vadd.f32 %v4601_v26, %v1122_v17  ;;  %v5559_v4 = vmul.f32 %v5516_v15, %v5423_v19 }
 0x1a8   :  { %v1295_v61 = vadd.f32 %v4601_v26, %v1119_v2  ;;  %v3286_v16 = vpop.eup %3285  ;;  %v2197_v20 = vmul.f32 %v3284_v8, %v6374_v63  ;;  %3311 = vrcp.f32 %v2487_v27  ;;  %v1549_v23 = vadd.f32 %v5494_v5, %v5485_v48  ;;  %v6376_v63 = vld [vmem:[#allocation13_spill] sm:$0xff] }
 0x1a9   :  { %v3288_v40 = vpop.eup %3287  ;;  %v2741_v56 = vadd.f32 %v2677_v54, %v2229_v21  ;;  %3313 = vpow2.f32 %v3014_v25  ;;  %v2920_v31 = vmul.f32 -1.442695, %v1296_v12  ;;  %1725 = vadd.xlane.f32.xlu1 %v5262_v37  ;;  %1722 = vadd.xlane.f32.xlu0 %v6375_v36  ;;  %v5563_v37 = vsel %vm107_vm0, %v5475_v34, 0.0  ;;  %v5574_v25 = vld [vmem:[%s6236_s1 + $0x1f8] sm:$0xff] }
 0x1aa   :  { %v3290_v18 = vpop.eup %3289  ;;  %v2709_v58 = vadd.f32 %v2645_v57, %v2197_v20  ;;  %3315 = vpow2.f32 %v3013_v59  ;;  %v2919_v33 = vmul.f32 -1.442695, %v1295_v61  ;;  %v1218_v28 = vpop.xlane.xlu1 %1217  ;;  %v5584_v21 = vmul.f32 %v5546_v46, %v5555_v45 }
 0x1ab   :  { %v1215_v50 = vpop.xlane.xlu0 %1214  ;;  %v3292_v9 = vpop.eup %3291  ;;  %2805 = vst.msk [vmem:[%s6243_s8 + $0x110] sm:$0xff] %vm107_vm0, %v2741_v56  ;;  %v2010_v14 = vadd.f32 1.0, %v3290_v18  ;;  %3317 = vpow2.f32 %v2920_v31  ;;  %v1328_v10 = vadd.f32 %v4601_v26, %v1218_v28  ;;  %v5590_v2 = vmul.f32 %v5516_v15, %v5430_v24 }
 0x1ac   :  { %v1327_v53 = vadd.f32 %v4601_v26, %v1215_v50  ;;  %v3294_v52 = vpop.eup %3293  ;;  %2773 = vst.msk [vmem:[%s6243_s8 + $0x10] sm:$0xff] %vm107_vm0, %v2709_v58  ;;  %v2009_v34 = vadd.f32 1.0, %v3292_v9  ;;  %3319 = vpow2.f32 %v2919_v33  ;;  %v5594_v5 = vsel %vm107_vm0, %v5511_v3, 0.0  ;;  %v6377_v58 = vld [vmem:[#allocation14_spill] sm:$0xff] }
 0x1ad   :  { %v3296_v27 = vpop.eup %3295  ;;  %3321 = vrcp.f32 %v2010_v14  ;;  %v2952_v59 = vmul.f32 -1.442695, %v1328_v10  ;;  %1175 = vadd.xlane.f32.xlu1 %v5271_v55  ;;  %1172 = vadd.xlane.f32.xlu0 %v5281_v39  ;;  %v5597_v54 = vadd.f32 %v996_v6, %v5520_v30  ;;  %v5601_v55 = vmul.f32 %v5546_v46, %v5574_v25  ;;  %v3733_v6 = vld [vmem:[%s6236_s1 + $0x28] sm:$0xff] }
 0x1ae   :  { %v2951_v17 = vmul.f32 -1.442695, %v1327_v53  ;;  %v3298_v8 = vpop.eup %3297  ;;  %3323 = vrcp.f32 %v2009_v34  ;;  %v1582_v42 = vpop.xlane.xlu1 %1581  ;;  %v2200_v20 = vmul.f32 %v3286_v16, %v6376_v63  ;;  %v5608_v3 = vmul.f32 %v5516_v15, %v5445_v44  ;;  %v3734_v15 = vld [vmem:[%s6236_s1 + $0x20] sm:$0xff] }
 0x1af   :  { %v1579_v48 = vpop.xlane.xlu0 %1578  ;;  %v3300_v39 = vpop.eup %3299  ;;  %v2042_v12 = vadd.f32 1.0, %v3298_v8  ;;  %3325 = vpow2.f32 %v2952_v59  ;;  %v1756_v61 = vadd.f32 %v4607_v0, %v1582_v42  ;;  %v2199_v33 = vmul.f32 %v3288_v40, %v6377_v58  ;;  %v6378_v42 = vld [vmem:[#allocation15_spill] sm:$0xff] }
 0x1b0   :  { %v1755_v51 = vadd.f32 %v4607_v0, %v1579_v48  ;;  %v3302_v57 = vpop.eup %3301  ;;  %v2041_v56 = vadd.f32 1.0, %v3300_v39  ;;  %3327 = vpow2.f32 %v2951_v17  ;;  %v5620_v14 = vsel %vm107_vm0, %v1549_v23, 0.0  ;;  %v3735_v23 = vld [vmem:[%s6236_s1 + $0x128] sm:$0xff] }
 0x1b1   :  { %v3304_v30 = vpop.eup %3303  ;;  %v2648_v31 = vmul.f32 %v3733_v6, %v3302_v57  ;;  %3329 = vrcp.f32 %v2042_v12  ;;  %v2984_v36 = vmul.f32 -1.442695, %v1756_v61  ;;  %1271 = vadd.xlane.f32.xlu1 %v5284_v22  ;;  %1268 = vadd.xlane.f32.xlu0 %v5305_v62  ;;  %v2232_v48 = vmul.f32 %v3294_v52, %v6378_v42  ;;  %v3736_v52 = vld [vmem:[%s6236_s1 + $0x120] sm:$0xff] }
 0x1b2   :  { %v2983_v18 = vmul.f32 -1.442695, %v1755_v51  ;;  %v3306_v16 = vpop.eup %3305  ;;  %v2647_v28 = vmul.f32 %v3734_v15, %v3304_v30  ;;  %3331 = vrcp.f32 %v2041_v56  ;;  %v1678_v50 = vpop.xlane.xlu1 %1677  ;;  %v6379_v51 = vld [vmem:[#allocation16_spill] sm:$0xff] }
 0x1b3   :  { %v1675_v9 = vpop.xlane.xlu0 %1674  ;;  %v3308_v10 = vpop.eup %3307  ;;  %v2712_v53 = vadd.f32 %v2648_v31, %v2200_v20  ;;  %v2458_v34 = vadd.f32 1.0, %v3306_v16  ;;  %3333 = vpow2.f32 %v2984_v36  ;;  %v1788_v22 = vadd.f32 %v4607_v0, %v1678_v50  ;;  %v5646_v31 = vld [vmem:[%s6236_s1 + $0x1f0] sm:$0xff] }
 0x1b4   :  { %v3310_v62 = vpop.eup %3309  ;;  %v2711_v59 = vadd.f32 %v2647_v28, %v2199_v33  ;;  %v2457_v40 = vadd.f32 1.0, %v3308_v10  ;;  %3335 = vpow2.f32 %v2983_v18  ;;  %v1787_v17 = vadd.f32 %v4607_v0, %v1675_v9 }
 0x1b5   :  { %v3312_v8 = vpop.eup %3311  ;;  %2776 = vst.msk [vmem:[%s6243_s8 + $0x28] sm:$0xff] %vm107_vm0, %v2712_v53  ;;  %v2680_v39 = vmul.f32 %v3735_v23, %v3310_v62  ;;  %3337 = vrcp.f32 %v2458_v34  ;;  %v3016_v12 = vmul.f32 -1.442695, %v1788_v22  ;;  %1635 = vadd.xlane.f32.xlu1 %v5330_v60  ;;  %1632 = vadd.xlane.f32.xlu0 %v5340_v32  ;;  %v2231_v57 = vmul.f32 %v3296_v27, %v6379_v51 }
 0x1b6   :  { %v3314_v61 = vpop.eup %3313  ;;  %2775 = vst.msk [vmem:[%s6243_s8 + $0x20] sm:$0xff] %vm107_vm0, %v2711_v59  ;;  %v2679_v63 = vmul.f32 %v3736_v52, %v3312_v8  ;;  %3339 = vrcp.f32 %v2457_v40  ;;  %v3015_v20 = vmul.f32 -1.442695, %v1787_v17  ;;  %v1128_v56 = vpop.xlane.xlu1 %1127  ;;  %v1059_v50 = vadd.f32 %v5584_v21, %v5559_v4  ;;  %v5668_v21 = vld [vmem:[%s6240_s5 + $0x1] ss:$0 sm:$0xff] }
 0x1b7   :  { %v1125_v30 = vpop.xlane.xlu0 %1124  ;;  %v3316_v60 = vpop.eup %3315  ;;  %v2744_v6 = vadd.f32 %v2680_v39, %v2232_v48  ;;  %v2490_v32 = vadd.f32 1.0, %v3314_v61  ;;  %3341 = vpow2.f32 %v3016_v12  ;;  %v1298_v27 = vadd.f32 %v4601_v26, %v1128_v56  ;;  %v5683_v8 = vld [vmem:[%s6241_s6 + $0x1] ss:$0 sm:$0xff] }
 0x1b8   :  { %v3318_v36 = vpop.eup %3317  ;;  %v2743_v18 = vadd.f32 %v2679_v63, %v2231_v57  ;;  %v2489_v16 = vadd.f32 1.0, %v3316_v60  ;;  %3343 = vpow2.f32 %v3015_v20  ;;  %v1297_v58 = vadd.f32 %v4601_v26, %v1125_v30 }
 0x1b9   :  { %v3320_v33 = vpop.eup %3319  ;;  %2808 = vst.msk [vmem:[%s6243_s8 + $0x128] sm:$0xff] %vm107_vm0, %v2744_v6  ;;  %3345 = vrcp.f32 %v2490_v32  ;;  %v2012_v15 = vadd.f32 1.0, %v3318_v36  ;;  %v2922_v28 = vmul.f32 -1.442695, %v1298_v27  ;;  %1731 = vadd.xlane.f32.xlu1 %v5359_v41  ;;  %1728 = vadd.xlane.f32.xlu0 %v5370_v7  ;;  %v1027_v62 = vmul.f32 %v5546_v46, %v5646_v31 }
 0x1ba   :  { %v3322_v9 = vpop.eup %3321  ;;  %2807 = vst.msk [vmem:[%s6243_s8 + $0x120] sm:$0xff] %vm107_vm0, %v2743_v18  ;;  %3347 = vrcp.f32 %v2489_v16  ;;  %v2011_v10 = vadd.f32 1.0, %v3320_v33  ;;  %v2921_v53 = vmul.f32 -1.442695, %v1297_v58  ;;  %v1224_v34 = vpop.xlane.xlu1 %1223  ;;  %v1387_v59 = vmul.f32 %v5668_v21, %v5381_v35  ;;  %v6381_v18 = vld [vmem:[#allocation54_spill] sm:$0xff]  ;;  %v6382_v58 = vld [vmem:[#allocation17_spill] sm:$0xff] }
 0x1bb   :  { %v1221_v22 = vpop.xlane.xlu0 %1220  ;;  %v3324_v41 = vpop.eup %3323  ;;  %3349 = vrcp.f32 %v2012_v15  ;;  %v1330_v7 = vadd.f32 %v4601_v26, %v1224_v34  ;;  %v5674_v17 = vsel %vm107_vm0, %v5597_v54, 0.0  ;;  %v5678_v46 = vadd.f32 %v5601_v55, %v5590_v2  ;;  %v6380_v54 = vld [vmem:[#allocation52_spill] sm:$0xff] }
 0x1bc   :  { %v1329_v4 = vadd.f32 %v4601_v26, %v1221_v22  ;;  %v3326_v40 = vpop.eup %3325  ;;  %3351 = vrcp.f32 %v2011_v10  ;;  %v1456_v42 = vmul.f32 %v5683_v8, %v5527_v38  ;;  %v5691_v2 = vmul.f32 %v5668_v21, %v5423_v19 }
 0x1bd   :  { %v3328_v48 = vpop.eup %3327  ;;  %v2044_v23 = vadd.f32 1.0, %v3326_v40  ;;  %3353 = vpow2.f32 %v2922_v28  ;;  %v2954_v39 = vmul.f32 -1.442695, %v1330_v7  ;;  %1181 = vadd.xlane.f32.xlu1 %v5378_v29  ;;  %1178 = vadd.xlane.f32.xlu0 %v6380_v54  ;;  %v5694_v38 = vsel %vm107_vm0, %v1059_v50, 0.0 }
 0x1be   :  { %v3330_v55 = vpop.eup %3329  ;;  %v2043_v12 = vadd.f32 1.0, %v3328_v48  ;;  %3355 = vpow2.f32 %v2921_v53  ;;  %v2953_v61 = vmul.f32 -1.442695, %v1329_v4  ;;  %v1588_v51 = vpop.xlane.xlu1 %1587  ;;  %v5699_v20 = vadd.f32 %v1027_v62, %v5608_v3  ;;  %v3739_v53 = vld [vmem:[%s6236_s1 + $0x38] sm:$0xff]  ;;  %v6383_v62 = vld [vmem:[#allocation18_spill] sm:$0xff] }
 0x1bf   :  { %v1585_v57 = vpop.xlane.xlu0 %1584  ;;  %v3332_v52 = vpop.eup %3331  ;;  %3357 = vrcp.f32 %v2044_v23  ;;  %v1758_v63 = vadd.f32 %v4607_v0, %v1588_v51  ;;  %v5701_v30 = vadd.f32 %v1456_v42, %v1387_v59  ;;  %v1455_v60 = vmul.f32 %v5683_v8, %v5555_v45  ;;  %v3740_v59 = vld [vmem:[%s6236_s1 + $0x30] sm:$0xff] }
 0x1c0   :  { %v1757_v29 = vadd.f32 %v4607_v0, %v1585_v57  ;;  %v3334_v56 = vpop.eup %3333  ;;  %3359 = vrcp.f32 %v2043_v12  ;;  %v5707_v6 = vmul.f32 %v5668_v21, %v5430_v24  ;;  %v5713_v3 = vmul.f32 %v5683_v8, %v5574_v25 }
 0x1c1   :  { %v3336_v32 = vpop.eup %3335  ;;  %v2460_v27 = vadd.f32 1.0, %v3334_v56  ;;  %3361 = vpow2.f32 %v2954_v39  ;;  %v2986_v36 = vmul.f32 -1.442695, %v1758_v63  ;;  %1277 = vadd.xlane.f32.xlu1 %v6381_v18  ;;  %1274 = vadd.xlane.f32.xlu0 %v5460_v47  ;;  %v2202_v33 = vmul.f32 %v3322_v9, %v6382_v58  ;;  %v6384_v9 = vld [vmem:[#allocation19_spill] sm:$0xff]  ;;  %v3741_v63 = vld [vmem:[%s6236_s1 + $0x138] sm:$0xff] }
 0x1c2   :  { %v3338_v16 = vpop.eup %3337  ;;  %v2459_v45 = vadd.f32 1.0, %v3336_v32  ;;  %3363 = vpow2.f32 %v2953_v61  ;;  %v2985_v15 = vmul.f32 -1.442695, %v1757_v29  ;;  %v1684_v28 = vpop.xlane.xlu1 %1683  ;;  %v2201_v7 = vmul.f32 %v3324_v41, %v6383_v62  ;;  %v6385_v32 = vld [vmem:[#allocation20_spill] sm:$0xff] }
 0x1c3   :  { %v1681_v50 = vpop.xlane.xlu0 %1680  ;;  %v3340_v10 = vpop.eup %3339  ;;  %v2650_v34 = vmul.f32 %v3739_v53, %v3338_v16  ;;  %3365 = vrcp.f32 %v2460_v27  ;;  %v1790_v47 = vadd.f32 %v4607_v0, %v1684_v28  ;;  %v2234_v4 = vmul.f32 %v3330_v55, %v6384_v9 }
 0x1c4   :  { %v1789_v25 = vadd.f32 %v4607_v0, %v1681_v50  ;;  %v3342_v22 = vpop.eup %3341  ;;  %v2649_v40 = vmul.f32 %v3740_v59, %v3340_v10  ;;  %3367 = vrcp.f32 %v2459_v45  ;;  %v2233_v27 = vmul.f32 %v3332_v52, %v6385_v32 }
 0x1c5   :  { %v3344_v42 = vpop.eup %3343  ;;  %v2714_v48 = vadd.f32 %v2650_v34, %v2202_v33  ;;  %v2492_v23 = vadd.f32 1.0, %v3342_v22  ;;  %3369 = vpow2.f32 %v2986_v36  ;;  %v3018_v39 = vmul.f32 -1.442695, %v1790_v47  ;;  %1641 = vadd.xlane.f32.xlu1 %v5509_v1  ;;  %1638 = vadd.xlane.f32.xlu0 %v5563_v37  ;;  %v3742_v36 = vld [vmem:[%s6236_s1 + $0x130] sm:$0xff] }
 0x1c6   :  { %v3346_v54 = vpop.eup %3345  ;;  %v2713_v12 = vadd.f32 %v2649_v40, %v2201_v7  ;;  %v2491_v41 = vadd.f32 1.0, %v3344_v42  ;;  %3371 = vpow2.f32 %v2985_v15  ;;  %v3017_v55 = vmul.f32 -1.442695, %v1789_v25  ;;  %v1134_v61 = vpop.xlane.xlu1 %1133 }
 0x1c7   :  { %v1131_v51 = vpop.xlane.xlu0 %1130  ;;  %v3348_v57 = vpop.eup %3347  ;;  %2778 = vst.msk [vmem:[%s6243_s8 + $0x38] sm:$0xff] %vm107_vm0, %v2714_v48  ;;  %v2682_v1 = vmul.f32 %v3741_v63, %v3346_v54  ;;  %3373 = vrcp.f32 %v2492_v23  ;;  %v1300_v37 = vadd.f32 %v4601_v26, %v1134_v61  ;;  %v1418_v16 = vmul.f32 %v5668_v21, %v5445_v44  ;;  %v6386_v23 = vld [vmem:[#allocation21_spill] sm:$0xff] }
 0x1c8   :  { %v1299_v29 = vadd.f32 %v4601_v26, %v1131_v51  ;;  %v3350_v56 = vpop.eup %3349  ;;  %2777 = vst.msk [vmem:[%s6243_s8 + $0x30] sm:$0xff] %vm107_vm0, %v2713_v12  ;;  %v2681_v18 = vmul.f32 %v3742_v36, %v3348_v57  ;;  %3375 = vrcp.f32 %v2491_v41  ;;  %v1519_v52 = vadd.f32 %v1455_v60, %v5691_v2  ;;  %v6387_v57 = vld [vmem:[#allocation22_spill] sm:$0xff] }
 0x1c9   :  { %v3352_v58 = vpop.eup %3351  ;;  %v2746_v33 = vadd.f32 %v2682_v1, %v2234_v4  ;;  %3377 = vpow2.f32 %v3018_v39  ;;  %v2924_v45 = vmul.f32 -1.442695, %v1300_v37  ;;  %1737 = vadd.xlane.f32.xlu1 %v5594_v5  ;;  %1734 = vadd.xlane.f32.xlu0 %v5620_v14  ;;  %v1487_v34 = vmul.f32 %v5683_v8, %v5646_v31  ;;  %v3744_v1 = vld [vmem:[%s6236_s1 + $0x40] sm:$0xff] }
 0x1ca   :  { %v3354_v15 = vpop.eup %3353  ;;  %v2745_v28 = vadd.f32 %v2681_v18, %v2233_v27  ;;  %3379 = vpow2.f32 %v3017_v55  ;;  %v2923_v50 = vmul.f32 -1.442695, %v1299_v29  ;;  %v1230_v10 = vpop.xlane.xlu1 %1229  ;;  %v1282_v31 = vsel %vm107_vm0, %v5678_v46, 0.0 }
 0x1cb   :  { %v1227_v53 = vpop.xlane.xlu0 %1226  ;;  %v3356_v21 = vpop.eup %3355  ;;  %2810 = vst.msk [vmem:[%s6243_s8 + $0x138] sm:$0xff] %vm107_vm0, %v2746_v33  ;;  %v2014_v5 = vadd.f32 1.0, %v3354_v15  ;;  %3381 = vpow2.f32 %v2924_v45  ;;  %v1332_v14 = vadd.f32 %v4601_v26, %v1230_v10  ;;  %v1552_v8 = vadd.f32 %v5713_v3, %v5707_v6  ;;  %v3745_v10 = vld [vmem:[%s6236_s1 + $0x148] sm:$0xff] }
 0x1cc   :  { %v1331_v2 = vadd.f32 %v4601_v26, %v1227_v53  ;;  %v3358_v60 = vpop.eup %3357  ;;  %2809 = vst.msk [vmem:[%s6243_s8 + $0x130] sm:$0xff] %vm107_vm0, %v2745_v28  ;;  %v2013_v47 = vadd.f32 1.0, %v3356_v21  ;;  %3383 = vpow2.f32 %v2923_v50  ;;  %v1279_v7 = vsel %vm107_vm0, %v5699_v20, 0.0  ;;  %v6388_v28 = vld [vmem:[#allocation23_spill] sm:$0xff] }
 0x1cd   :  { %v3360_v25 = vpop.eup %3359  ;;  %3385 = vrcp.f32 %v2014_v5  ;;  %v2956_v22 = vmul.f32 -1.442695, %v1332_v14  ;;  %1187 = vadd.xlane.f32.xlu1 %v5674_v17  ;;  %1184 = vadd.xlane.f32.xlu0 %v5694_v38  ;;  %v1646_v46 = vsel %vm107_vm0, %v5701_v30, 0.0  ;;  %v1643_v6 = vsel %vm107_vm0, %v1519_v52, 0.0  ;;  %v3743_v30 = vld [vmem:[%s6236_s1 + $0x48] sm:$0xff]  ;;  %v6389_v5 = vld [vmem:[#allocation24_spill] sm:$0xff] }
 0x1ce   :  { %v2955_v62 = vmul.f32 -1.442695, %v1331_v2  ;;  %v3362_v9 = vpop.eup %3361  ;;  %3387 = vrcp.f32 %v2013_v47  ;;  %v1594_v4 = vpop.xlane.xlu1 %1593  ;;  %v1551_v3 = vadd.f32 %v1487_v34, %v1418_v16  ;;  %v2204_v20 = vmul.f32 %v3350_v56, %v6386_v23  ;;  %v3746_v2 = vld [vmem:[%s6236_s1 + $0x140] sm:$0xff] }
 0x1cf   :  { %v1591_v59 = vpop.xlane.xlu0 %1590  ;;  %v3364_v40 = vpop.eup %3363  ;;  %v2046_v42 = vadd.f32 1.0, %v3362_v9  ;;  %3389 = vpow2.f32 %v2956_v22  ;;  %v1760_v17 = vadd.f32 %v4607_v0, %v1594_v4  ;;  %v1742_v54 = vsel %vm107_vm0, %v1552_v8, 0.0 }
 0x1d0   :  { %v1759_v38 = vadd.f32 %v4607_v0, %v1591_v59  ;;  %v3366_v48 = vpop.eup %3365  ;;  %v2045_v39 = vadd.f32 1.0, %v3364_v40  ;;  %3391 = vpow2.f32 %v2955_v62  ;;  %v2203_v63 = vmul.f32 %v3352_v58, %v6387_v57 }
 0x1d1   :  { %v3368_v12 = vpop.eup %3367  ;;  %v2652_v41 = vmul.f32 %v3743_v30, %v3366_v48  ;;  %3393 = vrcp.f32 %v2046_v42  ;;  %v2988_v55 = vmul.f32 -1.442695, %v1760_v17  ;;  %1283 = vadd.xlane.f32.xlu1 %v1282_v31  ;;  %1280 = vadd.xlane.f32.xlu0 %v1279_v7  ;;  %v1739_v32 = vsel %vm107_vm0, %v1551_v3, 0.0 }
 0x1d2   :  { %v2987_v61 = vmul.f32 -1.442695, %v1759_v38  ;;  %v3370_v51 = vpop.eup %3369  ;;  %v2651_v37 = vmul.f32 %v3744_v1, %v3368_v12  ;;  %3395 = vrcp.f32 %v2045_v39  ;;  %v1690_v29 = vpop.xlane.xlu1 %1689  ;;  %v2236_v50 = vmul.f32 %v3358_v60, %v6388_v28 }
 0x1d3   :  { %v1687_v56 = vpop.xlane.xlu0 %1686  ;;  %v3372_v27 = vpop.eup %3371  ;;  %v2716_v36 = vadd.f32 %v2652_v41, %v2204_v20  ;;  %v2462_v18 = vadd.f32 1.0, %v3370_v51  ;;  %3397 = vpow2.f32 %v2988_v55  ;;  %v1792_v16 = vadd.f32 %v4607_v0, %v1690_v29 }
 0x1d4   :  { %v3374_v33 = vpop.eup %3373  ;;  %v2715_v45 = vadd.f32 %v2651_v37, %v2203_v63  ;;  %v2461_v52 = vadd.f32 1.0, %v3372_v27  ;;  %3399 = vpow2.f32 %v2987_v61  ;;  %v1791_v58 = vadd.f32 %v4607_v0, %v1687_v56 }
 0x1d5   :  { %v3376_v15 = vpop.eup %3375  ;;  %2780 = vst.msk [vmem:[%s6243_s8 + $0x48] sm:$0xff] %vm107_vm0, %v2716_v36  ;;  %v2684_v53 = vmul.f32 %v3745_v10, %v3374_v33  ;;  %3401 = vrcp.f32 %v2462_v18  ;;  %v3020_v34 = vmul.f32 -1.442695, %v1792_v16  ;;  %1647 = vadd.xlane.f32.xlu1 %v1646_v46  ;;  %1644 = vadd.xlane.f32.xlu0 %v1643_v6  ;;  %v2235_v14 = vmul.f32 %v3360_v25, %v6389_v5  ;;  %v6390_v33 = vld [vmem:[#allocation25_spill] sm:$0xff]  ;;  %v3747_v10 = vld [vmem:[%s6236_s1 + $0x58] sm:$0xff] }
 0x1d6   :  { %v3378_v21 = vpop.eup %3377  ;;  %2779 = vst.msk [vmem:[%s6243_s8 + $0x40] sm:$0xff] %vm107_vm0, %v2715_v45  ;;  %v2683_v60 = vmul.f32 %v3746_v2, %v3376_v15  ;;  %3403 = vrcp.f32 %v2461_v52  ;;  %v3019_v47 = vmul.f32 -1.442695, %v1791_v58  ;;  %v1140_v31 = vpop.xlane.xlu1 %1139 }
 0x1d7   :  { %v1137_v8 = vpop.xlane.xlu0 %1136  ;;  %v3380_v22 = vpop.eup %3379  ;;  %v2748_v62 = vadd.f32 %v2684_v53, %v2236_v50  ;;  %v2494_v7 = vadd.f32 1.0, %v3378_v21  ;;  %3405 = vpow2.f32 %v3020_v34  ;;  %v1302_v25 = vadd.f32 %v4601_v26, %v1140_v31  ;;  %v3748_v31 = vld [vmem:[%s6236_s1 + $0x50] sm:$0xff] }
 0x1d8   :  { %v3382_v9 = vpop.eup %3381  ;;  %v2747_v4 = vadd.f32 %v2683_v60, %v2235_v14  ;;  %v2493_v59 = vadd.f32 1.0, %v3380_v22  ;;  %3407 = vpow2.f32 %v3019_v47  ;;  %v1301_v46 = vadd.f32 %v4601_v26, %v1137_v8  ;;  %v6391_v14 = vld [vmem:[#allocation26_spill] sm:$0xff]  ;;  %v6392_v60 = vld [vmem:[#allocation27_spill] sm:$0xff] }
 0x1d9   :  { %v3384_v6 = vpop.eup %3383  ;;  %2812 = vst.msk [vmem:[%s6243_s8 + $0x148] sm:$0xff] %vm107_vm0, %v2748_v62  ;;  %3409 = vrcp.f32 %v2494_v7  ;;  %v2016_v3 = vadd.f32 1.0, %v3382_v9  ;;  %v2926_v40 = vmul.f32 -1.442695, %v1302_v25  ;;  %1743 = vadd.xlane.f32.xlu1 %v1742_v54  ;;  %1740 = vadd.xlane.f32.xlu0 %v1739_v32 }
 0x1da   :  { %v3386_v42 = vpop.eup %3385  ;;  %2811 = vst.msk [vmem:[%s6243_s8 + $0x140] sm:$0xff] %vm107_vm0, %v2747_v4  ;;  %3411 = vrcp.f32 %v2493_v59  ;;  %v2015_v17 = vadd.f32 1.0, %v3384_v6  ;;  %v2925_v38 = vmul.f32 -1.442695, %v1301_v46  ;;  %v1236_v48 = vpop.xlane.xlu1 %1235 }
 0x1db   :  { %v1233_v23 = vpop.xlane.xlu0 %1232  ;;  %v3388_v20 = vpop.eup %3387  ;;  %3413 = vrcp.f32 %v2016_v3  ;;  %v1334_v39 = vadd.f32 %v4601_v26, %v1236_v48  ;;  %v2206_v45 = vmul.f32 %v3386_v42, %v6390_v33  ;;  %v3749_v42 = vld [vmem:[%s6236_s1 + $0x158] sm:$0xff] }
 0x1dc   :  { %v1333_v12 = vadd.f32 %v4601_v26, %v1233_v23  ;;  %v3390_v30 = vpop.eup %3389  ;;  %3415 = vrcp.f32 %v2015_v17  ;;  %v2205_v2 = vmul.f32 %v3388_v20, %v6391_v14  ;;  %v6393_v20 = vld [vmem:[#allocation28_spill] sm:$0xff] }
 0x1dd   :  { %v3392_v54 = vpop.eup %3391  ;;  %v2048_v41 = vadd.f32 1.0, %v3390_v30  ;;  %3417 = vpow2.f32 %v2926_v40  ;;  %v2958_v55 = vmul.f32 -1.442695, %v1334_v39 }
 0x1de   :  { %v3394_v61 = vpop.eup %3393  ;;  %v2047_v51 = vadd.f32 1.0, %v3392_v54  ;;  %3419 = vpow2.f32 %v2925_v38  ;;  %v2957_v57 = vmul.f32 -1.442695, %v1333_v12  ;;  %v1600_v63 = vpop.xlane.xlu1 %1599  ;;  %v3750_v12 = vld [vmem:[%s6236_s1 + $0x150] sm:$0xff] }
 0x1df   :  { %v1597_v1 = vpop.xlane.xlu0 %1596  ;;  %v3396_v37 = vpop.eup %3395  ;;  %3421 = vrcp.f32 %v2048_v41  ;;  %v1762_v29 = vadd.f32 %v4607_v0, %v1600_v63  ;;  %v2238_v47 = vmul.f32 %v3394_v61, %v6392_v60 }
 0x1e0   :  { %v1761_v56 = vadd.f32 %v4607_v0, %v1597_v1  ;;  %v3398_v32 = vpop.eup %3397  ;;  %3423 = vrcp.f32 %v2047_v51  ;;  %v2237_v39 = vmul.f32 %v3396_v37, %v6393_v20 }
 0x1e1   :  { %v3400_v27 = vpop.eup %3399  ;;  %v2464_v36 = vadd.f32 1.0, %v3398_v32  ;;  %3425 = vpow2.f32 %v2958_v55  ;;  %v2990_v18 = vmul.f32 -1.442695, %v1762_v29 }
 0x1e2   :  { %v3402_v16 = vpop.eup %3401  ;;  %v2463_v52 = vadd.f32 1.0, %v3400_v27  ;;  %3427 = vpow2.f32 %v2957_v57  ;;  %v2989_v58 = vmul.f32 -1.442695, %v1761_v56  ;;  %v1696_v15 = vpop.xlane.xlu1 %1695 }
 0x1e3   :  { %v1693_v28 = vpop.xlane.xlu0 %1692  ;;  %v3404_v50 = vpop.eup %3403  ;;  %v2654_v53 = vmul.f32 %v3747_v10, %v3402_v16  ;;  %3429 = vrcp.f32 %v2464_v36  ;;  %v1794_v34 = vadd.f32 %v4607_v0, %v1696_v15 }
 0x1e4   :  { %v1793_v21 = vadd.f32 %v4607_v0, %v1693_v28  ;;  %v3406_v5 = vpop.eup %3405  ;;  %v2653_v8 = vmul.f32 %v3748_v31, %v3404_v50  ;;  %3431 = vrcp.f32 %v2463_v52 }
 0x1e5   :  { %v3408_v22 = vpop.eup %3407  ;;  %v2718_v62 = vadd.f32 %v2654_v53, %v2206_v45  ;;  %v2496_v7 = vadd.f32 1.0, %v3406_v5  ;;  %3433 = vpow2.f32 %v2990_v18  ;;  %v3022_v25 = vmul.f32 -1.442695, %v1794_v34  ;;  %v6394_v34 = vld [vmem:[#allocation29_spill] sm:$0xff] }
 0x1e6   :  { %v3410_v9 = vpop.eup %3409  ;;  %v2717_v4 = vadd.f32 %v2653_v8, %v2205_v2  ;;  %v2495_v59 = vadd.f32 1.0, %v3408_v22  ;;  %3435 = vpow2.f32 %v2989_v58  ;;  %v3021_v46 = vmul.f32 -1.442695, %v1793_v21  ;;  %v1146_v6 = vpop.xlane.xlu1 %1145  ;;  %v3751_v2 = vld [vmem:[%s6236_s1 + $0x68] sm:$0xff] }
 0x1e7   :  { %v1143_v3 = vpop.xlane.xlu0 %1142  ;;  %v3412_v40 = vpop.eup %3411  ;;  %2782 = vst.msk [vmem:[%s6243_s8 + $0x58] sm:$0xff] %vm107_vm0, %v2718_v62  ;;  %v2686_v17 = vmul.f32 %v3749_v42, %v3410_v9  ;;  %3437 = vrcp.f32 %v2496_v7  ;;  %v1304_v38 = vadd.f32 %v4601_v26, %v1146_v6  ;;  %v6395_v22 = vld [vmem:[#allocation30_spill] sm:$0xff]  ;;  %v3752_v7 = vld [vmem:[%s6236_s1 + $0x60] sm:$0xff] }
 0x1e8   :  { %v1303_v48 = vadd.f32 %v4601_v26, %v1143_v3  ;;  %v3414_v23 = vpop.eup %3413  ;;  %2781 = vst.msk [vmem:[%s6243_s8 + $0x50] sm:$0xff] %vm107_vm0, %v2717_v4  ;;  %v2685_v30 = vmul.f32 %v3750_v12, %v3412_v40  ;;  %3439 = vrcp.f32 %v2495_v59 }
 0x1e9   :  { %v3416_v54 = vpop.eup %3415  ;;  %v2750_v41 = vadd.f32 %v2686_v17, %v2238_v47  ;;  %3441 = vpow2.f32 %v3022_v25  ;;  %v2928_v55 = vmul.f32 -1.442695, %v1304_v38  ;;  %v2208_v21 = vmul.f32 %v3414_v23, %v6394_v34  ;;  %v6396_v23 = vld [vmem:[#allocation31_spill] sm:$0xff] }
 0x1ea   :  { %v3418_v61 = vpop.eup %3417  ;;  %v2749_v51 = vadd.f32 %v2685_v30, %v2237_v39  ;;  %3443 = vpow2.f32 %v3021_v46  ;;  %v2927_v57 = vmul.f32 -1.442695, %v1303_v48  ;;  %v1242_v63 = vpop.xlane.xlu1 %1241  ;;  %v2207_v62 = vmul.f32 %v3416_v54, %v6395_v22  ;;  %v3753_v39 = vld [vmem:[%s6236_s1 + $0x168] sm:$0xff] }
 0x1eb   :  { %v1239_v1 = vpop.xlane.xlu0 %1238  ;;  %v3420_v37 = vpop.eup %3419  ;;  %2814 = vst.msk [vmem:[%s6243_s8 + $0x158] sm:$0xff] %vm107_vm0, %v2750_v41  ;;  %v2018_v29 = vadd.f32 1.0, %v3418_v61  ;;  %3445 = vpow2.f32 %v2928_v55  ;;  %v1336_v56 = vadd.f32 %v4601_v26, %v1242_v63  ;;  %v6397_v41 = vld [vmem:[#allocation32_spill] sm:$0xff]  ;;  %v3754_v61 = vld [vmem:[%s6236_s1 + $0x160] sm:$0xff] }
 0x1ec   :  { %v1335_v32 = vadd.f32 %v4601_v26, %v1239_v1  ;;  %v3422_v27 = vpop.eup %3421  ;;  %2813 = vst.msk [vmem:[%s6243_s8 + $0x150] sm:$0xff] %vm107_vm0, %v2749_v51  ;;  %v2017_v36 = vadd.f32 1.0, %v3420_v37  ;;  %3447 = vpow2.f32 %v2927_v57 }
 0x1ed   :  { %v3424_v18 = vpop.eup %3423  ;;  %3449 = vrcp.f32 %v2018_v29  ;;  %v2960_v16 = vmul.f32 -1.442695, %v1336_v56  ;;  %v2240_v20 = vmul.f32 %v3422_v27, %v6396_v23 }
 0x1ee   :  { %v2959_v33 = vmul.f32 -1.442695, %v1335_v32  ;;  %v3426_v45 = vpop.eup %3425  ;;  %3451 = vrcp.f32 %v2017_v36  ;;  %v1606_v52 = vpop.xlane.xlu1 %1605  ;;  %v2239_v55 = vmul.f32 %v3424_v18, %v6397_v41 }
 0x1ef   :  { %v1603_v58 = vpop.xlane.xlu0 %1602  ;;  %v3428_v15 = vpop.eup %3427  ;;  %v2050_v28 = vadd.f32 1.0, %v3426_v45  ;;  %3453 = vpow2.f32 %v2960_v16  ;;  %v1764_v50 = vadd.f32 %v4607_v0, %v1606_v52 }
 0x1f0   :  { %v1763_v10 = vadd.f32 %v4607_v0, %v1603_v58  ;;  %v3430_v53 = vpop.eup %3429  ;;  %v2049_v5 = vadd.f32 1.0, %v3428_v15  ;;  %3455 = vpow2.f32 %v2959_v33 }
 0x1f1   :  { %v3432_v14 = vpop.eup %3431  ;;  %v2656_v60 = vmul.f32 %v3751_v2, %v3430_v53  ;;  %3457 = vrcp.f32 %v2050_v28  ;;  %v2992_v47 = vmul.f32 -1.442695, %v1764_v50 }
 0x1f2   :  { %v2991_v31 = vmul.f32 -1.442695, %v1763_v10  ;;  %v3434_v8 = vpop.eup %3433  ;;  %v2655_v25 = vmul.f32 %v3752_v7, %v3432_v14  ;;  %3459 = vrcp.f32 %v2049_v5  ;;  %v1702_v9 = vpop.xlane.xlu1 %1701 }
 0x1f3   :  { %v1699_v4 = vpop.xlane.xlu0 %1698  ;;  %v3436_v59 = vpop.eup %3435  ;;  %v2720_v46 = vadd.f32 %v2656_v60, %v2208_v21  ;;  %v2466_v6 = vadd.f32 1.0, %v3434_v8  ;;  %3461 = vpow2.f32 %v2992_v47  ;;  %v1796_v3 = vadd.f32 %v4607_v0, %v1702_v9 }
 0x1f4   :  { %v3438_v40 = vpop.eup %3437  ;;  %v2719_v42 = vadd.f32 %v2655_v25, %v2207_v62  ;;  %v2465_v17 = vadd.f32 1.0, %v3436_v59  ;;  %3463 = vpow2.f32 %v2991_v31  ;;  %v1795_v38 = vadd.f32 %v4607_v0, %v1699_v4 }
 0x1f5   :  { %v3440_v48 = vpop.eup %3439  ;;  %2784 = vst.msk [vmem:[%s6243_s8 + $0x68] sm:$0xff] %vm107_vm0, %v2720_v46  ;;  %v2688_v12 = vmul.f32 %v3753_v39, %v3438_v40  ;;  %3465 = vrcp.f32 %v2466_v6  ;;  %v3024_v30 = vmul.f32 -1.442695, %v1796_v3  ;;  %v6398_v40 = vld [vmem:[#allocation33_spill] sm:$0xff]  ;;  %v3755_v39 = vld [vmem:[%s6236_s1 + $0x78] sm:$0xff] }
 0x1f6   :  { %v3442_v54 = vpop.eup %3441  ;;  %2783 = vst.msk [vmem:[%s6243_s8 + $0x60] sm:$0xff] %vm107_vm0, %v2719_v42  ;;  %v2687_v51 = vmul.f32 %v3754_v61, %v3440_v48  ;;  %3467 = vrcp.f32 %v2465_v17  ;;  %v3023_v57 = vmul.f32 -1.442695, %v1795_v38  ;;  %v1152_v63 = vpop.xlane.xlu1 %1151 }
 0x1f7   :  { %v1149_v1 = vpop.xlane.xlu0 %1148  ;;  %v3444_v37 = vpop.eup %3443  ;;  %v2752_v29 = vadd.f32 %v2688_v12, %v2240_v20  ;;  %v2498_v56 = vadd.f32 1.0, %v3442_v54  ;;  %3469 = vpow2.f32 %v3024_v30  ;;  %v1306_v32 = vadd.f32 %v4601_v26, %v1152_v63  ;;  %v3756_v63 = vld [vmem:[%s6236_s1 + $0x70] sm:$0xff] }
 0x1f8   :  { %v3446_v27 = vpop.eup %3445  ;;  %v2751_v36 = vadd.f32 %v2687_v51, %v2239_v55  ;;  %v2497_v18 = vadd.f32 1.0, %v3444_v37  ;;  %3471 = vpow2.f32 %v3023_v57  ;;  %v1305_v16 = vadd.f32 %v4601_v26, %v1149_v1  ;;  %v6399_v55 = vld [vmem:[#allocation34_spill] sm:$0xff]  ;;  %v6400_v51 = vld [vmem:[#allocation35_spill] sm:$0xff] }
 0x1f9   :  { %v3448_v33 = vpop.eup %3447  ;;  %2816 = vst.msk [vmem:[%s6243_s8 + $0x168] sm:$0xff] %vm107_vm0, %v2752_v29  ;;  %3473 = vrcp.f32 %v2498_v56  ;;  %v2020_v45 = vadd.f32 1.0, %v3446_v27  ;;  %v2930_v52 = vmul.f32 -1.442695, %v1306_v32 }
 0x1fa   :  { %v3450_v58 = vpop.eup %3449  ;;  %2815 = vst.msk [vmem:[%s6243_s8 + $0x160] sm:$0xff] %vm107_vm0, %v2751_v36  ;;  %3475 = vrcp.f32 %v2497_v18  ;;  %v2019_v15 = vadd.f32 1.0, %v3448_v33  ;;  %v2929_v28 = vmul.f32 -1.442695, %v1305_v16  ;;  %v1248_v50 = vpop.xlane.xlu1 %1247 }
 0x1fb   :  { %v1245_v10 = vpop.xlane.xlu0 %1244  ;;  %v3452_v53 = vpop.eup %3451  ;;  %3477 = vrcp.f32 %v2020_v45  ;;  %v1338_v34 = vadd.f32 %v4601_v26, %v1248_v50  ;;  %v2210_v42 = vmul.f32 %v3450_v58, %v6398_v40  ;;  %v3757_v58 = vld [vmem:[%s6236_s1 + $0x178] sm:$0xff] }
 0x1fc   :  { %v1337_v21 = vadd.f32 %v4601_v26, %v1245_v10  ;;  %v3454_v5 = vpop.eup %3453  ;;  %3479 = vrcp.f32 %v2019_v15  ;;  %v2209_v61 = vmul.f32 %v3452_v53, %v6399_v55  ;;  %v6401_v53 = vld [vmem:[#allocation36_spill] sm:$0xff] }
 0x1fd   :  { %v3456_v14 = vpop.eup %3455  ;;  %v2052_v2 = vadd.f32 1.0, %v3454_v5  ;;  %3481 = vpow2.f32 %v2930_v52  ;;  %v2962_v60 = vmul.f32 -1.442695, %v1338_v34 }
 0x1fe   :  { %v3458_v47 = vpop.eup %3457  ;;  %v2051_v31 = vadd.f32 1.0, %v3456_v14  ;;  %3483 = vpow2.f32 %v2929_v28  ;;  %v2961_v8 = vmul.f32 -1.442695, %v1337_v21  ;;  %v1612_v22 = vpop.xlane.xlu1 %1611  ;;  %v3758_v21 = vld [vmem:[%s6236_s1 + $0x170] sm:$0xff] }
 0x1ff   :  { %v1609_v62 = vpop.xlane.xlu0 %1608  ;;  %v3460_v7 = vpop.eup %3459  ;;  %3485 = vrcp.f32 %v2052_v2  ;;  %v1766_v25 = vadd.f32 %v4607_v0, %v1612_v22  ;;  %v2242_v57 = vmul.f32 %v3458_v47, %v6400_v51 }
 0x200   :  { %v1765_v9 = vadd.f32 %v4607_v0, %v1609_v62  ;;  %v3462_v4 = vpop.eup %3461  ;;  %3487 = vrcp.f32 %v2051_v31  ;;  %v2241_v34 = vmul.f32 %v3460_v7, %v6401_v53 }
 0x201   :  { %v3464_v59 = vpop.eup %3463  ;;  %v2468_v46 = vadd.f32 1.0, %v3462_v4  ;;  %3489 = vpow2.f32 %v2962_v60  ;;  %v2994_v6 = vmul.f32 -1.442695, %v1766_v25 }
 0x202   :  { %v3466_v3 = vpop.eup %3465  ;;  %v2467_v17 = vadd.f32 1.0, %v3464_v59  ;;  %3491 = vpow2.f32 %v2961_v8  ;;  %v2993_v38 = vmul.f32 -1.442695, %v1765_v9  ;;  %v1708_v48 = vpop.xlane.xlu1 %1707 }
 0x203   :  { %v1705_v23 = vpop.xlane.xlu0 %1704  ;;  %v3468_v20 = vpop.eup %3467  ;;  %v2658_v12 = vmul.f32 %v3755_v39, %v3466_v3  ;;  %3493 = vrcp.f32 %v2468_v46  ;;  %v1798_v30 = vadd.f32 %v4607_v0, %v1708_v48 }
 0x204   :  { %v1797_v54 = vadd.f32 %v4607_v0, %v1705_v23  ;;  %v3470_v41 = vpop.eup %3469  ;;  %v2657_v1 = vmul.f32 %v3756_v63, %v3468_v20  ;;  %3495 = vrcp.f32 %v2467_v17 }
 0x205   :  { %v3472_v37 = vpop.eup %3471  ;;  %v2722_v29 = vadd.f32 %v2658_v12, %v2210_v42  ;;  %v2500_v56 = vadd.f32 1.0, %v3470_v41  ;;  %3497 = vpow2.f32 %v2994_v6  ;;  %v3026_v32 = vmul.f32 -1.442695, %v1798_v30  ;;  %v6402_v30 = vld [vmem:[#allocation37_spill] sm:$0xff] }
 0x206   :  { %v3474_v27 = vpop.eup %3473  ;;  %v2721_v36 = vadd.f32 %v2657_v1, %v2209_v61  ;;  %v2499_v18 = vadd.f32 1.0, %v3472_v37  ;;  %3499 = vpow2.f32 %v2993_v38  ;;  %v3025_v16 = vmul.f32 -1.442695, %v1797_v54  ;;  %v1158_v33 = vpop.xlane.xlu1 %1157  ;;  %v3759_v61 = vld [vmem:[%s6236_s1 + $0x88] sm:$0xff] }
 0x207   :  { %v1155_v45 = vpop.xlane.xlu0 %1154  ;;  %v3476_v52 = vpop.eup %3475  ;;  %2786 = vst.msk [vmem:[%s6243_s8 + $0x78] sm:$0xff] %vm107_vm0, %v2722_v29  ;;  %v2690_v15 = vmul.f32 %v3757_v58, %v3474_v27  ;;  %3501 = vrcp.f32 %v2500_v56  ;;  %v1308_v28 = vadd.f32 %v4601_v26, %v1158_v33  ;;  %v6403_v37 = vld [vmem:[#allocation38_spill] sm:$0xff]  ;;  %v3760_v56 = vld [vmem:[%s6236_s1 + $0x80] sm:$0xff] }
 0x208   :  { %v1307_v50 = vadd.f32 %v4601_v26, %v1155_v45  ;;  %v3478_v10 = vpop.eup %3477  ;;  %2785 = vst.msk [vmem:[%s6243_s8 + $0x70] sm:$0xff] %vm107_vm0, %v2721_v36  ;;  %v2689_v5 = vmul.f32 %v3758_v21, %v3476_v52  ;;  %3503 = vrcp.f32 %v2499_v18 }
 0x209   :  { %v3480_v14 = vpop.eup %3479  ;;  %v2754_v2 = vadd.f32 %v2690_v15, %v2242_v57  ;;  %3505 = vpow2.f32 %v3026_v32  ;;  %v2932_v60 = vmul.f32 -1.442695, %v1308_v28  ;;  %v2212_v54 = vmul.f32 %v3478_v10, %v6402_v30  ;;  %v6404_v10 = vld [vmem:[#allocation39_spill] sm:$0xff] }
 0x20a   :  { %v3482_v47 = vpop.eup %3481  ;;  %v2753_v31 = vadd.f32 %v2689_v5, %v2241_v34  ;;  %3507 = vpow2.f32 %v3025_v16  ;;  %v2931_v8 = vmul.f32 -1.442695, %v1307_v50  ;;  %v1254_v22 = vpop.xlane.xlu1 %1253  ;;  %v2211_v29 = vmul.f32 %v3480_v14, %v6403_v37  ;;  %v3761_v34 = vld [vmem:[%s6236_s1 + $0x188] sm:$0xff] }
 0x20b   :  { %v1251_v62 = vpop.xlane.xlu0 %1250  ;;  %v3484_v7 = vpop.eup %3483  ;;  %2818 = vst.msk [vmem:[%s6243_s8 + $0x178] sm:$0xff] %vm107_vm0, %v2754_v2  ;;  %v2022_v25 = vadd.f32 1.0, %v3482_v47  ;;  %3509 = vpow2.f32 %v2932_v60  ;;  %v1340_v9 = vadd.f32 %v4601_v26, %v1254_v22  ;;  %v6405_v2 = vld [vmem:[#allocation40_spill] sm:$0xff]  ;;  %v3762_v47 = vld [vmem:[%s6236_s1 + $0x180] sm:$0xff] }
 0x20c   :  { %v1339_v4 = vadd.f32 %v4601_v26, %v1251_v62  ;;  %v3486_v59 = vpop.eup %3485  ;;  %2817 = vst.msk [vmem:[%s6243_s8 + $0x170] sm:$0xff] %vm107_vm0, %v2753_v31  ;;  %v2021_v46 = vadd.f32 1.0, %v3484_v7  ;;  %3511 = vpow2.f32 %v2931_v8 }
 0x20d   :  { %v3488_v6 = vpop.eup %3487  ;;  %3513 = vrcp.f32 %v2022_v25  ;;  %v2964_v3 = vmul.f32 -1.442695, %v1340_v9  ;;  %v2244_v53 = vmul.f32 %v3486_v59, %v6404_v10 }
 0x20e   :  { %v2963_v40 = vmul.f32 -1.442695, %v1339_v4  ;;  %v3490_v42 = vpop.eup %3489  ;;  %3515 = vrcp.f32 %v2021_v46  ;;  %v1618_v17 = vpop.xlane.xlu1 %1617  ;;  %v2243_v60 = vmul.f32 %v3488_v6, %v6405_v2 }
 0x20f   :  { %v1615_v38 = vpop.xlane.xlu0 %1614  ;;  %v3492_v48 = vpop.eup %3491  ;;  %v2054_v23 = vadd.f32 1.0, %v3490_v42  ;;  %3517 = vpow2.f32 %v2964_v3  ;;  %v1768_v20 = vadd.f32 %v4607_v0, %v1618_v17 }
 0x210   :  { %v1767_v39 = vadd.f32 %v4607_v0, %v1615_v38  ;;  %v3494_v12 = vpop.eup %3493  ;;  %v2053_v41 = vadd.f32 1.0, %v3492_v48  ;;  %3519 = vpow2.f32 %v2963_v40 }
 0x211   :  { %v3496_v55 = vpop.eup %3495  ;;  %v2660_v51 = vmul.f32 %v3759_v61, %v3494_v12  ;;  %3521 = vrcp.f32 %v2054_v23  ;;  %v2996_v57 = vmul.f32 -1.442695, %v1768_v20 }
 0x212   :  { %v2995_v63 = vmul.f32 -1.442695, %v1767_v39  ;;  %v3498_v1 = vpop.eup %3497  ;;  %v2659_v32 = vmul.f32 %v3760_v56, %v3496_v55  ;;  %3523 = vrcp.f32 %v2053_v41  ;;  %v1714_v27 = vpop.xlane.xlu1 %1713 }
 0x213   :  { %v1711_v36 = vpop.xlane.xlu0 %1710  ;;  %v3500_v18 = vpop.eup %3499  ;;  %v2724_v16 = vadd.f32 %v2660_v51, %v2212_v54  ;;  %v2470_v33 = vadd.f32 1.0, %v3498_v1  ;;  %3525 = vpow2.f32 %v2996_v57  ;;  %v1800_v45 = vadd.f32 %v4607_v0, %v1714_v27 }
 0x214   :  { %v3502_v52 = vpop.eup %3501  ;;  %v2723_v58 = vadd.f32 %v2659_v32, %v2211_v29  ;;  %v2469_v15 = vadd.f32 1.0, %v3500_v18  ;;  %3527 = vpow2.f32 %v2995_v63  ;;  %v1799_v28 = vadd.f32 %v4607_v0, %v1711_v36 }
 0x215   :  { %v3504_v50 = vpop.eup %3503  ;;  %2788 = vst.msk [vmem:[%s6243_s8 + $0x88] sm:$0xff] %vm107_vm0, %v2724_v16  ;;  %v2692_v21 = vmul.f32 %v3761_v34, %v3502_v52  ;;  %3529 = vrcp.f32 %v2470_v33  ;;  %v3028_v5 = vmul.f32 -1.442695, %v1800_v45  ;;  %v6406_v52 = vld [vmem:[#allocation41_spill] sm:$0xff]  ;;  %v3763_v34 = vld [vmem:[%s6236_s1 + $0x98] sm:$0xff] }
 0x216   :  { %v3506_v14 = vpop.eup %3505  ;;  %2787 = vst.msk [vmem:[%s6243_s8 + $0x80] sm:$0xff] %vm107_vm0, %v2723_v58  ;;  %v2691_v31 = vmul.f32 %v3762_v47, %v3504_v50  ;;  %3531 = vrcp.f32 %v2469_v15  ;;  %v3027_v8 = vmul.f32 -1.442695, %v1799_v28  ;;  %v1164_v22 = vpop.xlane.xlu1 %1163 }
 0x217   :  { %v1161_v62 = vpop.xlane.xlu0 %1160  ;;  %v3508_v7 = vpop.eup %3507  ;;  %v2756_v25 = vadd.f32 %v2692_v21, %v2244_v53  ;;  %v2502_v9 = vadd.f32 1.0, %v3506_v14  ;;  %3533 = vpow2.f32 %v3028_v5  ;;  %v1310_v4 = vadd.f32 %v4601_v26, %v1164_v22  ;;  %v3764_v22 = vld [vmem:[%s6236_s1 + $0x90] sm:$0xff] }
 0x218   :  { %v3510_v59 = vpop.eup %3509  ;;  %v2755_v46 = vadd.f32 %v2691_v31, %v2243_v60  ;;  %v2501_v6 = vadd.f32 1.0, %v3508_v7  ;;  %3535 = vpow2.f32 %v3027_v8  ;;  %v1309_v3 = vadd.f32 %v4601_v26, %v1161_v62  ;;  %v6407_v60 = vld [vmem:[#allocation42_spill] sm:$0xff]  ;;  %v6408_v31 = vld [vmem:[#allocation43_spill] sm:$0xff] }
 0x219   :  { %v3512_v40 = vpop.eup %3511  ;;  %2820 = vst.msk [vmem:[%s6243_s8 + $0x188] sm:$0xff] %vm107_vm0, %v2756_v25  ;;  %3537 = vrcp.f32 %v2502_v9  ;;  %v2024_v42 = vadd.f32 1.0, %v3510_v59  ;;  %v2934_v17 = vmul.f32 -1.442695, %v1310_v4 }
 0x21a   :  { %v3514_v38 = vpop.eup %3513  ;;  %2819 = vst.msk [vmem:[%s6243_s8 + $0x180] sm:$0xff] %vm107_vm0, %v2755_v46  ;;  %3539 = vrcp.f32 %v2501_v6  ;;  %v2023_v48 = vadd.f32 1.0, %v3512_v40  ;;  %v2933_v23 = vmul.f32 -1.442695, %v1309_v3  ;;  %v1260_v20 = vpop.xlane.xlu1 %1259 }
 0x21b   :  { %v1257_v39 = vpop.xlane.xlu0 %1256  ;;  %v3516_v12 = vpop.eup %3515  ;;  %3541 = vrcp.f32 %v2024_v42  ;;  %v1342_v30 = vadd.f32 %v4601_v26, %v1260_v20  ;;  %v2214_v58 = vmul.f32 %v3514_v38, %v6406_v52  ;;  %v3765_v38 = vld [vmem:[%s6236_s1 + $0x198] sm:$0xff] }
 0x21c   :  { %v1341_v54 = vadd.f32 %v4601_v26, %v1257_v39  ;;  %v3518_v41 = vpop.eup %3517  ;;  %3543 = vrcp.f32 %v2023_v48  ;;  %v2213_v47 = vmul.f32 %v3516_v12, %v6407_v60  ;;  %v6409_v12 = vld [vmem:[#allocation44_spill] sm:$0xff] }
 0x21d   :  { %v3520_v55 = vpop.eup %3519  ;;  %v2056_v61 = vadd.f32 1.0, %v3518_v41  ;;  %3545 = vpow2.f32 %v2934_v17  ;;  %v2966_v51 = vmul.f32 -1.442695, %v1342_v30 }
 0x21e   :  { %v3522_v57 = vpop.eup %3521  ;;  %v2055_v63 = vadd.f32 1.0, %v3520_v55  ;;  %3547 = vpow2.f32 %v2933_v23  ;;  %v2965_v1 = vmul.f32 -1.442695, %v1341_v54  ;;  %v1624_v37 = vpop.xlane.xlu1 %1623  ;;  %v3766_v54 = vld [vmem:[%s6236_s1 + $0x190] sm:$0xff] }
 0x21f   :  { %v1621_v29 = vpop.xlane.xlu0 %1620  ;;  %v3524_v56 = vpop.eup %3523  ;;  %3549 = vrcp.f32 %v2056_v61  ;;  %v1770_v32 = vadd.f32 %v4607_v0, %v1624_v37  ;;  %v2246_v8 = vmul.f32 %v3522_v57, %v6408_v31 }
 0x220   :  { %v1769_v27 = vadd.f32 %v4607_v0, %v1621_v29  ;;  %v3526_v36 = vpop.eup %3525  ;;  %3551 = vrcp.f32 %v2055_v63  ;;  %v2245_v30 = vmul.f32 %v3524_v56, %v6409_v12 }
 0x221   :  { %v3528_v18 = vpop.eup %3527  ;;  %v2472_v16 = vadd.f32 1.0, %v3526_v36  ;;  %3553 = vpow2.f32 %v2966_v51  ;;  %v2998_v33 = vmul.f32 -1.442695, %v1770_v32 }
 0x222   :  { %v3530_v45 = vpop.eup %3529  ;;  %v2471_v15 = vadd.f32 1.0, %v3528_v18  ;;  %3555 = vpow2.f32 %v2965_v1  ;;  %v2997_v28 = vmul.f32 -1.442695, %v1769_v27  ;;  %v1720_v50 = vpop.xlane.xlu1 %1719 }
 0x223   :  { %v1717_v10 = vpop.xlane.xlu0 %1716  ;;  %v3532_v53 = vpop.eup %3531  ;;  %v2662_v21 = vmul.f32 %v3763_v34, %v3530_v45  ;;  %3557 = vrcp.f32 %v2472_v16  ;;  %v1802_v5 = vadd.f32 %v4607_v0, %v1720_v50 }
 0x224   :  { %v1801_v14 = vadd.f32 %v4607_v0, %v1717_v10  ;;  %v3534_v2 = vpop.eup %3533  ;;  %v2661_v62 = vmul.f32 %v3764_v22, %v3532_v53  ;;  %3559 = vrcp.f32 %v2471_v15 }
 0x225   :  { %v3536_v7 = vpop.eup %3535  ;;  %v2726_v25 = vadd.f32 %v2662_v21, %v2214_v58  ;;  %v2504_v9 = vadd.f32 1.0, %v3534_v2  ;;  %3561 = vpow2.f32 %v2998_v33  ;;  %v3030_v4 = vmul.f32 -1.442695, %v1802_v5  ;;  %v6410_v5 = vld [vmem:[#allocation45_spill] sm:$0xff] }
 0x226   :  { %v3538_v59 = vpop.eup %3537  ;;  %v2725_v46 = vadd.f32 %v2661_v62, %v2213_v47  ;;  %v2503_v6 = vadd.f32 1.0, %v3536_v7  ;;  %3563 = vpow2.f32 %v2997_v28  ;;  %v3029_v3 = vmul.f32 -1.442695, %v1801_v14  ;;  %v1170_v40 = vpop.xlane.xlu1 %1169  ;;  %v3767_v47 = vld [vmem:[%s6236_s1 + $0xa8] sm:$0xff] }
 0x227   :  { %v1167_v42 = vpop.xlane.xlu0 %1166  ;;  %v3540_v17 = vpop.eup %3539  ;;  %2790 = vst.msk [vmem:[%s6243_s8 + $0x98] sm:$0xff] %vm107_vm0, %v2726_v25  ;;  %v2694_v48 = vmul.f32 %v3765_v38, %v3538_v59  ;;  %3565 = vrcp.f32 %v2504_v9  ;;  %v1312_v23 = vadd.f32 %v4601_v26, %v1170_v40  ;;  %v6411_v7 = vld [vmem:[#allocation46_spill] sm:$0xff]  ;;  %v3768_v9 = vld [vmem:[%s6236_s1 + $0xa0] sm:$0xff] }
 0x228   :  { %v1311_v20 = vadd.f32 %v4601_v26, %v1167_v42  ;;  %v3542_v39 = vpop.eup %3541  ;;  %2789 = vst.msk [vmem:[%s6243_s8 + $0x90] sm:$0xff] %vm107_vm0, %v2725_v46  ;;  %v2693_v41 = vmul.f32 %v3766_v54, %v3540_v17  ;;  %3567 = vrcp.f32 %v2503_v6 }
 0x229   :  { %v3544_v55 = vpop.eup %3543  ;;  %v2758_v61 = vadd.f32 %v2694_v48, %v2246_v8  ;;  %3569 = vpow2.f32 %v3030_v4  ;;  %v2936_v51 = vmul.f32 -1.442695, %v1312_v23  ;;  %v2216_v14 = vmul.f32 %v3542_v39, %v6410_v5  ;;  %v6412_v39 = vld [vmem:[#allocation47_spill] sm:$0xff] }
 0x22a   :  { %v3546_v57 = vpop.eup %3545  ;;  %v2757_v63 = vadd.f32 %v2693_v41, %v2245_v30  ;;  %3571 = vpow2.f32 %v3029_v3  ;;  %v2935_v1 = vmul.f32 -1.442695, %v1311_v20  ;;  %v1266_v37 = vpop.xlane.xlu1 %1265  ;;  %v2215_v25 = vmul.f32 %v3544_v55, %v6411_v7  ;;  %v3769_v30 = vld [vmem:[%s6236_s1 + $0x1a8] sm:$0xff] }
 0x22b   :  { %v1263_v29 = vpop.xlane.xlu0 %1262  ;;  %v3548_v56 = vpop.eup %3547  ;;  %2822 = vst.msk [vmem:[%s6243_s8 + $0x198] sm:$0xff] %vm107_vm0, %v2758_v61  ;;  %v2026_v32 = vadd.f32 1.0, %v3546_v57  ;;  %3573 = vpow2.f32 %v2936_v51  ;;  %v1344_v27 = vadd.f32 %v4601_v26, %v1266_v37  ;;  %v6413_v61 = vld [vmem:[#allocation48_spill] sm:$0xff]  ;;  %v3770_v57 = vld [vmem:[%s6236_s1 + $0x1a0] sm:$0xff] }
 0x22c   :  { %v1343_v36 = vadd.f32 %v4601_v26, %v1263_v29  ;;  %v3550_v18 = vpop.eup %3549  ;;  %2821 = vst.msk [vmem:[%s6243_s8 + $0x190] sm:$0xff] %vm107_vm0, %v2757_v63  ;;  %v2025_v16 = vadd.f32 1.0, %v3548_v56  ;;  %3575 = vpow2.f32 %v2935_v1 }
 0x22d   :  { %v3552_v33 = vpop.eup %3551  ;;  %3577 = vrcp.f32 %v2026_v32  ;;  %v2968_v45 = vmul.f32 -1.442695, %v1344_v27  ;;  %v2248_v12 = vmul.f32 %v3550_v18, %v6412_v39 }
 0x22e   :  { %v2967_v52 = vmul.f32 -1.442695, %v1343_v36  ;;  %v3554_v58 = vpop.eup %3553  ;;  %3579 = vrcp.f32 %v2025_v16  ;;  %v1630_v15 = vpop.xlane.xlu1 %1629  ;;  %v2247_v51 = vmul.f32 %v3552_v33, %v6413_v61 }
 0x22f   :  { %v1627_v28 = vpop.xlane.xlu0 %1626  ;;  %v3556_v50 = vpop.eup %3555  ;;  %v2058_v10 = vadd.f32 1.0, %v3554_v58  ;;  %3581 = vpow2.f32 %v2968_v45  ;;  %v1772_v53 = vadd.f32 %v4607_v0, %v1630_v15 }
 0x230   :  { %v1771_v34 = vadd.f32 %v4607_v0, %v1627_v28  ;;  %v3558_v21 = vpop.eup %3557  ;;  %v2057_v2 = vadd.f32 1.0, %v3556_v50  ;;  %3583 = vpow2.f32 %v2967_v52 }
 0x231   :  { %v3560_v60 = vpop.eup %3559  ;;  %v2664_v31 = vmul.f32 %v3767_v47, %v3558_v21  ;;  %3585 = vrcp.f32 %v2058_v10  ;;  %v3000_v8 = vmul.f32 -1.442695, %v1772_v53 }
 0x232   :  { %v2999_v22 = vmul.f32 -1.442695, %v1771_v34  ;;  %v3562_v62 = vpop.eup %3561  ;;  %v2663_v4 = vmul.f32 %v3768_v9, %v3560_v60  ;;  %3587 = vrcp.f32 %v2057_v2  ;;  %v1726_v59 = vpop.xlane.xlu1 %1725 }
 0x233   :  { %v1723_v46 = vpop.xlane.xlu0 %1722  ;;  %v3564_v6 = vpop.eup %3563  ;;  %v2728_v3 = vadd.f32 %v2664_v31, %v2216_v14  ;;  %v2474_v40 = vadd.f32 1.0, %v3562_v62  ;;  %3589 = vpow2.f32 %v3000_v8  ;;  %v1804_v42 = vadd.f32 %v4607_v0, %v1726_v59 }
 0x234   :  { %v3566_v17 = vpop.eup %3565  ;;  %v2727_v38 = vadd.f32 %v2663_v4, %v2215_v25  ;;  %v2473_v48 = vadd.f32 1.0, %v3564_v6  ;;  %3591 = vpow2.f32 %v2999_v22  ;;  %v1803_v23 = vadd.f32 %v4607_v0, %v1723_v46 }
 0x235   :  { %v3568_v20 = vpop.eup %3567  ;;  %2792 = vst.msk [vmem:[%s6243_s8 + $0xa8] sm:$0xff] %vm107_vm0, %v2728_v3  ;;  %v2696_v54 = vmul.f32 %v3769_v30, %v3566_v17  ;;  %3593 = vrcp.f32 %v2474_v40  ;;  %v3032_v41 = vmul.f32 -1.442695, %v1804_v42  ;;  %v6414_v17 = vld [vmem:[#allocation49_spill] sm:$0xff]  ;;  %v3771_v30 = vld [vmem:[%s6236_s1 + $0xb8] sm:$0xff] }
 0x236   :  { %v3570_v55 = vpop.eup %3569  ;;  %2791 = vst.msk [vmem:[%s6243_s8 + $0xa0] sm:$0xff] %vm107_vm0, %v2727_v38  ;;  %v2695_v63 = vmul.f32 %v3770_v57, %v3568_v20  ;;  %3595 = vrcp.f32 %v2473_v48  ;;  %v3031_v1 = vmul.f32 -1.442695, %v1803_v23  ;;  %v1176_v37 = vpop.xlane.xlu1 %1175 }
 0x237   :  { %v1173_v29 = vpop.xlane.xlu0 %1172  ;;  %v3572_v56 = vpop.eup %3571  ;;  %v2760_v32 = vadd.f32 %v2696_v54, %v2248_v12  ;;  %v2506_v27 = vadd.f32 1.0, %v3570_v55  ;;  %3597 = vpow2.f32 %v3032_v41  ;;  %v1314_v36 = vadd.f32 %v4601_v26, %v1176_v37  ;;  %v3772_v37 = vld [vmem:[%s6236_s1 + $0xb0] sm:$0xff] }
 0x238   :  { %v3574_v18 = vpop.eup %3573  ;;  %v2759_v16 = vadd.f32 %v2695_v63, %v2247_v51  ;;  %v2505_v33 = vadd.f32 1.0, %v3572_v56  ;;  %3599 = vpow2.f32 %v3031_v1  ;;  %v1313_v45 = vadd.f32 %v4601_v26, %v1173_v29  ;;  %v6415_v51 = vld [vmem:[#allocation50_spill] sm:$0xff]  ;;  %v6416_v63 = vld [vmem:[#allocation51_spill] sm:$0xff] }
 0x239   :  { %v3576_v52 = vpop.eup %3575  ;;  %2824 = vst.msk [vmem:[%s6243_s8 + $0x1a8] sm:$0xff] %vm107_vm0, %v2760_v32  ;;  %3601 = vrcp.f32 %v2506_v27  ;;  %v2028_v58 = vadd.f32 1.0, %v3574_v18  ;;  %v2938_v15 = vmul.f32 -1.442695, %v1314_v36 }
 0x23a   :  { %v3578_v28 = vpop.eup %3577  ;;  %2823 = vst.msk [vmem:[%s6243_s8 + $0x1a0] sm:$0xff] %vm107_vm0, %v2759_v16  ;;  %3603 = vrcp.f32 %v2505_v33  ;;  %v2027_v50 = vadd.f32 1.0, %v3576_v52  ;;  %v2937_v10 = vmul.f32 -1.442695, %v1313_v45  ;;  %v1272_v53 = vpop.xlane.xlu1 %1271 }
 0x23b   :  { %v1269_v34 = vpop.xlane.xlu0 %1268  ;;  %v3580_v21 = vpop.eup %3579  ;;  %3605 = vrcp.f32 %v2028_v58  ;;  %v1346_v5 = vadd.f32 %v4601_v26, %v1272_v53  ;;  %v2218_v38 = vmul.f32 %v3578_v28, %v6414_v17  ;;  %v3773_v28 = vld [vmem:[%s6236_s1 + $0x1b8] sm:$0xff] }
 0x23c   :  { %v1345_v14 = vadd.f32 %v4601_v26, %v1269_v34  ;;  %v3582_v2 = vpop.eup %3581  ;;  %3607 = vrcp.f32 %v2027_v50  ;;  %v2217_v57 = vmul.f32 %v3580_v21, %v6415_v51  ;;  %v6417_v21 = vld [vmem:[#allocation53_spill] sm:$0xff] }
 0x23d   :  { %v3584_v60 = vpop.eup %3583  ;;  %v2060_v47 = vadd.f32 1.0, %v3582_v2  ;;  %3609 = vpow2.f32 %v2938_v15  ;;  %v2970_v31 = vmul.f32 -1.442695, %v1346_v5 }
 0x23e   :  { %v3586_v8 = vpop.eup %3585  ;;  %v2059_v22 = vadd.f32 1.0, %v3584_v60  ;;  %3611 = vpow2.f32 %v2937_v10  ;;  %v2969_v62 = vmul.f32 -1.442695, %v1345_v14  ;;  %v1636_v7 = vpop.xlane.xlu1 %1635  ;;  %v3774_v14 = vld [vmem:[%s6236_s1 + $0x1b0] sm:$0xff] }
 0x23f   :  { %v1633_v25 = vpop.xlane.xlu0 %1632  ;;  %v3588_v9 = vpop.eup %3587  ;;  %3613 = vrcp.f32 %v2060_v47  ;;  %v1774_v4 = vadd.f32 %v4607_v0, %v1636_v7  ;;  %v2250_v1 = vmul.f32 %v3586_v8, %v6416_v63 }
 0x240   :  { %v1773_v59 = vadd.f32 %v4607_v0, %v1633_v25  ;;  %v3590_v46 = vpop.eup %3589  ;;  %3615 = vrcp.f32 %v2059_v22  ;;  %v2249_v5 = vmul.f32 %v3588_v9, %v6417_v21 }
 0x241   :  { %v3592_v6 = vpop.eup %3591  ;;  %v2476_v3 = vadd.f32 1.0, %v3590_v46  ;;  %3617 = vpow2.f32 %v2970_v31  ;;  %v3002_v40 = vmul.f32 -1.442695, %v1774_v4 }
 0x242   :  { %v3594_v42 = vpop.eup %3593  ;;  %v2475_v48 = vadd.f32 1.0, %v3592_v6  ;;  %3619 = vpow2.f32 %v2969_v62  ;;  %v3001_v23 = vmul.f32 -1.442695, %v1773_v59  ;;  %v1732_v20 = vpop.xlane.xlu1 %1731 }
 0x243   :  { %v1729_v39 = vpop.xlane.xlu0 %1728  ;;  %v3596_v12 = vpop.eup %3595  ;;  %v2666_v54 = vmul.f32 %v3771_v30, %v3594_v42  ;;  %3621 = vrcp.f32 %v2476_v3  ;;  %v1806_v41 = vadd.f32 %v4607_v0, %v1732_v20 }
 0x244   :  { %v1805_v55 = vadd.f32 %v4607_v0, %v1729_v39  ;;  %v3598_v61 = vpop.eup %3597  ;;  %v2665_v29 = vmul.f32 %v3772_v37, %v3596_v12  ;;  %3623 = vrcp.f32 %v2475_v48 }
 0x245   :  { %v3600_v56 = vpop.eup %3599  ;;  %v2730_v32 = vadd.f32 %v2666_v54, %v2218_v38  ;;  %v2508_v27 = vadd.f32 1.0, %v3598_v61  ;;  %3625 = vpow2.f32 %v3002_v40  ;;  %v3034_v36 = vmul.f32 -1.442695, %v1806_v41  ;;  %v6418_v41 = vld [vmem:[#allocation56_spill] sm:$0xff] }
 0x246   :  { %v3602_v18 = vpop.eup %3601  ;;  %v2729_v16 = vadd.f32 %v2665_v29, %v2217_v57  ;;  %v2507_v33 = vadd.f32 1.0, %v3600_v56  ;;  %3627 = vpow2.f32 %v3001_v23  ;;  %v3033_v45 = vmul.f32 -1.442695, %v1805_v55  ;;  %v1182_v52 = vpop.xlane.xlu1 %1181  ;;  %v3775_v57 = vld [vmem:[%s6236_s1 + $0xc8] sm:$0xff]  ;;  %v6419_v56 = vld [vmem:[#allocation57_spill] sm:$0xff] }
 0x247   :  { %v1179_v58 = vpop.xlane.xlu0 %1178  ;;  %v3604_v15 = vpop.eup %3603  ;;  %2794 = vst.msk [vmem:[%s6243_s8 + $0xb8] sm:$0xff] %vm107_vm0, %v2730_v32  ;;  %v2698_v50 = vmul.f32 %v3773_v28, %v3602_v18  ;;  %3629 = vrcp.f32 %v2508_v27  ;;  %v1316_v10 = vadd.f32 %v4601_v26, %v1182_v52  ;;  %v3776_v27 = vld [vmem:[%s6236_s1 + $0xc0] sm:$0xff] }
 0x248   :  { %v1315_v53 = vadd.f32 %v4601_v26, %v1179_v58  ;;  %v3606_v34 = vpop.eup %3605  ;;  %2793 = vst.msk [vmem:[%s6243_s8 + $0xb0] sm:$0xff] %vm107_vm0, %v2729_v16  ;;  %v2697_v2 = vmul.f32 %v3774_v14, %v3604_v15  ;;  %3631 = vrcp.f32 %v2507_v33 }
 0x249   :  { %v3608_v60 = vpop.eup %3607  ;;  %v2762_v47 = vadd.f32 %v2698_v50, %v2250_v1  ;;  %3633 = vpow2.f32 %v3034_v36  ;;  %v2940_v31 = vmul.f32 -1.442695, %v1316_v10  ;;  %v2220_v55 = vmul.f32 %v3606_v34, %v6418_v41  ;;  %v6420_v34 = vld [vmem:[#allocation58_spill] sm:$0xff] }
 0x24a   :  { %v3610_v8 = vpop.eup %3609  ;;  %v2761_v22 = vadd.f32 %v2697_v2, %v2249_v5  ;;  %3635 = vpow2.f32 %v3033_v45  ;;  %v2939_v62 = vmul.f32 -1.442695, %v1315_v53  ;;  %v1278_v7 = vpop.xlane.xlu1 %1277  ;;  %v2219_v32 = vmul.f32 %v3608_v60, %v6419_v56  ;;  %v3777_v5 = vld [vmem:[%s6236_s1 + $0x1c8] sm:$0xff] }
 0x24b   :  { %v1275_v25 = vpop.xlane.xlu0 %1274  ;;  %v3612_v9 = vpop.eup %3611  ;;  %2826 = vst.msk [vmem:[%s6243_s8 + $0x1b8] sm:$0xff] %vm107_vm0, %v2762_v47  ;;  %v2030_v4 = vadd.f32 1.0, %v3610_v8  ;;  %3637 = vpow2.f32 %v2940_v31  ;;  %v1348_v59 = vadd.f32 %v4601_v26, %v1278_v7  ;;  %v6421_v47 = vld [vmem:[#allocation60_spill] sm:$0xff]  ;;  %v3778_v8 = vld [vmem:[%s6236_s1 + $0x1c0] sm:$0xff] }
 0x24c   :  { %v1347_v46 = vadd.f32 %v4601_v26, %v1275_v25  ;;  %v3614_v6 = vpop.eup %3613  ;;  %2825 = vst.msk [vmem:[%s6243_s8 + $0x1b0] sm:$0xff] %vm107_vm0, %v2761_v22  ;;  %v2029_v3 = vadd.f32 1.0, %v3612_v9  ;;  %3639 = vpow2.f32 %v2939_v62 }
 0x24d   :  { %v3616_v40 = vpop.eup %3615  ;;  %3641 = vrcp.f32 %v2030_v4  ;;  %v2972_v42 = vmul.f32 -1.442695, %v1348_v59  ;;  %v2252_v21 = vmul.f32 %v3614_v6, %v6420_v34 }
 0x24e   :  { %v2971_v17 = vmul.f32 -1.442695, %v1347_v46  ;;  %v3618_v38 = vpop.eup %3617  ;;  %3643 = vrcp.f32 %v2029_v3  ;;  %v1642_v48 = vpop.xlane.xlu1 %1641  ;;  %v2251_v31 = vmul.f32 %v3616_v40, %v6421_v47  ;;  %v6423_v47 = vld [vmem:[#allocation62_spill] sm:$0xff] }
 0x24f   :  { %v1639_v23 = vpop.xlane.xlu0 %1638  ;;  %v3620_v20 = vpop.eup %3619  ;;  %v2062_v39 = vadd.f32 1.0, %v3618_v38  ;;  %3645 = vpow2.f32 %v2972_v42  ;;  %v1776_v12 = vadd.f32 %v4607_v0, %v1642_v48 }
 0x250   :  { %v1775_v30 = vadd.f32 %v4607_v0, %v1639_v23  ;;  %v3622_v54 = vpop.eup %3621  ;;  %v2061_v61 = vadd.f32 1.0, %v3620_v20  ;;  %3647 = vpow2.f32 %v2971_v17 }
 0x251   :  { %v3624_v51 = vpop.eup %3623  ;;  %v2668_v63 = vmul.f32 %v3775_v57, %v3622_v54  ;;  %3649 = vrcp.f32 %v2062_v39  ;;  %v3004_v1 = vmul.f32 -1.442695, %v1776_v12 }
 0x252   :  { %v3003_v37 = vmul.f32 -1.442695, %v1775_v30  ;;  %v3626_v29 = vpop.eup %3625  ;;  %v2667_v36 = vmul.f32 %v3776_v27, %v3624_v51  ;;  %3651 = vrcp.f32 %v2061_v61  ;;  %v1738_v18 = vpop.xlane.xlu1 %1737 }
 0x253   :  { %v1735_v16 = vpop.xlane.xlu0 %1734  ;;  %v3628_v33 = vpop.eup %3627  ;;  %v2732_v45 = vadd.f32 %v2668_v63, %v2220_v55  ;;  %v2478_v52 = vadd.f32 1.0, %v3626_v29  ;;  %3653 = vpow2.f32 %v3004_v1  ;;  %v1808_v58 = vadd.f32 %v4607_v0, %v1738_v18 }
 0x254   :  { %v3630_v15 = vpop.eup %3629  ;;  %v2731_v28 = vadd.f32 %v2667_v36, %v2219_v32  ;;  %v2477_v50 = vadd.f32 1.0, %v3628_v33  ;;  %3655 = vpow2.f32 %v3003_v37  ;;  %v1807_v10 = vadd.f32 %v4607_v0, %v1735_v16 }
 0x255   :  { %v3632_v53 = vpop.eup %3631  ;;  %2796 = vst.msk [vmem:[%s6243_s8 + $0xc8] sm:$0xff] %vm107_vm0, %v2732_v45  ;;  %v2700_v14 = vmul.f32 %v3777_v5, %v3630_v15  ;;  %3657 = vrcp.f32 %v2478_v52  ;;  %v3036_v2 = vmul.f32 -1.442695, %v1808_v58  ;;  %v6422_v58 = vld [vmem:[#allocation61_spill] sm:$0xff] }
 0x256   :  { %v3634_v60 = vpop.eup %3633  ;;  %2795 = vst.msk [vmem:[%s6243_s8 + $0xc0] sm:$0xff] %vm107_vm0, %v2731_v28  ;;  %v2699_v22 = vmul.f32 %v3778_v8, %v3632_v53  ;;  %3659 = vrcp.f32 %v2477_v50  ;;  %v3035_v62 = vmul.f32 -1.442695, %v1807_v10  ;;  %v1188_v7 = vpop.xlane.xlu1 %1187  ;;  %v3780_v8 = vld [vmem:[%s6236_s1 + $0xd0] sm:$0xff] }
 0x257   :  { %v1185_v25 = vpop.xlane.xlu0 %1184  ;;  %v3636_v9 = vpop.eup %3635  ;;  %v2764_v4 = vadd.f32 %v2700_v14, %v2252_v21  ;;  %v2510_v59 = vadd.f32 1.0, %v3634_v60  ;;  %3661 = vpow2.f32 %v3036_v2  ;;  %v1318_v46 = vadd.f32 %v4601_v26, %v1188_v7  ;;  %v3779_v21 = vld [vmem:[%s6236_s1 + $0xd8] sm:$0xff] }
 0x258   :  { %v3638_v6 = vpop.eup %3637  ;;  %v2763_v3 = vadd.f32 %v2699_v22, %v2251_v31  ;;  %v2509_v40 = vadd.f32 1.0, %v3636_v9  ;;  %3663 = vpow2.f32 %v3035_v62  ;;  %v1317_v42 = vadd.f32 %v4601_v26, %v1185_v25 }
 0x259   :  { %v3640_v17 = vpop.eup %3639  ;;  %2828 = vst.msk [vmem:[%s6243_s8 + $0x1c8] sm:$0xff] %vm107_vm0, %v2764_v4  ;;  %3665 = vrcp.f32 %v2510_v59  ;;  %v2032_v38 = vadd.f32 1.0, %v3638_v6  ;;  %v2942_v48 = vmul.f32 -1.442695, %v1318_v46 }
 0x25a   :  { %v3642_v23 = vpop.eup %3641  ;;  %2827 = vst.msk [vmem:[%s6243_s8 + $0x1c0] sm:$0xff] %vm107_vm0, %v2763_v3  ;;  %3667 = vrcp.f32 %v2509_v40  ;;  %v2031_v20 = vadd.f32 1.0, %v3640_v17  ;;  %v2941_v39 = vmul.f32 -1.442695, %v1317_v42  ;;  %v1284_v12 = vpop.xlane.xlu1 %1283  ;;  %v6424_v3 = vld [vmem:[#allocation63_spill] sm:$0xff]  ;;  %v3781_v42 = vld [vmem:[%s6236_s1 + $0x1d8] sm:$0xff] }
 0x25b   :  { %v1281_v30 = vpop.xlane.xlu0 %1280  ;;  %v3644_v54 = vpop.eup %3643  ;;  %3669 = vrcp.f32 %v2032_v38  ;;  %v1350_v41 = vadd.f32 %v4601_v26, %v1284_v12  ;;  %v2222_v15 = vmul.f32 %v3642_v23, %v6422_v58 }
 0x25c   :  { %v1349_v55 = vadd.f32 %v4601_v26, %v1281_v30  ;;  %v3646_v61 = vpop.eup %3645  ;;  %3671 = vrcp.f32 %v2031_v20  ;;  %v2221_v31 = vmul.f32 %v3644_v54, %v6423_v47  ;;  %v3782_v20 = vld [vmem:[%s6236_s1 + $0x1d0] sm:$0xff] }
 0x25d   :  { %v3648_v51 = vpop.eup %3647  ;;  %v2064_v57 = vadd.f32 1.0, %v3646_v61  ;;  %3673 = vpow2.f32 %v2942_v48  ;;  %v2974_v63 = vmul.f32 -1.442695, %v1350_v41  ;;  %v6425_v48 = vld [vmem:[#allocation64_spill] sm:$0xff] }
 0x25e   :  { %v3650_v1 = vpop.eup %3649  ;;  %v2063_v37 = vadd.f32 1.0, %v3648_v51  ;;  %3675 = vpow2.f32 %v2941_v39  ;;  %v2973_v29 = vmul.f32 -1.442695, %v1349_v55  ;;  %v1648_v56 = vpop.xlane.xlu1 %1647 }
 0x25f   :  { %v1645_v32 = vpop.xlane.xlu0 %1644  ;;  %v3652_v27 = vpop.eup %3651  ;;  %3677 = vrcp.f32 %v2064_v57  ;;  %v1778_v36 = vadd.f32 %v4607_v0, %v1648_v56  ;;  %v2254_v40 = vmul.f32 %v3650_v1, %v6424_v3 }
 0x260   :  { %v1777_v18 = vadd.f32 %v4607_v0, %v1645_v32  ;;  %v3654_v16 = vpop.eup %3653  ;;  %3679 = vrcp.f32 %v2063_v37  ;;  %v2253_v23 = vmul.f32 %v3652_v27, %v6425_v48  ;;  %v3783_v27 = vld [vmem:[%s6236_s1 + $0xe8] sm:$0xff] }
 0x261   :  { %v3656_v26 = vpop.eup %3655  ;;  %v2480_v33 = vadd.f32 1.0, %v3654_v16  ;;  %3681 = vpow2.f32 %v2974_v63  ;;  %v3006_v45 = vmul.f32 -1.442695, %v1778_v36 }
 0x262   :  { %v3658_v52 = vpop.eup %3657  ;;  %v2479_v28 = vadd.f32 1.0, %v3656_v26  ;;  %3683 = vpow2.f32 %v2973_v29  ;;  %v3005_v50 = vmul.f32 -1.442695, %v1777_v18  ;;  %v1744_v10 = vpop.xlane.xlu1 %1743  ;;  %v3784_v26 = vld [vmem:[%s6236_s1 + $0xe0] sm:$0xff] }
 0x263   :  { %v1741_v53 = vpop.xlane.xlu0 %1740  ;;  %v3660_v34 = vpop.eup %3659  ;;  %v2670_v5 = vmul.f32 %v3779_v21, %v3658_v52  ;;  %3685 = vrcp.f32 %v2480_v33  ;;  %v1810_v14 = vadd.f32 %v4607_v0, %v1744_v10 }
 0x264   :  { %v1809_v2 = vadd.f32 %v4607_v0, %v1741_v53  ;;  %v3662_v60 = vpop.eup %3661  ;;  %v2669_v22 = vmul.f32 %v3780_v8, %v3660_v34  ;;  %3687 = vrcp.f32 %v2479_v28 }
 0x265   :  { %v3664_v62 = vpop.eup %3663  ;;  %v2734_v7 = vadd.f32 %v2670_v5, %v2222_v15  ;;  %v2512_v25 = vadd.f32 1.0, %v3662_v60  ;;  %3689 = vpow2.f32 %v3006_v45  ;;  %v3038_v9 = vmul.f32 -1.442695, %v1810_v14 }
 0x266   :  { %v3666_v4 = vpop.eup %3665  ;;  %v2733_v59 = vadd.f32 %v2669_v22, %v2221_v31  ;;  %v2511_v46 = vadd.f32 1.0, %v3664_v62  ;;  %3691 = vpow2.f32 %v3005_v50  ;;  %v3037_v6 = vmul.f32 -1.442695, %v1809_v2 }
 0x267   :  { %v3668_v0 = vpop.eup %3667  ;;  %2798 = vst.msk [vmem:[%s6243_s8 + $0xd8] sm:$0xff] %vm107_vm0, %v2734_v7  ;;  %v2702_v17 = vmul.f32 %v3781_v42, %v3666_v4  ;;  %3693 = vrcp.f32 %v2512_v25  ;;  %v3787_v4 = vld [vmem:[%s6236_s1 + $0xf8] sm:$0xff] }
 0x268   :  { %v3670_v38 = vpop.eup %3669  ;;  %2797 = vst.msk [vmem:[%s6243_s8 + $0xd0] sm:$0xff] %vm107_vm0, %v2733_v59  ;;  %v2701_v39 = vmul.f32 %v3782_v20, %v3668_v0  ;;  %3695 = vrcp.f32 %v2511_v46  ;;  %v3788_v0 = vld [vmem:[%s6236_s1 + $0xf0] sm:$0xff] }
 0x269   :  { %v3672_v12 = vpop.eup %3671  ;;  %v2766_v30 = vadd.f32 %v2702_v17, %v2254_v40  ;;  %3697 = vpow2.f32 %v3038_v9  ;;  %v2224_v32 = vmul.f32 %v3670_v38, %v5274_v43 }
 0x26a   :  { %v3674_v54 = vpop.eup %3673  ;;  %v2765_v41 = vadd.f32 %v2701_v39, %v2253_v23  ;;  %3699 = vpow2.f32 %v3037_v6  ;;  %v2223_v16 = vmul.f32 %v3672_v12, %v5293_v11  ;;  %v3785_v11 = vld [vmem:[%s6236_s1 + $0x1e8] sm:$0xff] }
 0x26b   :  { %v3676_v55 = vpop.eup %3675  ;;  %2830 = vst.msk [vmem:[%s6243_s8 + $0x1d8] sm:$0xff] %vm107_vm0, %v2766_v30  ;;  %v2034_v1 = vadd.f32 1.0, %v3674_v54 }
 0x26c   :  { %v3678_v61 = vpop.eup %3677  ;;  %2829 = vst.msk [vmem:[%s6243_s8 + $0x1d0] sm:$0xff] %vm107_vm0, %v2765_v41  ;;  %v2033_v29 = vadd.f32 1.0, %v3676_v55 }
 0x26d   :  { %v3680_v51 = vpop.eup %3679  ;;  %3701 = vrcp.f32 %v2034_v1  ;;  %v2256_v34 = vmul.f32 %v3678_v61, %v5296_v13  ;;  %v3786_v13 = vld [vmem:[%s6236_s1 + $0x1e0] sm:$0xff] }
 0x26e   :  { %v3682_v57 = vpop.eup %3681  ;;  %3703 = vrcp.f32 %v2033_v29  ;;  %v2255_v14 = vmul.f32 %v3680_v51, %v5308_v49 }
 0x26f   :  { %v3684_v63 = vpop.eup %3683  ;;  %v2066_v58 = vadd.f32 1.0, %v3682_v57 }
 0x270   :  { %v3686_v37 = vpop.eup %3685  ;;  %v2065_v50 = vadd.f32 1.0, %v3684_v63 }
 0x271   :  { %v3688_v56 = vpop.eup %3687  ;;  %v2672_v36 = vmul.f32 %v3783_v27, %v3686_v37 }
 0x272   :  { %v3690_v18 = vpop.eup %3689  ;;  %v2671_v33 = vmul.f32 %v3784_v26, %v3688_v56 }
 0x273   :  { %v3692_v45 = vpop.eup %3691  ;;  %v2736_v52 = vadd.f32 %v2672_v36, %v2224_v32  ;;  %v2482_v15 = vadd.f32 1.0, %v3690_v18 }
 0x274   :  { %v3694_v28 = vpop.eup %3693  ;;  %v2735_v43 = vadd.f32 %v2671_v33, %v2223_v16  ;;  %v2481_v10 = vadd.f32 1.0, %v3692_v45 }
 0x275   :  { %v3696_v53 = vpop.eup %3695  ;;  %2800 = vst.msk [vmem:[%s6243_s8 + $0xe8] sm:$0xff] %vm107_vm0, %v2736_v52  ;;  %v2704_v21 = vmul.f32 %v3785_v11, %v3694_v28  ;;  %3705 = vrcp.f32 %v2482_v15 }
 0x276   :  { %v3698_v5 = vpop.eup %3697  ;;  %2799 = vst.msk [vmem:[%s6243_s8 + $0xe0] sm:$0xff] %vm107_vm0, %v2735_v43  ;;  %v2703_v2 = vmul.f32 %v3786_v13, %v3696_v53  ;;  %3707 = vrcp.f32 %v2481_v10 }
 0x277   :  { %v3700_v60 = vpop.eup %3699  ;;  %v2768_v47 = vadd.f32 %v2704_v21, %v2256_v34  ;;  %3709 = vrcp.f32 %v2066_v58  ;;  %v2514_v31 = vadd.f32 1.0, %v3698_v5 }
 0x278   :  { %v2767_v8 = vadd.f32 %v2703_v2, %v2255_v14  ;;  %3711 = vrcp.f32 %v2065_v50  ;;  %v2513_v22 = vadd.f32 1.0, %v3700_v60 }
 0x279   :  { %2832 = vst.msk [vmem:[%s6243_s8 + $0x1e8] sm:$0xff] %vm107_vm0, %v2768_v47  ;;  %3713 = vrcp.f32 %v2514_v31 }
 0x27a   :  { %2831 = vst.msk [vmem:[%s6243_s8 + $0x1e0] sm:$0xff] %vm107_vm0, %v2767_v8  ;;  %3715 = vrcp.f32 %v2513_v22  ;;  %v3702_v49 = vpop.eup %3701 }
 0x27b   :  { %v3704_v62 = vpop.eup %3703  ;;  %v2226_v9 = vmul.f32 %v3702_v49, %v5381_v35 }
 0x27c   :  { %v2225_v6 = vmul.f32 %v3704_v62, %v5423_v19  ;;  %v3789_v19 = vld [vmem:[%s6236_s1 + $0x1f8] sm:$0xff] }
 0x282   :  { %v3706_v7 = vpop.eup %3705 }
 0x283   :  { %v3708_v25 = vpop.eup %3707  ;;  %v2674_v59 = vmul.f32 %v3787_v4, %v3706_v7 }
 0x284   :  { %v3710_v46 = vpop.eup %3709  ;;  %v2673_v3 = vmul.f32 %v3788_v0, %v3708_v25 }
 0x285   :  { %v3712_v40 = vpop.eup %3711  ;;  %v2738_v42 = vadd.f32 %v2674_v59, %v2226_v9  ;;  %v2258_v35 = vmul.f32 %v3710_v46, %v5430_v24  ;;  %v3790_v24 = vld [vmem:[%s6236_s1 + $0x1f0] sm:$0xff] }
 0x286   :  { %v3714_v17 = vpop.eup %3713  ;;  %v2737_v38 = vadd.f32 %v2673_v3, %v2225_v6  ;;  %v2257_v20 = vmul.f32 %v3712_v40, %v5445_v44 }
 0x287   :  { %v3716_v48 = vpop.eup %3715  ;;  %2802 = vst.msk [vmem:[%s6243_s8 + $0xf8] sm:$0xff] %vm107_vm0, %v2738_v42  ;;  %v2706_v23 = vmul.f32 %v3789_v19, %v3714_v17 }
 0x288   :  { %2801 = vst.msk [vmem:[%s6243_s8 + $0xf0] sm:$0xff] %vm107_vm0, %v2737_v38  ;;  %v2705_v39 = vmul.f32 %v3790_v24, %v3716_v48 }
 0x289   :  { %v2770_v12 = vadd.f32 %v2706_v23, %v2258_v35 }
 0x28a   :  { %v2769_v30 = vadd.f32 %v2705_v39, %v2257_v20 }
 0x28b   :  { %2834 = vst.msk [vmem:[%s6243_s8 + $0x1f8] sm:$0xff] %vm107_vm0, %v2770_v12 }
 0x28c   :  { %2833 = vst.msk [vmem:[%s6243_s8 + $0x1f0] sm:$0xff] %vm107_vm0, %v2769_v30 }
 0x28d   :  { %2839 = vsyncpa [#allocation3], 1 }

</bundles_post_ra>
